<compile_context>
chip_gen: v7x
topology: tpu7x:2x2x1
jax: 0.10.0
libtpu: 0.0.40
codegen_flags: <defaults>
</compile_context>

<pallas_src>
import numpy as np
import jax
import jax.numpy as jnp
from jax.experimental import pallas as pl
from jax.experimental.pallas import tpu as pltpu

MAX_L = 3      # max order (excluding l), as in module __init__ max_l
MAX_N = 5      # roots per l
CUTOFF = 5.0   # cutoff radius
LANES = 512    # lane width of the sample tiling (multiple of 128)
R_EPS = 1e-12  # lower clamp so r == 0 does not produce inf/NaN

# Precomputed zeros of the spherical Bessel functions j_l (rows l = 0, 1, 2,
# first 5 roots each).  Replaces the registered SPHERICAL_BESSEL_ROOTS buffer.
SPHERICAL_BESSEL_ROOTS = np.array(
    [
        [3.141592653589793, 6.283185307179586, 9.424777960769380, 12.566370614359172, 15.707963267948966],
        [4.493409457909064, 7.725251836937707, 10.904121659428899, 14.066193912831473, 17.220755271930768],
        [5.763459196894550, 9.095011330476355, 12.322940970566582, 15.514603010886749, 18.689036355362822],
    ],
    dtype=np.float64,
)


def _sph_jl(l, x, xp):
    """Rayleigh-formula spherical Bessel j_l (matches sympy.expand_func(jn(l, x)))."""
    s, c = xp.sin(x), xp.cos(x)
    if l == 0:
        return s / x
    if l == 1:
        return s / (x * x) - c / x
    if l == 2:
        return (3.0 / x**3 - 1.0 / x) * s - (3.0 / x**2) * c
    if l == 3:
        return (15.0 / x**4 - 6.0 / x**2) * s - (15.0 / x**3 - 1.0 / x) * c
    raise NotImplementedError(f"j_{l} not implemented")


# ---- host-side constants baked into the kernel as Python float immediates ----
_ROOTS = SPHERICAL_BESSEL_ROOTS[:MAX_L, :MAX_N]                       # float64
_FACTOR = float(np.sqrt(2.0 / CUTOFF**3))
_COEF = _ROOTS / CUTOFF                                               # x = r_c * coef
_INV_COEF = CUTOFF / _ROOTS                                           # 1/x = (1/r_c) * inv_coef
_NORM = np.stack(
    [_FACTOR / np.abs(_sph_jl(l + 1, _ROOTS[l], np)) for l in range(MAX_L)]
)                                                                     # float64 (MAX_L, MAX_N)

# Cody-Waite split of pi/2 (float32 hi + residual) for the shared sincos.
_PIO2_HI = float(np.float32(np.pi / 2.0))
_PIO2_LO = float(np.pi / 2.0 - np.float64(_PIO2_HI))
_TWO_OVER_PI = float(2.0 / np.pi)


def _sincos(x):
    """sin(x) and cos(x) for x in [0, ~20] via ONE shared quadrant reduction.

    Replaces two independent transcendental expansions per argument with one
    range reduction + two short Horner polynomials on [-pi/4, pi/4] (VPU only).
    """
    q = jnp.floor(x * _TWO_OVER_PI + 0.5)          # nearest multiple of pi/2
    t = x - q * _PIO2_HI
    t = t - q * _PIO2_LO                           # |t| <= pi/4
    t2 = t * t
    s = t * (1.0 + t2 * (-1.0 / 6.0 + t2 * (1.0 / 120.0
             + t2 * (-1.0 / 5040.0 + t2 * (1.0 / 362880.0)))))
    c = 1.0 + t2 * (-0.5 + t2 * (1.0 / 24.0
             + t2 * (-1.0 / 720.0 + t2 * (1.0 / 40320.0))))
    m = q - 4.0 * jnp.floor(q * 0.25)              # quadrant: q mod 4 in {0,1,2,3}
    swap = jnp.logical_or(m == 1.0, m == 3.0)
    sin_mag = jnp.where(swap, c, s)
    cos_mag = jnp.where(swap, s, c)
    sin_x = jnp.where(m >= 2.0, -sin_mag, sin_mag)
    cos_x = jnp.where(jnp.logical_or(m == 1.0, m == 2.0), -cos_mag, cos_mag)
    return sin_x, cos_x


def _sbf_kernel(r_ref, out_ref):
    """Elementwise spherical-Bessel basis expansion.

    r_ref:   (r_tile, LANES)               f32 distances
    out_ref: (MAX_L*MAX_N, r_tile, LANES)  basis values (basis index leading)
    """
    r_c = jnp.clip(r_ref[...], R_EPS, CUTOFF)      # r_c[r_c > cutoff] = cutoff (+ tiny-r guard)
    # TODO(synk): for r well below ~1e-3 the l>=1 terms inherit the reference
    # formula's float32 cancellation (same as the PyTorch module run in f32).

    # One approx reciprocal (EUP slot) + one Newton-Raphson step (2 VPU ops).
    inv_r = pl.reciprocal(r_c, approx=True)
    inv_r = inv_r * (2.0 - r_c * inv_r)
    inv_r2 = inv_r * inv_r
    inv_r3 = inv_r2 * inv_r

    # ---- l = 0 : roots are k*pi -> one sincos + Chebyshev recurrence ----
    theta = r_c * float(np.pi / CUTOFF)            # x_k = k * theta
    s1, c1 = _sincos(theta)
    two_c1 = 2.0 * c1
    s_prev = jnp.zeros_like(s1)                    # sin(0 * theta)
    s_cur = s1
    for k in range(MAX_N):
        if k > 0:
            s_prev, s_cur = s_cur, two_c1 * s_cur - s_prev
        scale0 = float(_INV_COEF[0, k] * _NORM[0, k])
        # j0(x_k)*norm = sin(x_k)/x_k * norm = s_k * inv_r * (icoef*norm)
        out_ref[k, :, :] = (s_cur * inv_r * scale0).astype(out_ref.dtype)

    # ---- l = 1, 2 : one shared sincos per (l, k) ----
    for l in (1, 2):
        for k in range(MAX_N):
            coef = float(_COEF[l, k])              # root / cutoff
            x = r_c * coef
            s, c = _sincos(x)
            if l == 1:
                scale = float(_INV_COEF[l, k] ** 2 * _NORM[l, k])
                jl = (s - x * c) * (inv_r2 * scale)            # (sin - x cos)/x^2
            else:  # l == 2
                scale = float(_INV_COEF[l, k] ** 3 * _NORM[l, k])
                jl = ((3.0 - x * x) * s - 3.0 * x * c) * (inv_r3 * scale)
            # dense, unmasked (r_tile, LANES) slab store
            out_ref[l * MAX_N + k, :, :] = jl.astype(out_ref.dtype)


def _round_up(a, b):
    return ((a + b - 1) // b) * b


def _default_block_rows():
    """Tile height chosen per TPU generation to stay inside default scoped VMEM."""
    try:
        kind = jax.devices()[0].device_kind.lower()
    except Exception:
        return 128
    if ("v6" in kind) or ("v7" in kind) or ("7x" in kind):
        return 192      # ~12 MiB double-buffered blocks, fits the 32 MiB default
    return 128          # ~8 MiB, safe under v5e's 16 MiB default scoped-VMEM limit


def spherical_bessel_sbf(r, *, block_rows=None, basis_major=False, out_dtype=jnp.float32):
    """[N] distances -> spherical Bessel basis expansion.

    Default: returns [N, MAX_L*MAX_N] in `out_dtype` (the PyTorch module layout;
    costs one XLA transpose over the output).
    basis_major=True: returns the padded basis-major [MAX_L*MAX_N, n_pad] slab
    with no extra HBM pass; columns >= N correspond to padded samples (r=cutoff).
    """
    assert r.ndim == 1
    n = r.shape[0]
    n_basis = MAX_L * MAX_N

    if block_rows is None:
        block_rows = _default_block_rows()
    sub = 8 if jnp.dtype(out_dtype).itemsize >= 4 else 16   # sublane granularity
    block_rows = max(sub, _round_up(int(block_rows), sub))

    # Sample tiling: rows x LANES; rows padded to the sublane granularity.
    rows = max(1, pl.cdiv(n, LANES))
    rows_sub = _round_up(rows, sub)
    r_tile = min(block_rows, rows_sub)
    if rows_sub >= 2 * sub:
        # Prefer an even number of >= 2 grid steps so both v7x TensorCores get
        # balanced work (also reduces tail padding for odd step counts).
        steps = int(pl.cdiv(rows_sub, r_tile))
        steps = max(2, steps + (steps % 2))
        r_tile = min(r_tile, _round_up(int(pl.cdiv(rows_sub, steps)), sub))
    rows_total = _round_up(rows_sub, r_tile)
    n_pad = rows_total * LANES

    r_f32 = r.astype(jnp.float32)
    # pad with CUTOFF so padded lanes stay finite; they are sliced off below
    r_padded = jnp.full((n_pad,), CUTOFF, dtype=jnp.float32).at[:n].set(r_f32)
    r2d = r_padded.reshape(rows_total, LANES)

    out = pl.pallas_call(
        _sbf_kernel,
        out_shape=jax.ShapeDtypeStruct((n_basis, rows_total, LANES), out_dtype),
        grid=(rows_total // r_tile,),
        in_specs=[pl.BlockSpec((r_tile, LANES), lambda i: (i, 0))],
        out_specs=pl.BlockSpec((n_basis, r_tile, LANES), lambda i: (0, i, 0)),
        compiler_params=pltpu.CompilerParams(dimension_semantics=("parallel",)),
    )(r2d)

    out_flat = out.reshape(n_basis, n_pad)
    if basis_major:
        # Fast path: no output transpose / no extra HBM traffic.
        return out_flat
    # Module layout [N, n_basis] (pays one XLA transpose over the output).
    return out_flat.T[:n, :]


def _reference_sbf(r_np):
    """Float64 numpy reference mirroring SphericalBesselFunction._call_sbf."""
    r64 = np.asarray(r_np, dtype=np.float64)
    r_c = np.minimum(r64, CUTOFF)
    factor = np.sqrt(2.0 / CUTOFF**3)
    cols = []
    for l in range(MAX_L):
        root = _ROOTS[l]
        x = r_c[:, None] * root[None, :] / CUTOFF
        cols.append(_sph_jl(l, x, np) * factor / np.abs(_sph_jl(l + 1, root[None, :], np)))
    return np.concatenate(cols, axis=1)


# TODO(synk): the smooth=True path (_call_smooth_sbf / _get_lambda_func) is not
# implemented; this kernel covers the default non-smooth forward only.

if __name__ == "__main__":
    key = jax.random.PRNGKey(0)
    k1, k2 = jax.random.split(key)

    # 1) small 1-D distance tensor; some entries exceed the cutoff (exercises clamp)
    r = jax.random.uniform(k1, (16,), dtype=jnp.float32, minval=0.5, maxval=6.0)
    out = jax.block_until_ready(spherical_bessel_sbf(r))
    assert out.shape == (16, MAX_L * MAX_N)
    ref = _reference_sbf(np.asarray(r))
    assert np.allclose(np.asarray(out), ref, rtol=1e-4, atol=1e-5)

    # 2) non-multiple-of-LANES length + multi-step grid (block_rows=8)
    r2 = jax.random.uniform(k2, (5000,), dtype=jnp.float32, minval=0.5, maxval=6.0)
    out2 = jax.block_until_ready(spherical_bessel_sbf(r2, block_rows=8))
    assert out2.shape == (5000, MAX_L * MAX_N)
    ref2 = _reference_sbf(np.asarray(r2))
    assert np.allclose(np.asarray(out2), ref2, rtol=1e-4, atol=1e-5)

    # 3) basis-major fast path: padded [15, n_pad] slab, no output transpose
    out3 = jax.block_until_ready(spherical_bessel_sbf(r2, basis_major=True))
    assert out3.shape[0] == MAX_L * MAX_N and out3.shape[1] >= 5000
    assert np.allclose(np.asarray(out3)[:, :5000], ref2.T, rtol=1e-4, atol=1e-5)

    # 4) bf16 output option (halves the writeback on HBM-bound v5e/v6e)
    out4 = jax.block_until_ready(spherical_bessel_sbf(r2, out_dtype=jnp.bfloat16))
    assert out4.dtype == jnp.bfloat16 and out4.shape == (5000, MAX_L * MAX_N)
    assert np.allclose(np.asarray(out4, dtype=np.float32), ref2, rtol=2e-2, atol=5e-3)

    print("KERNEL_OK")
</pallas_src>

<mosaic_0001>
module attributes {stable_mosaic.version = 11 : i64} {
  func.func @_sbf_kernel(%arg0: i32, %arg1: memref<8x512xf32, #tpu.memory_space<vmem>>, %arg2: memref<15x8x512xf32, #tpu.memory_space<vmem>>) attributes {dimension_semantics = [#tpu.dimension_semantics<parallel>], iteration_bounds = array<i64: 1>, scalar_prefetch = 0 : i64, scratch_operands = 0 : i64, tpu.core_type = #tpu.core_type<tc>, window_params = [{transform_indices = @transform_0, window_bounds = array<i64: 8, 512>}, {transform_indices = @transform_1, window_bounds = array<i64: 15, 8, 512>}]} {
    %c0 = arith.constant 0 : index
    %c0_0 = arith.constant 0 : index
    %0 = vector.load %arg1[%c0, %c0_0] : memref<8x512xf32, #tpu.memory_space<vmem>>, vector<8x512xf32>
    %cst = arith.constant 9.99999996E-13 : f32
    %cst_1 = arith.constant 5.000000e+00 : f32
    %1 = vector.broadcast %cst : f32 to vector<8x512xf32>
    %2 = arith.maximumf %1, %0 : vector<8x512xf32>
    %3 = vector.broadcast %cst_1 : f32 to vector<8x512xf32>
    %4 = arith.minimumf %3, %2 : vector<8x512xf32>
    %5 = tpu.reciprocal %4 {approx = true} : vector<8x512xf32> -> vector<8x512xf32>
    %6 = arith.mulf %4, %5 : vector<8x512xf32>
    %cst_2 = arith.constant 2.000000e+00 : f32
    %7 = vector.broadcast %cst_2 : f32 to vector<8x512xf32>
    %8 = arith.subf %7, %6 : vector<8x512xf32>
    %9 = arith.mulf %5, %8 : vector<8x512xf32>
    %10 = arith.mulf %9, %9 : vector<8x512xf32>
    %11 = arith.mulf %10, %9 : vector<8x512xf32>
    %cst_3 = arith.constant 0.628318548 : f32
    %12 = vector.broadcast %cst_3 : f32 to vector<8x512xf32>
    %13 = arith.mulf %4, %12 : vector<8x512xf32>
    %cst_4 = arith.constant 0.636619746 : f32
    %14 = vector.broadcast %cst_4 : f32 to vector<8x512xf32>
    %15 = arith.mulf %13, %14 : vector<8x512xf32>
    %cst_5 = arith.constant 5.000000e-01 : f32
    %16 = vector.broadcast %cst_5 : f32 to vector<8x512xf32>
    %17 = arith.addf %15, %16 : vector<8x512xf32>
    %18 = math.floor %17 : vector<8x512xf32>
    %cst_6 = arith.constant 1.57079637 : f32
    %19 = vector.broadcast %cst_6 : f32 to vector<8x512xf32>
    %20 = arith.mulf %18, %19 : vector<8x512xf32>
    %21 = arith.subf %13, %20 : vector<8x512xf32>
    %cst_7 = arith.constant -4.37113883E-8 : f32
    %22 = vector.broadcast %cst_7 : f32 to vector<8x512xf32>
    %23 = arith.mulf %18, %22 : vector<8x512xf32>
    %24 = arith.subf %21, %23 : vector<8x512xf32>
    %25 = arith.mulf %24, %24 : vector<8x512xf32>
    %cst_8 = arith.constant 2.75573188E-6 : f32
    %26 = vector.broadcast %cst_8 : f32 to vector<8x512xf32>
    %27 = arith.mulf %25, %26 : vector<8x512xf32>
    %cst_9 = arith.constant -1.98412701E-4 : f32
    %28 = vector.broadcast %cst_9 : f32 to vector<8x512xf32>
    %29 = arith.addf %28, %27 : vector<8x512xf32>
    %30 = arith.mulf %25, %29 : vector<8x512xf32>
    %cst_10 = arith.constant 0.00833333377 : f32
    %31 = vector.broadcast %cst_10 : f32 to vector<8x512xf32>
    %32 = arith.addf %31, %30 : vector<8x512xf32>
    %33 = arith.mulf %25, %32 : vector<8x512xf32>
    %cst_11 = arith.constant -0.166666672 : f32
    %34 = vector.broadcast %cst_11 : f32 to vector<8x512xf32>
    %35 = arith.addf %34, %33 : vector<8x512xf32>
    %36 = arith.mulf %25, %35 : vector<8x512xf32>
    %cst_12 = arith.constant 1.000000e+00 : f32
    %37 = vector.broadcast %cst_12 : f32 to vector<8x512xf32>
    %38 = arith.addf %37, %36 : vector<8x512xf32>
    %39 = arith.mulf %24, %38 : vector<8x512xf32>
    %cst_13 = arith.constant 2.48015876E-5 : f32
    %40 = vector.broadcast %cst_13 : f32 to vector<8x512xf32>
    %41 = arith.mulf %25, %40 : vector<8x512xf32>
    %cst_14 = arith.constant -0.00138888892 : f32
    %42 = vector.broadcast %cst_14 : f32 to vector<8x512xf32>
    %43 = arith.addf %42, %41 : vector<8x512xf32>
    %44 = arith.mulf %25, %43 : vector<8x512xf32>
    %cst_15 = arith.constant 0.0416666679 : f32
    %45 = vector.broadcast %cst_15 : f32 to vector<8x512xf32>
    %46 = arith.addf %45, %44 : vector<8x512xf32>
    %47 = arith.mulf %25, %46 : vector<8x512xf32>
    %cst_16 = arith.constant -5.000000e-01 : f32
    %48 = vector.broadcast %cst_16 : f32 to vector<8x512xf32>
    %49 = arith.addf %48, %47 : vector<8x512xf32>
    %50 = arith.mulf %25, %49 : vector<8x512xf32>
    %cst_17 = arith.constant 1.000000e+00 : f32
    %51 = vector.broadcast %cst_17 : f32 to vector<8x512xf32>
    %52 = arith.addf %51, %50 : vector<8x512xf32>
    %cst_18 = arith.constant 2.500000e-01 : f32
    %53 = vector.broadcast %cst_18 : f32 to vector<8x512xf32>
    %54 = arith.mulf %18, %53 : vector<8x512xf32>
    %55 = math.floor %54 : vector<8x512xf32>
    %cst_19 = arith.constant 4.000000e+00 : f32
    %56 = vector.broadcast %cst_19 : f32 to vector<8x512xf32>
    %57 = arith.mulf %56, %55 : vector<8x512xf32>
    %58 = arith.subf %18, %57 : vector<8x512xf32>
    %cst_20 = arith.constant 1.000000e+00 : f32
    %59 = vector.broadcast %cst_20 : f32 to vector<8x512xf32>
    %60 = arith.cmpf oeq, %58, %59 : vector<8x512xf32>
    %cst_21 = arith.constant 3.000000e+00 : f32
    %61 = vector.broadcast %cst_21 : f32 to vector<8x512xf32>
    %62 = arith.cmpf oeq, %58, %61 : vector<8x512xf32>
    %63 = arith.ori %60, %62 : vector<8x512xi1>
    %64 = arith.select %63, %52, %39 : vector<8x512xi1>, vector<8x512xf32>
    %65 = arith.select %63, %39, %52 : vector<8x512xi1>, vector<8x512xf32>
    %cst_22 = arith.constant 2.000000e+00 : f32
    %66 = vector.broadcast %cst_22 : f32 to vector<8x512xf32>
    %67 = arith.cmpf oge, %58, %66 : vector<8x512xf32>
    %cst_23 = arith.constant 0.000000e+00 : f32
    %68 = vector.broadcast %cst_23 : f32 to vector<8x512xf32>
    %69 = arith.subf %68, %64 : vector<8x512xf32>
    %70 = arith.select %67, %69, %64 : vector<8x512xi1>, vector<8x512xf32>
    %cst_24 = arith.constant 1.000000e+00 : f32
    %71 = vector.broadcast %cst_24 : f32 to vector<8x512xf32>
    %72 = arith.cmpf oeq, %58, %71 : vector<8x512xf32>
    %cst_25 = arith.constant 2.000000e+00 : f32
    %73 = vector.broadcast %cst_25 : f32 to vector<8x512xf32>
    %74 = arith.cmpf oeq, %58, %73 : vector<8x512xf32>
    %75 = arith.ori %72, %74 : vector<8x512xi1>
    %cst_26 = arith.constant 0.000000e+00 : f32
    %76 = vector.broadcast %cst_26 : f32 to vector<8x512xf32>
    %77 = arith.subf %76, %65 : vector<8x512xf32>
    %78 = arith.select %75, %77, %65 : vector<8x512xi1>, vector<8x512xf32>
    %cst_27 = arith.constant 2.000000e+00 : f32
    %79 = vector.broadcast %cst_27 : f32 to vector<8x512xf32>
    %80 = arith.mulf %79, %78 : vector<8x512xf32>
    %cst_28 = arith.constant 0.000000e+00 : f32
    %81 = vector.broadcast %cst_28 : f32 to vector<8x512xf32>
    %82 = arith.mulf %70, %9 : vector<8x512xf32>
    %cst_29 = arith.constant 0.632455527 : f32
    %83 = vector.broadcast %cst_29 : f32 to vector<8x512xf32>
    %84 = arith.mulf %82, %83 : vector<8x512xf32>
    %c0_30 = arith.constant 0 : index
    %c0_31 = arith.constant 0 : index
    %c0_32 = arith.constant 0 : index
    %85 = vector.load %arg2[%c0_30, %c0_31, %c0_32] : memref<15x8x512xf32, #tpu.memory_space<vmem>>, vector<1x8x512xf32>
    %86 = vector.shape_cast %85 : vector<1x8x512xf32> to vector<8x512xf32>
    %87 = vector.shape_cast %84 : vector<8x512xf32> to vector<1x8x512xf32>
    tpu.vector_store %arg2[%c0_30, %c0_31, %c0_32], %87 {strides = array<i32>} : memref<15x8x512xf32, #tpu.memory_space<vmem>>, vector<1x8x512xf32>,
    %88 = arith.mulf %80, %70 : vector<8x512xf32>
    %89 = arith.subf %88, %81 : vector<8x512xf32>
    %90 = arith.mulf %89, %9 : vector<8x512xf32>
    %cst_33 = arith.constant 0.632455527 : f32
    %91 = vector.broadcast %cst_33 : f32 to vector<8x512xf32>
    %92 = arith.mulf %90, %91 : vector<8x512xf32>
    %c1 = arith.constant 1 : index
    %c0_34 = arith.constant 0 : index
    %c0_35 = arith.constant 0 : index
    %93 = vector.load %arg2[%c1, %c0_34, %c0_35] : memref<15x8x512xf32, #tpu.memory_space<vmem>>, vector<1x8x512xf32>
    %94 = vector.shape_cast %93 : vector<1x8x512xf32> to vector<8x512xf32>
    %95 = vector.shape_cast %92 : vector<8x512xf32> to vector<1x8x512xf32>
    tpu.vector_store %arg2[%c1, %c0_34, %c0_35], %95 {strides = array<i32>} : memref<15x8x512xf32, #tpu.memory_space<vmem>>, vector<1x8x512xf32>,
    %96 = arith.mulf %80, %89 : vector<8x512xf32>
    %97 = arith.subf %96, %70 : vector<8x512xf32>
    %98 = arith.mulf %97, %9 : vector<8x512xf32>
    %cst_36 = arith.constant 0.632455527 : f32
    %99 = vector.broadcast %cst_36 : f32 to vector<8x512xf32>
    %100 = arith.mulf %98, %99 : vector<8x512xf32>
    %c2 = arith.constant 2 : index
    %c0_37 = arith.constant 0 : index
    %c0_38 = arith.constant 0 : index
    %101 = vector.load %arg2[%c2, %c0_37, %c0_38] : memref<15x8x512xf32, #tpu.memory_space<vmem>>, vector<1x8x512xf32>
    %102 = vector.shape_cast %101 : vector<1x8x512xf32> to vector<8x512xf32>
    %103 = vector.shape_cast %100 : vector<8x512xf32> to vector<1x8x512xf32>
    tpu.vector_store %arg2[%c2, %c0_37, %c0_38], %103 {strides = array<i32>} : memref<15x8x512xf32, #tpu.memory_space<vmem>>, vector<1x8x512xf32>,
    %104 = arith.mulf %80, %97 : vector<8x512xf32>
    %105 = arith.subf %104, %89 : vector<8x512xf32>
    %106 = arith.mulf %105, %9 : vector<8x512xf32>
    %cst_39 = arith.constant 0.632455527 : f32
    %107 = vector.broadcast %cst_39 : f32 to vector<8x512xf32>
    %108 = arith.mulf %106, %107 : vector<8x512xf32>
    %c3 = arith.constant 3 : index
    %c0_40 = arith.constant 0 : index
    %c0_41 = arith.constant 0 : index
    %109 = vector.load %arg2[%c3, %c0_40, %c0_41] : memref<15x8x512xf32, #tpu.memory_space<vmem>>, vector<1x8x512xf32>
    %110 = vector.shape_cast %109 : vector<1x8x512xf32> to vector<8x512xf32>
    %111 = vector.shape_cast %108 : vector<8x512xf32> to vector<1x8x512xf32>
    tpu.vector_store %arg2[%c3, %c0_40, %c0_41], %111 {strides = array<i32>} : memref<15x8x512xf32, #tpu.memory_space<vmem>>, vector<1x8x512xf32>,
    %112 = arith.mulf %80, %105 : vector<8x512xf32>
    %113 = arith.subf %112, %97 : vector<8x512xf32>
    %114 = arith.mulf %113, %9 : vector<8x512xf32>
    %cst_42 = arith.constant 0.632455527 : f32
    %115 = vector.broadcast %cst_42 : f32 to vector<8x512xf32>
    %116 = arith.mulf %114, %115 : vector<8x512xf32>
    %c4 = arith.constant 4 : index
    %c0_43 = arith.constant 0 : index
    %c0_44 = arith.constant 0 : index
    %117 = vector.load %arg2[%c4, %c0_43, %c0_44] : memref<15x8x512xf32, #tpu.memory_space<vmem>>, vector<1x8x512xf32>
    %118 = vector.shape_cast %117 : vector<1x8x512xf32> to vector<8x512xf32>
    %119 = vector.shape_cast %116 : vector<8x512xf32> to vector<1x8x512xf32>
    tpu.vector_store %arg2[%c4, %c0_43, %c0_44], %119 {strides = array<i32>} : memref<15x8x512xf32, #tpu.memory_space<vmem>>, vector<1x8x512xf32>,
    %cst_45 = arith.constant 0.898681879 : f32
    %120 = vector.broadcast %cst_45 : f32 to vector<8x512xf32>
    %121 = arith.mulf %4, %120 : vector<8x512xf32>
    %cst_46 = arith.constant 0.636619746 : f32
    %122 = vector.broadcast %cst_46 : f32 to vector<8x512xf32>
    %123 = arith.mulf %121, %122 : vector<8x512xf32>
    %cst_47 = arith.constant 5.000000e-01 : f32
    %124 = vector.broadcast %cst_47 : f32 to vector<8x512xf32>
    %125 = arith.addf %123, %124 : vector<8x512xf32>
    %126 = math.floor %125 : vector<8x512xf32>
    %cst_48 = arith.constant 1.57079637 : f32
    %127 = vector.broadcast %cst_48 : f32 to vector<8x512xf32>
    %128 = arith.mulf %126, %127 : vector<8x512xf32>
    %129 = arith.subf %121, %128 : vector<8x512xf32>
    %cst_49 = arith.constant -4.37113883E-8 : f32
    %130 = vector.broadcast %cst_49 : f32 to vector<8x512xf32>
    %131 = arith.mulf %126, %130 : vector<8x512xf32>
    %132 = arith.subf %129, %131 : vector<8x512xf32>
    %133 = arith.mulf %132, %132 : vector<8x512xf32>
    %cst_50 = arith.constant 2.75573188E-6 : f32
    %134 = vector.broadcast %cst_50 : f32 to vector<8x512xf32>
    %135 = arith.mulf %133, %134 : vector<8x512xf32>
    %cst_51 = arith.constant -1.98412701E-4 : f32
    %136 = vector.broadcast %cst_51 : f32 to vector<8x512xf32>
    %137 = arith.addf %136, %135 : vector<8x512xf32>
    %138 = arith.mulf %133, %137 : vector<8x512xf32>
    %cst_52 = arith.constant 0.00833333377 : f32
    %139 = vector.broadcast %cst_52 : f32 to vector<8x512xf32>
    %140 = arith.addf %139, %138 : vector<8x512xf32>
    %141 = arith.mulf %133, %140 : vector<8x512xf32>
    %cst_53 = arith.constant -0.166666672 : f32
    %142 = vector.broadcast %cst_53 : f32 to vector<8x512xf32>
    %143 = arith.addf %142, %141 : vector<8x512xf32>
    %144 = arith.mulf %133, %143 : vector<8x512xf32>
    %cst_54 = arith.constant 1.000000e+00 : f32
    %145 = vector.broadcast %cst_54 : f32 to vector<8x512xf32>
    %146 = arith.addf %145, %144 : vector<8x512xf32>
    %147 = arith.mulf %132, %146 : vector<8x512xf32>
    %cst_55 = arith.constant 2.48015876E-5 : f32
    %148 = vector.broadcast %cst_55 : f32 to vector<8x512xf32>
    %149 = arith.mulf %133, %148 : vector<8x512xf32>
    %cst_56 = arith.constant -0.00138888892 : f32
    %150 = vector.broadcast %cst_56 : f32 to vector<8x512xf32>
    %151 = arith.addf %150, %149 : vector<8x512xf32>
    %152 = arith.mulf %133, %151 : vector<8x512xf32>
    %cst_57 = arith.constant 0.0416666679 : f32
    %153 = vector.broadcast %cst_57 : f32 to vector<8x512xf32>
    %154 = arith.addf %153, %152 : vector<8x512xf32>
    %155 = arith.mulf %133, %154 : vector<8x512xf32>
    %cst_58 = arith.constant -5.000000e-01 : f32
    %156 = vector.broadcast %cst_58 : f32 to vector<8x512xf32>
    %157 = arith.addf %156, %155 : vector<8x512xf32>
    %158 = arith.mulf %133, %157 : vector<8x512xf32>
    %cst_59 = arith.constant 1.000000e+00 : f32
    %159 = vector.broadcast %cst_59 : f32 to vector<8x512xf32>
    %160 = arith.addf %159, %158 : vector<8x512xf32>
    %cst_60 = arith.constant 2.500000e-01 : f32
    %161 = vector.broadcast %cst_60 : f32 to vector<8x512xf32>
    %162 = arith.mulf %126, %161 : vector<8x512xf32>
    %163 = math.floor %162 : vector<8x512xf32>
    %cst_61 = arith.constant 4.000000e+00 : f32
    %164 = vector.broadcast %cst_61 : f32 to vector<8x512xf32>
    %165 = arith.mulf %164, %163 : vector<8x512xf32>
    %166 = arith.subf %126, %165 : vector<8x512xf32>
    %cst_62 = arith.constant 1.000000e+00 : f32
    %167 = vector.broadcast %cst_62 : f32 to vector<8x512xf32>
    %168 = arith.cmpf oeq, %166, %167 : vector<8x512xf32>
    %cst_63 = arith.constant 3.000000e+00 : f32
    %169 = vector.broadcast %cst_63 : f32 to vector<8x512xf32>
    %170 = arith.cmpf oeq, %166, %169 : vector<8x512xf32>
    %171 = arith.ori %168, %170 : vector<8x512xi1>
    %172 = arith.select %171, %160, %147 : vector<8x512xi1>, vector<8x512xf32>
    %173 = arith.select %171, %147, %160 : vector<8x512xi1>, vector<8x512xf32>
    %cst_64 = arith.constant 2.000000e+00 : f32
    %174 = vector.broadcast %cst_64 : f32 to vector<8x512xf32>
    %175 = arith.cmpf oge, %166, %174 : vector<8x512xf32>
    %cst_65 = arith.constant 0.000000e+00 : f32
    %176 = vector.broadcast %cst_65 : f32 to vector<8x512xf32>
    %177 = arith.subf %176, %172 : vector<8x512xf32>
    %178 = arith.select %175, %177, %172 : vector<8x512xi1>, vector<8x512xf32>
    %cst_66 = arith.constant 1.000000e+00 : f32
    %179 = vector.broadcast %cst_66 : f32 to vector<8x512xf32>
    %180 = arith.cmpf oeq, %166, %179 : vector<8x512xf32>
    %cst_67 = arith.constant 2.000000e+00 : f32
    %181 = vector.broadcast %cst_67 : f32 to vector<8x512xf32>
    %182 = arith.cmpf oeq, %166, %181 : vector<8x512xf32>
    %183 = arith.ori %180, %182 : vector<8x512xi1>
    %cst_68 = arith.constant 0.000000e+00 : f32
    %184 = vector.broadcast %cst_68 : f32 to vector<8x512xf32>
    %185 = arith.subf %184, %173 : vector<8x512xf32>
    %186 = arith.select %183, %185, %173 : vector<8x512xi1>, vector<8x512xf32>
    %187 = arith.mulf %121, %186 : vector<8x512xf32>
    %188 = arith.subf %178, %187 : vector<8x512xf32>
    %cst_69 = arith.constant 0.720976233 : f32
    %189 = vector.broadcast %cst_69 : f32 to vector<8x512xf32>
    %190 = arith.mulf %10, %189 : vector<8x512xf32>
    %191 = arith.mulf %188, %190 : vector<8x512xf32>
    %c5 = arith.constant 5 : index
    %c0_70 = arith.constant 0 : index
    %c0_71 = arith.constant 0 : index
    %192 = vector.load %arg2[%c5, %c0_70, %c0_71] : memref<15x8x512xf32, #tpu.memory_space<vmem>>, vector<1x8x512xf32>
    %193 = vector.shape_cast %192 : vector<1x8x512xf32> to vector<8x512xf32>
    %194 = vector.shape_cast %191 : vector<8x512xf32> to vector<1x8x512xf32>
    tpu.vector_store %arg2[%c5, %c0_70, %c0_71], %194 {strides = array<i32>} : memref<15x8x512xf32, #tpu.memory_space<vmem>>, vector<1x8x512xf32>,
    %cst_72 = arith.constant 1.54505038 : f32
    %195 = vector.broadcast %cst_72 : f32 to vector<8x512xf32>
    %196 = arith.mulf %4, %195 : vector<8x512xf32>
    %cst_73 = arith.constant 0.636619746 : f32
    %197 = vector.broadcast %cst_73 : f32 to vector<8x512xf32>
    %198 = arith.mulf %196, %197 : vector<8x512xf32>
    %cst_74 = arith.constant 5.000000e-01 : f32
    %199 = vector.broadcast %cst_74 : f32 to vector<8x512xf32>
    %200 = arith.addf %198, %199 : vector<8x512xf32>
    %201 = math.floor %200 : vector<8x512xf32>
    %cst_75 = arith.constant 1.57079637 : f32
    %202 = vector.broadcast %cst_75 : f32 to vector<8x512xf32>
    %203 = arith.mulf %201, %202 : vector<8x512xf32>
    %204 = arith.subf %196, %203 : vector<8x512xf32>
    %cst_76 = arith.constant -4.37113883E-8 : f32
    %205 = vector.broadcast %cst_76 : f32 to vector<8x512xf32>
    %206 = arith.mulf %201, %205 : vector<8x512xf32>
    %207 = arith.subf %204, %206 : vector<8x512xf32>
    %208 = arith.mulf %207, %207 : vector<8x512xf32>
    %cst_77 = arith.constant 2.75573188E-6 : f32
    %209 = vector.broadcast %cst_77 : f32 to vector<8x512xf32>
    %210 = arith.mulf %208, %209 : vector<8x512xf32>
    %cst_78 = arith.constant -1.98412701E-4 : f32
    %211 = vector.broadcast %cst_78 : f32 to vector<8x512xf32>
    %212 = arith.addf %211, %210 : vector<8x512xf32>
    %213 = arith.mulf %208, %212 : vector<8x512xf32>
    %cst_79 = arith.constant 0.00833333377 : f32
    %214 = vector.broadcast %cst_79 : f32 to vector<8x512xf32>
    %215 = arith.addf %214, %213 : vector<8x512xf32>
    %216 = arith.mulf %208, %215 : vector<8x512xf32>
    %cst_80 = arith.constant -0.166666672 : f32
    %217 = vector.broadcast %cst_80 : f32 to vector<8x512xf32>
    %218 = arith.addf %217, %216 : vector<8x512xf32>
    %219 = arith.mulf %208, %218 : vector<8x512xf32>
    %cst_81 = arith.constant 1.000000e+00 : f32
    %220 = vector.broadcast %cst_81 : f32 to vector<8x512xf32>
    %221 = arith.addf %220, %219 : vector<8x512xf32>
    %222 = arith.mulf %207, %221 : vector<8x512xf32>
    %cst_82 = arith.constant 2.48015876E-5 : f32
    %223 = vector.broadcast %cst_82 : f32 to vector<8x512xf32>
    %224 = arith.mulf %208, %223 : vector<8x512xf32>
    %cst_83 = arith.constant -0.00138888892 : f32
    %225 = vector.broadcast %cst_83 : f32 to vector<8x512xf32>
    %226 = arith.addf %225, %224 : vector<8x512xf32>
    %227 = arith.mulf %208, %226 : vector<8x512xf32>
    %cst_84 = arith.constant 0.0416666679 : f32
    %228 = vector.broadcast %cst_84 : f32 to vector<8x512xf32>
    %229 = arith.addf %228, %227 : vector<8x512xf32>
    %230 = arith.mulf %208, %229 : vector<8x512xf32>
    %cst_85 = arith.constant -5.000000e-01 : f32
    %231 = vector.broadcast %cst_85 : f32 to vector<8x512xf32>
    %232 = arith.addf %231, %230 : vector<8x512xf32>
    %233 = arith.mulf %208, %232 : vector<8x512xf32>
    %cst_86 = arith.constant 1.000000e+00 : f32
    %234 = vector.broadcast %cst_86 : f32 to vector<8x512xf32>
    %235 = arith.addf %234, %233 : vector<8x512xf32>
    %cst_87 = arith.constant 2.500000e-01 : f32
    %236 = vector.broadcast %cst_87 : f32 to vector<8x512xf32>
    %237 = arith.mulf %201, %236 : vector<8x512xf32>
    %238 = math.floor %237 : vector<8x512xf32>
    %cst_88 = arith.constant 4.000000e+00 : f32
    %239 = vector.broadcast %cst_88 : f32 to vector<8x512xf32>
    %240 = arith.mulf %239, %238 : vector<8x512xf32>
    %241 = arith.subf %201, %240 : vector<8x512xf32>
    %cst_89 = arith.constant 1.000000e+00 : f32
    %242 = vector.broadcast %cst_89 : f32 to vector<8x512xf32>
    %243 = arith.cmpf oeq, %241, %242 : vector<8x512xf32>
    %cst_90 = arith.constant 3.000000e+00 : f32
    %244 = vector.broadcast %cst_90 : f32 to vector<8x512xf32>
    %245 = arith.cmpf oeq, %241, %244 : vector<8x512xf32>
    %246 = arith.ori %243, %245 : vector<8x512xi1>
    %247 = arith.select %246, %235, %222 : vector<8x512xi1>, vector<8x512xf32>
    %248 = arith.select %246, %222, %235 : vector<8x512xi1>, vector<8x512xf32>
    %cst_91 = arith.constant 2.000000e+00 : f32
    %249 = vector.broadcast %cst_91 : f32 to vector<8x512xf32>
    %250 = arith.cmpf oge, %241, %249 : vector<8x512xf32>
    %cst_92 = arith.constant 0.000000e+00 : f32
    %251 = vector.broadcast %cst_92 : f32 to vector<8x512xf32>
    %252 = arith.subf %251, %247 : vector<8x512xf32>
    %253 = arith.select %250, %252, %247 : vector<8x512xi1>, vector<8x512xf32>
    %cst_93 = arith.constant 1.000000e+00 : f32
    %254 = vector.broadcast %cst_93 : f32 to vector<8x512xf32>
    %255 = arith.cmpf oeq, %241, %254 : vector<8x512xf32>
    %cst_94 = arith.constant 2.000000e+00 : f32
    %256 = vector.broadcast %cst_94 : f32 to vector<8x512xf32>
    %257 = arith.cmpf oeq, %241, %256 : vector<8x512xf32>
    %258 = arith.ori %255, %257 : vector<8x512xi1>
    %cst_95 = arith.constant 0.000000e+00 : f32
    %259 = vector.broadcast %cst_95 : f32 to vector<8x512xf32>
    %260 = arith.subf %259, %248 : vector<8x512xf32>
    %261 = arith.select %258, %260, %248 : vector<8x512xi1>, vector<8x512xf32>
    %262 = arith.mulf %196, %261 : vector<8x512xf32>
    %263 = arith.subf %253, %262 : vector<8x512xf32>
    %cst_96 = arith.constant 0.412758261 : f32
    %264 = vector.broadcast %cst_96 : f32 to vector<8x512xf32>
    %265 = arith.mulf %10, %264 : vector<8x512xf32>
    %266 = arith.mulf %263, %265 : vector<8x512xf32>
    %c6 = arith.constant 6 : index
    %c0_97 = arith.constant 0 : index
    %c0_98 = arith.constant 0 : index
    %267 = vector.load %arg2[%c6, %c0_97, %c0_98] : memref<15x8x512xf32, #tpu.memory_space<vmem>>, vector<1x8x512xf32>
    %268 = vector.shape_cast %267 : vector<1x8x512xf32> to vector<8x512xf32>
    %269 = vector.shape_cast %266 : vector<8x512xf32> to vector<1x8x512xf32>
    tpu.vector_store %arg2[%c6, %c0_97, %c0_98], %269 {strides = array<i32>} : memref<15x8x512xf32, #tpu.memory_space<vmem>>, vector<1x8x512xf32>,
    %cst_99 = arith.constant 2.18082428 : f32
    %270 = vector.broadcast %cst_99 : f32 to vector<8x512xf32>
    %271 = arith.mulf %4, %270 : vector<8x512xf32>
    %cst_100 = arith.constant 0.636619746 : f32
    %272 = vector.broadcast %cst_100 : f32 to vector<8x512xf32>
    %273 = arith.mulf %271, %272 : vector<8x512xf32>
    %cst_101 = arith.constant 5.000000e-01 : f32
    %274 = vector.broadcast %cst_101 : f32 to vector<8x512xf32>
    %275 = arith.addf %273, %274 : vector<8x512xf32>
    %276 = math.floor %275 : vector<8x512xf32>
    %cst_102 = arith.constant 1.57079637 : f32
    %277 = vector.broadcast %cst_102 : f32 to vector<8x512xf32>
    %278 = arith.mulf %276, %277 : vector<8x512xf32>
    %279 = arith.subf %271, %278 : vector<8x512xf32>
    %cst_103 = arith.constant -4.37113883E-8 : f32
    %280 = vector.broadcast %cst_103 : f32 to vector<8x512xf32>
    %281 = arith.mulf %276, %280 : vector<8x512xf32>
    %282 = arith.subf %279, %281 : vector<8x512xf32>
    %283 = arith.mulf %282, %282 : vector<8x512xf32>
    %cst_104 = arith.constant 2.75573188E-6 : f32
    %284 = vector.broadcast %cst_104 : f32 to vector<8x512xf32>
    %285 = arith.mulf %283, %284 : vector<8x512xf32>
    %cst_105 = arith.constant -1.98412701E-4 : f32
    %286 = vector.broadcast %cst_105 : f32 to vector<8x512xf32>
    %287 = arith.addf %286, %285 : vector<8x512xf32>
    %288 = arith.mulf %283, %287 : vector<8x512xf32>
    %cst_106 = arith.constant 0.00833333377 : f32
    %289 = vector.broadcast %cst_106 : f32 to vector<8x512xf32>
    %290 = arith.addf %289, %288 : vector<8x512xf32>
    %291 = arith.mulf %283, %290 : vector<8x512xf32>
    %cst_107 = arith.constant -0.166666672 : f32
    %292 = vector.broadcast %cst_107 : f32 to vector<8x512xf32>
    %293 = arith.addf %292, %291 : vector<8x512xf32>
    %294 = arith.mulf %283, %293 : vector<8x512xf32>
    %cst_108 = arith.constant 1.000000e+00 : f32
    %295 = vector.broadcast %cst_108 : f32 to vector<8x512xf32>
    %296 = arith.addf %295, %294 : vector<8x512xf32>
    %297 = arith.mulf %282, %296 : vector<8x512xf32>
    %cst_109 = arith.constant 2.48015876E-5 : f32
    %298 = vector.broadcast %cst_109 : f32 to vector<8x512xf32>
    %299 = arith.mulf %283, %298 : vector<8x512xf32>
    %cst_110 = arith.constant -0.00138888892 : f32
    %300 = vector.broadcast %cst_110 : f32 to vector<8x512xf32>
    %301 = arith.addf %300, %299 : vector<8x512xf32>
    %302 = arith.mulf %283, %301 : vector<8x512xf32>
    %cst_111 = arith.constant 0.0416666679 : f32
    %303 = vector.broadcast %cst_111 : f32 to vector<8x512xf32>
    %304 = arith.addf %303, %302 : vector<8x512xf32>
    %305 = arith.mulf %283, %304 : vector<8x512xf32>
    %cst_112 = arith.constant -5.000000e-01 : f32
    %306 = vector.broadcast %cst_112 : f32 to vector<8x512xf32>
    %307 = arith.addf %306, %305 : vector<8x512xf32>
    %308 = arith.mulf %283, %307 : vector<8x512xf32>
    %cst_113 = arith.constant 1.000000e+00 : f32
    %309 = vector.broadcast %cst_113 : f32 to vector<8x512xf32>
    %310 = arith.addf %309, %308 : vector<8x512xf32>
    %cst_114 = arith.constant 2.500000e-01 : f32
    %311 = vector.broadcast %cst_114 : f32 to vector<8x512xf32>
    %312 = arith.mulf %276, %311 : vector<8x512xf32>
    %313 = math.floor %312 : vector<8x512xf32>
    %cst_115 = arith.constant 4.000000e+00 : f32
    %314 = vector.broadcast %cst_115 : f32 to vector<8x512xf32>
    %315 = arith.mulf %314, %313 : vector<8x512xf32>
    %316 = arith.subf %276, %315 : vector<8x512xf32>
    %cst_116 = arith.constant 1.000000e+00 : f32
    %317 = vector.broadcast %cst_116 : f32 to vector<8x512xf32>
    %318 = arith.cmpf oeq, %316, %317 : vector<8x512xf32>
    %cst_117 = arith.constant 3.000000e+00 : f32
    %319 = vector.broadcast %cst_117 : f32 to vector<8x512xf32>
    %320 = arith.cmpf oeq, %316, %319 : vector<8x512xf32>
    %321 = arith.ori %318, %320 : vector<8x512xi1>
    %322 = arith.select %321, %310, %297 : vector<8x512xi1>, vector<8x512xf32>
    %323 = arith.select %321, %297, %310 : vector<8x512xi1>, vector<8x512xf32>
    %cst_118 = arith.constant 2.000000e+00 : f32
    %324 = vector.broadcast %cst_118 : f32 to vector<8x512xf32>
    %325 = arith.cmpf oge, %316, %324 : vector<8x512xf32>
    %cst_119 = arith.constant 0.000000e+00 : f32
    %326 = vector.broadcast %cst_119 : f32 to vector<8x512xf32>
    %327 = arith.subf %326, %322 : vector<8x512xf32>
    %328 = arith.select %325, %327, %322 : vector<8x512xi1>, vector<8x512xf32>
    %cst_120 = arith.constant 1.000000e+00 : f32
    %329 = vector.broadcast %cst_120 : f32 to vector<8x512xf32>
    %330 = arith.cmpf oeq, %316, %329 : vector<8x512xf32>
    %cst_121 = arith.constant 2.000000e+00 : f32
    %331 = vector.broadcast %cst_121 : f32 to vector<8x512xf32>
    %332 = arith.cmpf oeq, %316, %331 : vector<8x512xf32>
    %333 = arith.ori %330, %332 : vector<8x512xi1>
    %cst_122 = arith.constant 0.000000e+00 : f32
    %334 = vector.broadcast %cst_122 : f32 to vector<8x512xf32>
    %335 = arith.subf %334, %323 : vector<8x512xf32>
    %336 = arith.select %333, %335, %323 : vector<8x512xi1>, vector<8x512xf32>
    %337 = arith.mulf %271, %336 : vector<8x512xf32>
    %338 = arith.subf %328, %337 : vector<8x512xf32>
    %cst_123 = arith.constant 0.291224539 : f32
    %339 = vector.broadcast %cst_123 : f32 to vector<8x512xf32>
    %340 = arith.mulf %10, %339 : vector<8x512xf32>
    %341 = arith.mulf %338, %340 : vector<8x512xf32>
    %c7 = arith.constant 7 : index
    %c0_124 = arith.constant 0 : index
    %c0_125 = arith.constant 0 : index
    %342 = vector.load %arg2[%c7, %c0_124, %c0_125] : memref<15x8x512xf32, #tpu.memory_space<vmem>>, vector<1x8x512xf32>
    %343 = vector.shape_cast %342 : vector<1x8x512xf32> to vector<8x512xf32>
    %344 = vector.shape_cast %341 : vector<8x512xf32> to vector<1x8x512xf32>
    tpu.vector_store %arg2[%c7, %c0_124, %c0_125], %344 {strides = array<i32>} : memref<15x8x512xf32, #tpu.memory_space<vmem>>, vector<1x8x512xf32>,
    %cst_126 = arith.constant 2.81323886 : f32
    %345 = vector.broadcast %cst_126 : f32 to vector<8x512xf32>
    %346 = arith.mulf %4, %345 : vector<8x512xf32>
    %cst_127 = arith.constant 0.636619746 : f32
    %347 = vector.broadcast %cst_127 : f32 to vector<8x512xf32>
    %348 = arith.mulf %346, %347 : vector<8x512xf32>
    %cst_128 = arith.constant 5.000000e-01 : f32
    %349 = vector.broadcast %cst_128 : f32 to vector<8x512xf32>
    %350 = arith.addf %348, %349 : vector<8x512xf32>
    %351 = math.floor %350 : vector<8x512xf32>
    %cst_129 = arith.constant 1.57079637 : f32
    %352 = vector.broadcast %cst_129 : f32 to vector<8x512xf32>
    %353 = arith.mulf %351, %352 : vector<8x512xf32>
    %354 = arith.subf %346, %353 : vector<8x512xf32>
    %cst_130 = arith.constant -4.37113883E-8 : f32
    %355 = vector.broadcast %cst_130 : f32 to vector<8x512xf32>
    %356 = arith.mulf %351, %355 : vector<8x512xf32>
    %357 = arith.subf %354, %356 : vector<8x512xf32>
    %358 = arith.mulf %357, %357 : vector<8x512xf32>
    %cst_131 = arith.constant 2.75573188E-6 : f32
    %359 = vector.broadcast %cst_131 : f32 to vector<8x512xf32>
    %360 = arith.mulf %358, %359 : vector<8x512xf32>
    %cst_132 = arith.constant -1.98412701E-4 : f32
    %361 = vector.broadcast %cst_132 : f32 to vector<8x512xf32>
    %362 = arith.addf %361, %360 : vector<8x512xf32>
    %363 = arith.mulf %358, %362 : vector<8x512xf32>
    %cst_133 = arith.constant 0.00833333377 : f32
    %364 = vector.broadcast %cst_133 : f32 to vector<8x512xf32>
    %365 = arith.addf %364, %363 : vector<8x512xf32>
    %366 = arith.mulf %358, %365 : vector<8x512xf32>
    %cst_134 = arith.constant -0.166666672 : f32
    %367 = vector.broadcast %cst_134 : f32 to vector<8x512xf32>
    %368 = arith.addf %367, %366 : vector<8x512xf32>
    %369 = arith.mulf %358, %368 : vector<8x512xf32>
    %cst_135 = arith.constant 1.000000e+00 : f32
    %370 = vector.broadcast %cst_135 : f32 to vector<8x512xf32>
    %371 = arith.addf %370, %369 : vector<8x512xf32>
    %372 = arith.mulf %357, %371 : vector<8x512xf32>
    %cst_136 = arith.constant 2.48015876E-5 : f32
    %373 = vector.broadcast %cst_136 : f32 to vector<8x512xf32>
    %374 = arith.mulf %358, %373 : vector<8x512xf32>
    %cst_137 = arith.constant -0.00138888892 : f32
    %375 = vector.broadcast %cst_137 : f32 to vector<8x512xf32>
    %376 = arith.addf %375, %374 : vector<8x512xf32>
    %377 = arith.mulf %358, %376 : vector<8x512xf32>
    %cst_138 = arith.constant 0.0416666679 : f32
    %378 = vector.broadcast %cst_138 : f32 to vector<8x512xf32>
    %379 = arith.addf %378, %377 : vector<8x512xf32>
    %380 = arith.mulf %358, %379 : vector<8x512xf32>
    %cst_139 = arith.constant -5.000000e-01 : f32
    %381 = vector.broadcast %cst_139 : f32 to vector<8x512xf32>
    %382 = arith.addf %381, %380 : vector<8x512xf32>
    %383 = arith.mulf %358, %382 : vector<8x512xf32>
    %cst_140 = arith.constant 1.000000e+00 : f32
    %384 = vector.broadcast %cst_140 : f32 to vector<8x512xf32>
    %385 = arith.addf %384, %383 : vector<8x512xf32>
    %cst_141 = arith.constant 2.500000e-01 : f32
    %386 = vector.broadcast %cst_141 : f32 to vector<8x512xf32>
    %387 = arith.mulf %351, %386 : vector<8x512xf32>
    %388 = math.floor %387 : vector<8x512xf32>
    %cst_142 = arith.constant 4.000000e+00 : f32
    %389 = vector.broadcast %cst_142 : f32 to vector<8x512xf32>
    %390 = arith.mulf %389, %388 : vector<8x512xf32>
    %391 = arith.subf %351, %390 : vector<8x512xf32>
    %cst_143 = arith.constant 1.000000e+00 : f32
    %392 = vector.broadcast %cst_143 : f32 to vector<8x512xf32>
    %393 = arith.cmpf oeq, %391, %392 : vector<8x512xf32>
    %cst_144 = arith.constant 3.000000e+00 : f32
    %394 = vector.broadcast %cst_144 : f32 to vector<8x512xf32>
    %395 = arith.cmpf oeq, %391, %394 : vector<8x512xf32>
    %396 = arith.ori %393, %395 : vector<8x512xi1>
    %397 = arith.select %396, %385, %372 : vector<8x512xi1>, vector<8x512xf32>
    %398 = arith.select %396, %372, %385 : vector<8x512xi1>, vector<8x512xf32>
    %cst_145 = arith.constant 2.000000e+00 : f32
    %399 = vector.broadcast %cst_145 : f32 to vector<8x512xf32>
    %400 = arith.cmpf oge, %391, %399 : vector<8x512xf32>
    %cst_146 = arith.constant 0.000000e+00 : f32
    %401 = vector.broadcast %cst_146 : f32 to vector<8x512xf32>
    %402 = arith.subf %401, %397 : vector<8x512xf32>
    %403 = arith.select %400, %402, %397 : vector<8x512xi1>, vector<8x512xf32>
    %cst_147 = arith.constant 1.000000e+00 : f32
    %404 = vector.broadcast %cst_147 : f32 to vector<8x512xf32>
    %405 = arith.cmpf oeq, %391, %404 : vector<8x512xf32>
    %cst_148 = arith.constant 2.000000e+00 : f32
    %406 = vector.broadcast %cst_148 : f32 to vector<8x512xf32>
    %407 = arith.cmpf oeq, %391, %406 : vector<8x512xf32>
    %408 = arith.ori %405, %407 : vector<8x512xi1>
    %cst_149 = arith.constant 0.000000e+00 : f32
    %409 = vector.broadcast %cst_149 : f32 to vector<8x512xf32>
    %410 = arith.subf %409, %398 : vector<8x512xf32>
    %411 = arith.select %408, %410, %398 : vector<8x512xi1>, vector<8x512xf32>
    %412 = arith.mulf %346, %411 : vector<8x512xf32>
    %413 = arith.subf %403, %412 : vector<8x512xf32>
    %cst_150 = arith.constant 0.225381434 : f32
    %414 = vector.broadcast %cst_150 : f32 to vector<8x512xf32>
    %415 = arith.mulf %10, %414 : vector<8x512xf32>
    %416 = arith.mulf %413, %415 : vector<8x512xf32>
    %c8 = arith.constant 8 : index
    %c0_151 = arith.constant 0 : index
    %c0_152 = arith.constant 0 : index
    %417 = vector.load %arg2[%c8, %c0_151, %c0_152] : memref<15x8x512xf32, #tpu.memory_space<vmem>>, vector<1x8x512xf32>
    %418 = vector.shape_cast %417 : vector<1x8x512xf32> to vector<8x512xf32>
    %419 = vector.shape_cast %416 : vector<8x512xf32> to vector<1x8x512xf32>
    tpu.vector_store %arg2[%c8, %c0_151, %c0_152], %419 {strides = array<i32>} : memref<15x8x512xf32, #tpu.memory_space<vmem>>, vector<1x8x512xf32>,
    %cst_153 = arith.constant 3.44415116 : f32
    %420 = vector.broadcast %cst_153 : f32 to vector<8x512xf32>
    %421 = arith.mulf %4, %420 : vector<8x512xf32>
    %cst_154 = arith.constant 0.636619746 : f32
    %422 = vector.broadcast %cst_154 : f32 to vector<8x512xf32>
    %423 = arith.mulf %421, %422 : vector<8x512xf32>
    %cst_155 = arith.constant 5.000000e-01 : f32
    %424 = vector.broadcast %cst_155 : f32 to vector<8x512xf32>
    %425 = arith.addf %423, %424 : vector<8x512xf32>
    %426 = math.floor %425 : vector<8x512xf32>
    %cst_156 = arith.constant 1.57079637 : f32
    %427 = vector.broadcast %cst_156 : f32 to vector<8x512xf32>
    %428 = arith.mulf %426, %427 : vector<8x512xf32>
    %429 = arith.subf %421, %428 : vector<8x512xf32>
    %cst_157 = arith.constant -4.37113883E-8 : f32
    %430 = vector.broadcast %cst_157 : f32 to vector<8x512xf32>
    %431 = arith.mulf %426, %430 : vector<8x512xf32>
    %432 = arith.subf %429, %431 : vector<8x512xf32>
    %433 = arith.mulf %432, %432 : vector<8x512xf32>
    %cst_158 = arith.constant 2.75573188E-6 : f32
    %434 = vector.broadcast %cst_158 : f32 to vector<8x512xf32>
    %435 = arith.mulf %433, %434 : vector<8x512xf32>
    %cst_159 = arith.constant -1.98412701E-4 : f32
    %436 = vector.broadcast %cst_159 : f32 to vector<8x512xf32>
    %437 = arith.addf %436, %435 : vector<8x512xf32>
    %438 = arith.mulf %433, %437 : vector<8x512xf32>
    %cst_160 = arith.constant 0.00833333377 : f32
    %439 = vector.broadcast %cst_160 : f32 to vector<8x512xf32>
    %440 = arith.addf %439, %438 : vector<8x512xf32>
    %441 = arith.mulf %433, %440 : vector<8x512xf32>
    %cst_161 = arith.constant -0.166666672 : f32
    %442 = vector.broadcast %cst_161 : f32 to vector<8x512xf32>
    %443 = arith.addf %442, %441 : vector<8x512xf32>
    %444 = arith.mulf %433, %443 : vector<8x512xf32>
    %cst_162 = arith.constant 1.000000e+00 : f32
    %445 = vector.broadcast %cst_162 : f32 to vector<8x512xf32>
    %446 = arith.addf %445, %444 : vector<8x512xf32>
    %447 = arith.mulf %432, %446 : vector<8x512xf32>
    %cst_163 = arith.constant 2.48015876E-5 : f32
    %448 = vector.broadcast %cst_163 : f32 to vector<8x512xf32>
    %449 = arith.mulf %433, %448 : vector<8x512xf32>
    %cst_164 = arith.constant -0.00138888892 : f32
    %450 = vector.broadcast %cst_164 : f32 to vector<8x512xf32>
    %451 = arith.addf %450, %449 : vector<8x512xf32>
    %452 = arith.mulf %433, %451 : vector<8x512xf32>
    %cst_165 = arith.constant 0.0416666679 : f32
    %453 = vector.broadcast %cst_165 : f32 to vector<8x512xf32>
    %454 = arith.addf %453, %452 : vector<8x512xf32>
    %455 = arith.mulf %433, %454 : vector<8x512xf32>
    %cst_166 = arith.constant -5.000000e-01 : f32
    %456 = vector.broadcast %cst_166 : f32 to vector<8x512xf32>
    %457 = arith.addf %456, %455 : vector<8x512xf32>
    %458 = arith.mulf %433, %457 : vector<8x512xf32>
    %cst_167 = arith.constant 1.000000e+00 : f32
    %459 = vector.broadcast %cst_167 : f32 to vector<8x512xf32>
    %460 = arith.addf %459, %458 : vector<8x512xf32>
    %cst_168 = arith.constant 2.500000e-01 : f32
    %461 = vector.broadcast %cst_168 : f32 to vector<8x512xf32>
    %462 = arith.mulf %426, %461 : vector<8x512xf32>
    %463 = math.floor %462 : vector<8x512xf32>
    %cst_169 = arith.constant 4.000000e+00 : f32
    %464 = vector.broadcast %cst_169 : f32 to vector<8x512xf32>
    %465 = arith.mulf %464, %463 : vector<8x512xf32>
    %466 = arith.subf %426, %465 : vector<8x512xf32>
    %cst_170 = arith.constant 1.000000e+00 : f32
    %467 = vector.broadcast %cst_170 : f32 to vector<8x512xf32>
    %468 = arith.cmpf oeq, %466, %467 : vector<8x512xf32>
    %cst_171 = arith.constant 3.000000e+00 : f32
    %469 = vector.broadcast %cst_171 : f32 to vector<8x512xf32>
    %470 = arith.cmpf oeq, %466, %469 : vector<8x512xf32>
    %471 = arith.ori %468, %470 : vector<8x512xi1>
    %472 = arith.select %471, %460, %447 : vector<8x512xi1>, vector<8x512xf32>
    %473 = arith.select %471, %447, %460 : vector<8x512xi1>, vector<8x512xf32>
    %cst_172 = arith.constant 2.000000e+00 : f32
    %474 = vector.broadcast %cst_172 : f32 to vector<8x512xf32>
    %475 = arith.cmpf oge, %466, %474 : vector<8x512xf32>
    %cst_173 = arith.constant 0.000000e+00 : f32
    %476 = vector.broadcast %cst_173 : f32 to vector<8x512xf32>
    %477 = arith.subf %476, %472 : vector<8x512xf32>
    %478 = arith.select %475, %477, %472 : vector<8x512xi1>, vector<8x512xf32>
    %cst_174 = arith.constant 1.000000e+00 : f32
    %479 = vector.broadcast %cst_174 : f32 to vector<8x512xf32>
    %480 = arith.cmpf oeq, %466, %479 : vector<8x512xf32>
    %cst_175 = arith.constant 2.000000e+00 : f32
    %481 = vector.broadcast %cst_175 : f32 to vector<8x512xf32>
    %482 = arith.cmpf oeq, %466, %481 : vector<8x512xf32>
    %483 = arith.ori %480, %482 : vector<8x512xi1>
    %cst_176 = arith.constant 0.000000e+00 : f32
    %484 = vector.broadcast %cst_176 : f32 to vector<8x512xf32>
    %485 = arith.subf %484, %473 : vector<8x512xf32>
    %486 = arith.select %483, %485, %473 : vector<8x512xi1>, vector<8x512xf32>
    %487 = arith.mulf %421, %486 : vector<8x512xf32>
    %488 = arith.subf %478, %487 : vector<8x512xf32>
    %cst_177 = arith.constant 0.183941111 : f32
    %489 = vector.broadcast %cst_177 : f32 to vector<8x512xf32>
    %490 = arith.mulf %10, %489 : vector<8x512xf32>
    %491 = arith.mulf %488, %490 : vector<8x512xf32>
    %c9 = arith.constant 9 : index
    %c0_178 = arith.constant 0 : index
    %c0_179 = arith.constant 0 : index
    %492 = vector.load %arg2[%c9, %c0_178, %c0_179] : memref<15x8x512xf32, #tpu.memory_space<vmem>>, vector<1x8x512xf32>
    %493 = vector.shape_cast %492 : vector<1x8x512xf32> to vector<8x512xf32>
    %494 = vector.shape_cast %491 : vector<8x512xf32> to vector<1x8x512xf32>
    tpu.vector_store %arg2[%c9, %c0_178, %c0_179], %494 {strides = array<i32>} : memref<15x8x512xf32, #tpu.memory_space<vmem>>, vector<1x8x512xf32>,
    %cst_180 = arith.constant 1.15269184 : f32
    %495 = vector.broadcast %cst_180 : f32 to vector<8x512xf32>
    %496 = arith.mulf %4, %495 : vector<8x512xf32>
    %cst_181 = arith.constant 0.636619746 : f32
    %497 = vector.broadcast %cst_181 : f32 to vector<8x512xf32>
    %498 = arith.mulf %496, %497 : vector<8x512xf32>
    %cst_182 = arith.constant 5.000000e-01 : f32
    %499 = vector.broadcast %cst_182 : f32 to vector<8x512xf32>
    %500 = arith.addf %498, %499 : vector<8x512xf32>
    %501 = math.floor %500 : vector<8x512xf32>
    %cst_183 = arith.constant 1.57079637 : f32
    %502 = vector.broadcast %cst_183 : f32 to vector<8x512xf32>
    %503 = arith.mulf %501, %502 : vector<8x512xf32>
    %504 = arith.subf %496, %503 : vector<8x512xf32>
    %cst_184 = arith.constant -4.37113883E-8 : f32
    %505 = vector.broadcast %cst_184 : f32 to vector<8x512xf32>
    %506 = arith.mulf %501, %505 : vector<8x512xf32>
    %507 = arith.subf %504, %506 : vector<8x512xf32>
    %508 = arith.mulf %507, %507 : vector<8x512xf32>
    %cst_185 = arith.constant 2.75573188E-6 : f32
    %509 = vector.broadcast %cst_185 : f32 to vector<8x512xf32>
    %510 = arith.mulf %508, %509 : vector<8x512xf32>
    %cst_186 = arith.constant -1.98412701E-4 : f32
    %511 = vector.broadcast %cst_186 : f32 to vector<8x512xf32>
    %512 = arith.addf %511, %510 : vector<8x512xf32>
    %513 = arith.mulf %508, %512 : vector<8x512xf32>
    %cst_187 = arith.constant 0.00833333377 : f32
    %514 = vector.broadcast %cst_187 : f32 to vector<8x512xf32>
    %515 = arith.addf %514, %513 : vector<8x512xf32>
    %516 = arith.mulf %508, %515 : vector<8x512xf32>
    %cst_188 = arith.constant -0.166666672 : f32
    %517 = vector.broadcast %cst_188 : f32 to vector<8x512xf32>
    %518 = arith.addf %517, %516 : vector<8x512xf32>
    %519 = arith.mulf %508, %518 : vector<8x512xf32>
    %cst_189 = arith.constant 1.000000e+00 : f32
    %520 = vector.broadcast %cst_189 : f32 to vector<8x512xf32>
    %521 = arith.addf %520, %519 : vector<8x512xf32>
    %522 = arith.mulf %507, %521 : vector<8x512xf32>
    %cst_190 = arith.constant 2.48015876E-5 : f32
    %523 = vector.broadcast %cst_190 : f32 to vector<8x512xf32>
    %524 = arith.mulf %508, %523 : vector<8x512xf32>
    %cst_191 = arith.constant -0.00138888892 : f32
    %525 = vector.broadcast %cst_191 : f32 to vector<8x512xf32>
    %526 = arith.addf %525, %524 : vector<8x512xf32>
    %527 = arith.mulf %508, %526 : vector<8x512xf32>
    %cst_192 = arith.constant 0.0416666679 : f32
    %528 = vector.broadcast %cst_192 : f32 to vector<8x512xf32>
    %529 = arith.addf %528, %527 : vector<8x512xf32>
    %530 = arith.mulf %508, %529 : vector<8x512xf32>
    %cst_193 = arith.constant -5.000000e-01 : f32
    %531 = vector.broadcast %cst_193 : f32 to vector<8x512xf32>
    %532 = arith.addf %531, %530 : vector<8x512xf32>
    %533 = arith.mulf %508, %532 : vector<8x512xf32>
    %cst_194 = arith.constant 1.000000e+00 : f32
    %534 = vector.broadcast %cst_194 : f32 to vector<8x512xf32>
    %535 = arith.addf %534, %533 : vector<8x512xf32>
    %cst_195 = arith.constant 2.500000e-01 : f32
    %536 = vector.broadcast %cst_195 : f32 to vector<8x512xf32>
    %537 = arith.mulf %501, %536 : vector<8x512xf32>
    %538 = math.floor %537 : vector<8x512xf32>
    %cst_196 = arith.constant 4.000000e+00 : f32
    %539 = vector.broadcast %cst_196 : f32 to vector<8x512xf32>
    %540 = arith.mulf %539, %538 : vector<8x512xf32>
    %541 = arith.subf %501, %540 : vector<8x512xf32>
    %cst_197 = arith.constant 1.000000e+00 : f32
    %542 = vector.broadcast %cst_197 : f32 to vector<8x512xf32>
    %543 = arith.cmpf oeq, %541, %542 : vector<8x512xf32>
    %cst_198 = arith.constant 3.000000e+00 : f32
    %544 = vector.broadcast %cst_198 : f32 to vector<8x512xf32>
    %545 = arith.cmpf oeq, %541, %544 : vector<8x512xf32>
    %546 = arith.ori %543, %545 : vector<8x512xi1>
    %547 = arith.select %546, %535, %522 : vector<8x512xi1>, vector<8x512xf32>
    %548 = arith.select %546, %522, %535 : vector<8x512xi1>, vector<8x512xf32>
    %cst_199 = arith.constant 2.000000e+00 : f32
    %549 = vector.broadcast %cst_199 : f32 to vector<8x512xf32>
    %550 = arith.cmpf oge, %541, %549 : vector<8x512xf32>
    %cst_200 = arith.constant 0.000000e+00 : f32
    %551 = vector.broadcast %cst_200 : f32 to vector<8x512xf32>
    %552 = arith.subf %551, %547 : vector<8x512xf32>
    %553 = arith.select %550, %552, %547 : vector<8x512xi1>, vector<8x512xf32>
    %cst_201 = arith.constant 1.000000e+00 : f32
    %554 = vector.broadcast %cst_201 : f32 to vector<8x512xf32>
    %555 = arith.cmpf oeq, %541, %554 : vector<8x512xf32>
    %cst_202 = arith.constant 2.000000e+00 : f32
    %556 = vector.broadcast %cst_202 : f32 to vector<8x512xf32>
    %557 = arith.cmpf oeq, %541, %556 : vector<8x512xf32>
    %558 = arith.ori %555, %557 : vector<8x512xi1>
    %cst_203 = arith.constant 0.000000e+00 : f32
    %559 = vector.broadcast %cst_203 : f32 to vector<8x512xf32>
    %560 = arith.subf %559, %548 : vector<8x512xf32>
    %561 = arith.select %558, %560, %548 : vector<8x512xi1>, vector<8x512xf32>
    %562 = arith.mulf %496, %496 : vector<8x512xf32>
    %cst_204 = arith.constant 3.000000e+00 : f32
    %563 = vector.broadcast %cst_204 : f32 to vector<8x512xf32>
    %564 = arith.subf %563, %562 : vector<8x512xf32>
    %565 = arith.mulf %564, %553 : vector<8x512xf32>
    %cst_205 = arith.constant 3.000000e+00 : f32
    %566 = vector.broadcast %cst_205 : f32 to vector<8x512xf32>
    %567 = arith.mulf %566, %496 : vector<8x512xf32>
    %568 = arith.mulf %567, %561 : vector<8x512xf32>
    %569 = arith.subf %565, %568 : vector<8x512xf32>
    %cst_206 = arith.constant 0.498881936 : f32
    %570 = vector.broadcast %cst_206 : f32 to vector<8x512xf32>
    %571 = arith.mulf %11, %570 : vector<8x512xf32>
    %572 = arith.mulf %569, %571 : vector<8x512xf32>
    %c10 = arith.constant 10 : index
    %c0_207 = arith.constant 0 : index
    %c0_208 = arith.constant 0 : index
    %573 = vector.load %arg2[%c10, %c0_207, %c0_208] : memref<15x8x512xf32, #tpu.memory_space<vmem>>, vector<1x8x512xf32>
    %574 = vector.shape_cast %573 : vector<1x8x512xf32> to vector<8x512xf32>
    %575 = vector.shape_cast %572 : vector<8x512xf32> to vector<1x8x512xf32>
    tpu.vector_store %arg2[%c10, %c0_207, %c0_208], %575 {strides = array<i32>} : memref<15x8x512xf32, #tpu.memory_space<vmem>>, vector<1x8x512xf32>,
    %cst_209 = arith.constant 1.81900227 : f32
    %576 = vector.broadcast %cst_209 : f32 to vector<8x512xf32>
    %577 = arith.mulf %4, %576 : vector<8x512xf32>
    %cst_210 = arith.constant 0.636619746 : f32
    %578 = vector.broadcast %cst_210 : f32 to vector<8x512xf32>
    %579 = arith.mulf %577, %578 : vector<8x512xf32>
    %cst_211 = arith.constant 5.000000e-01 : f32
    %580 = vector.broadcast %cst_211 : f32 to vector<8x512xf32>
    %581 = arith.addf %579, %580 : vector<8x512xf32>
    %582 = math.floor %581 : vector<8x512xf32>
    %cst_212 = arith.constant 1.57079637 : f32
    %583 = vector.broadcast %cst_212 : f32 to vector<8x512xf32>
    %584 = arith.mulf %582, %583 : vector<8x512xf32>
    %585 = arith.subf %577, %584 : vector<8x512xf32>
    %cst_213 = arith.constant -4.37113883E-8 : f32
    %586 = vector.broadcast %cst_213 : f32 to vector<8x512xf32>
    %587 = arith.mulf %582, %586 : vector<8x512xf32>
    %588 = arith.subf %585, %587 : vector<8x512xf32>
    %589 = arith.mulf %588, %588 : vector<8x512xf32>
    %cst_214 = arith.constant 2.75573188E-6 : f32
    %590 = vector.broadcast %cst_214 : f32 to vector<8x512xf32>
    %591 = arith.mulf %589, %590 : vector<8x512xf32>
    %cst_215 = arith.constant -1.98412701E-4 : f32
    %592 = vector.broadcast %cst_215 : f32 to vector<8x512xf32>
    %593 = arith.addf %592, %591 : vector<8x512xf32>
    %594 = arith.mulf %589, %593 : vector<8x512xf32>
    %cst_216 = arith.constant 0.00833333377 : f32
    %595 = vector.broadcast %cst_216 : f32 to vector<8x512xf32>
    %596 = arith.addf %595, %594 : vector<8x512xf32>
    %597 = arith.mulf %589, %596 : vector<8x512xf32>
    %cst_217 = arith.constant -0.166666672 : f32
    %598 = vector.broadcast %cst_217 : f32 to vector<8x512xf32>
    %599 = arith.addf %598, %597 : vector<8x512xf32>
    %600 = arith.mulf %589, %599 : vector<8x512xf32>
    %cst_218 = arith.constant 1.000000e+00 : f32
    %601 = vector.broadcast %cst_218 : f32 to vector<8x512xf32>
    %602 = arith.addf %601, %600 : vector<8x512xf32>
    %603 = arith.mulf %588, %602 : vector<8x512xf32>
    %cst_219 = arith.constant 2.48015876E-5 : f32
    %604 = vector.broadcast %cst_219 : f32 to vector<8x512xf32>
    %605 = arith.mulf %589, %604 : vector<8x512xf32>
    %cst_220 = arith.constant -0.00138888892 : f32
    %606 = vector.broadcast %cst_220 : f32 to vector<8x512xf32>
    %607 = arith.addf %606, %605 : vector<8x512xf32>
    %608 = arith.mulf %589, %607 : vector<8x512xf32>
    %cst_221 = arith.constant 0.0416666679 : f32
    %609 = vector.broadcast %cst_221 : f32 to vector<8x512xf32>
    %610 = arith.addf %609, %608 : vector<8x512xf32>
    %611 = arith.mulf %589, %610 : vector<8x512xf32>
    %cst_222 = arith.constant -5.000000e-01 : f32
    %612 = vector.broadcast %cst_222 : f32 to vector<8x512xf32>
    %613 = arith.addf %612, %611 : vector<8x512xf32>
    %614 = arith.mulf %589, %613 : vector<8x512xf32>
    %cst_223 = arith.constant 1.000000e+00 : f32
    %615 = vector.broadcast %cst_223 : f32 to vector<8x512xf32>
    %616 = arith.addf %615, %614 : vector<8x512xf32>
    %cst_224 = arith.constant 2.500000e-01 : f32
    %617 = vector.broadcast %cst_224 : f32 to vector<8x512xf32>
    %618 = arith.mulf %582, %617 : vector<8x512xf32>
    %619 = math.floor %618 : vector<8x512xf32>
    %cst_225 = arith.constant 4.000000e+00 : f32
    %620 = vector.broadcast %cst_225 : f32 to vector<8x512xf32>
    %621 = arith.mulf %620, %619 : vector<8x512xf32>
    %622 = arith.subf %582, %621 : vector<8x512xf32>
    %cst_226 = arith.constant 1.000000e+00 : f32
    %623 = vector.broadcast %cst_226 : f32 to vector<8x512xf32>
    %624 = arith.cmpf oeq, %622, %623 : vector<8x512xf32>
    %cst_227 = arith.constant 3.000000e+00 : f32
    %625 = vector.broadcast %cst_227 : f32 to vector<8x512xf32>
    %626 = arith.cmpf oeq, %622, %625 : vector<8x512xf32>
    %627 = arith.ori %624, %626 : vector<8x512xi1>
    %628 = arith.select %627, %616, %603 : vector<8x512xi1>, vector<8x512xf32>
    %629 = arith.select %627, %603, %616 : vector<8x512xi1>, vector<8x512xf32>
    %cst_228 = arith.constant 2.000000e+00 : f32
    %630 = vector.broadcast %cst_228 : f32 to vector<8x512xf32>
    %631 = arith.cmpf oge, %622, %630 : vector<8x512xf32>
    %cst_229 = arith.constant 0.000000e+00 : f32
    %632 = vector.broadcast %cst_229 : f32 to vector<8x512xf32>
    %633 = arith.subf %632, %628 : vector<8x512xf32>
    %634 = arith.select %631, %633, %628 : vector<8x512xi1>, vector<8x512xf32>
    %cst_230 = arith.constant 1.000000e+00 : f32
    %635 = vector.broadcast %cst_230 : f32 to vector<8x512xf32>
    %636 = arith.cmpf oeq, %622, %635 : vector<8x512xf32>
    %cst_231 = arith.constant 2.000000e+00 : f32
    %637 = vector.broadcast %cst_231 : f32 to vector<8x512xf32>
    %638 = arith.cmpf oeq, %622, %637 : vector<8x512xf32>
    %639 = arith.ori %636, %638 : vector<8x512xi1>
    %cst_232 = arith.constant 0.000000e+00 : f32
    %640 = vector.broadcast %cst_232 : f32 to vector<8x512xf32>
    %641 = arith.subf %640, %629 : vector<8x512xf32>
    %642 = arith.select %639, %641, %629 : vector<8x512xi1>, vector<8x512xf32>
    %643 = arith.mulf %577, %577 : vector<8x512xf32>
    %cst_233 = arith.constant 3.000000e+00 : f32
    %644 = vector.broadcast %cst_233 : f32 to vector<8x512xf32>
    %645 = arith.subf %644, %643 : vector<8x512xf32>
    %646 = arith.mulf %645, %634 : vector<8x512xf32>
    %cst_234 = arith.constant 3.000000e+00 : f32
    %647 = vector.broadcast %cst_234 : f32 to vector<8x512xf32>
    %648 = arith.mulf %647, %577 : vector<8x512xf32>
    %649 = arith.mulf %648, %642 : vector<8x512xf32>
    %650 = arith.subf %646, %649 : vector<8x512xf32>
    %cst_235 = arith.constant 1.947040e-01 : f32
    %651 = vector.broadcast %cst_235 : f32 to vector<8x512xf32>
    %652 = arith.mulf %11, %651 : vector<8x512xf32>
    %653 = arith.mulf %650, %652 : vector<8x512xf32>
    %c11 = arith.constant 11 : index
    %c0_236 = arith.constant 0 : index
    %c0_237 = arith.constant 0 : index
    %654 = vector.load %arg2[%c11, %c0_236, %c0_237] : memref<15x8x512xf32, #tpu.memory_space<vmem>>, vector<1x8x512xf32>
    %655 = vector.shape_cast %654 : vector<1x8x512xf32> to vector<8x512xf32>
    %656 = vector.shape_cast %653 : vector<8x512xf32> to vector<1x8x512xf32>
    tpu.vector_store %arg2[%c11, %c0_236, %c0_237], %656 {strides = array<i32>} : memref<15x8x512xf32, #tpu.memory_space<vmem>>, vector<1x8x512xf32>,
    %cst_238 = arith.constant 2.46458817 : f32
    %657 = vector.broadcast %cst_238 : f32 to vector<8x512xf32>
    %658 = arith.mulf %4, %657 : vector<8x512xf32>
    %cst_239 = arith.constant 0.636619746 : f32
    %659 = vector.broadcast %cst_239 : f32 to vector<8x512xf32>
    %660 = arith.mulf %658, %659 : vector<8x512xf32>
    %cst_240 = arith.constant 5.000000e-01 : f32
    %661 = vector.broadcast %cst_240 : f32 to vector<8x512xf32>
    %662 = arith.addf %660, %661 : vector<8x512xf32>
    %663 = math.floor %662 : vector<8x512xf32>
    %cst_241 = arith.constant 1.57079637 : f32
    %664 = vector.broadcast %cst_241 : f32 to vector<8x512xf32>
    %665 = arith.mulf %663, %664 : vector<8x512xf32>
    %666 = arith.subf %658, %665 : vector<8x512xf32>
    %cst_242 = arith.constant -4.37113883E-8 : f32
    %667 = vector.broadcast %cst_242 : f32 to vector<8x512xf32>
    %668 = arith.mulf %663, %667 : vector<8x512xf32>
    %669 = arith.subf %666, %668 : vector<8x512xf32>
    %670 = arith.mulf %669, %669 : vector<8x512xf32>
    %cst_243 = arith.constant 2.75573188E-6 : f32
    %671 = vector.broadcast %cst_243 : f32 to vector<8x512xf32>
    %672 = arith.mulf %670, %671 : vector<8x512xf32>
    %cst_244 = arith.constant -1.98412701E-4 : f32
    %673 = vector.broadcast %cst_244 : f32 to vector<8x512xf32>
    %674 = arith.addf %673, %672 : vector<8x512xf32>
    %675 = arith.mulf %670, %674 : vector<8x512xf32>
    %cst_245 = arith.constant 0.00833333377 : f32
    %676 = vector.broadcast %cst_245 : f32 to vector<8x512xf32>
    %677 = arith.addf %676, %675 : vector<8x512xf32>
    %678 = arith.mulf %670, %677 : vector<8x512xf32>
    %cst_246 = arith.constant -0.166666672 : f32
    %679 = vector.broadcast %cst_246 : f32 to vector<8x512xf32>
    %680 = arith.addf %679, %678 : vector<8x512xf32>
    %681 = arith.mulf %670, %680 : vector<8x512xf32>
    %cst_247 = arith.constant 1.000000e+00 : f32
    %682 = vector.broadcast %cst_247 : f32 to vector<8x512xf32>
    %683 = arith.addf %682, %681 : vector<8x512xf32>
    %684 = arith.mulf %669, %683 : vector<8x512xf32>
    %cst_248 = arith.constant 2.48015876E-5 : f32
    %685 = vector.broadcast %cst_248 : f32 to vector<8x512xf32>
    %686 = arith.mulf %670, %685 : vector<8x512xf32>
    %cst_249 = arith.constant -0.00138888892 : f32
    %687 = vector.broadcast %cst_249 : f32 to vector<8x512xf32>
    %688 = arith.addf %687, %686 : vector<8x512xf32>
    %689 = arith.mulf %670, %688 : vector<8x512xf32>
    %cst_250 = arith.constant 0.0416666679 : f32
    %690 = vector.broadcast %cst_250 : f32 to vector<8x512xf32>
    %691 = arith.addf %690, %689 : vector<8x512xf32>
    %692 = arith.mulf %670, %691 : vector<8x512xf32>
    %cst_251 = arith.constant -5.000000e-01 : f32
    %693 = vector.broadcast %cst_251 : f32 to vector<8x512xf32>
    %694 = arith.addf %693, %692 : vector<8x512xf32>
    %695 = arith.mulf %670, %694 : vector<8x512xf32>
    %cst_252 = arith.constant 1.000000e+00 : f32
    %696 = vector.broadcast %cst_252 : f32 to vector<8x512xf32>
    %697 = arith.addf %696, %695 : vector<8x512xf32>
    %cst_253 = arith.constant 2.500000e-01 : f32
    %698 = vector.broadcast %cst_253 : f32 to vector<8x512xf32>
    %699 = arith.mulf %663, %698 : vector<8x512xf32>
    %700 = math.floor %699 : vector<8x512xf32>
    %cst_254 = arith.constant 4.000000e+00 : f32
    %701 = vector.broadcast %cst_254 : f32 to vector<8x512xf32>
    %702 = arith.mulf %701, %700 : vector<8x512xf32>
    %703 = arith.subf %663, %702 : vector<8x512xf32>
    %cst_255 = arith.constant 1.000000e+00 : f32
    %704 = vector.broadcast %cst_255 : f32 to vector<8x512xf32>
    %705 = arith.cmpf oeq, %703, %704 : vector<8x512xf32>
    %cst_256 = arith.constant 3.000000e+00 : f32
    %706 = vector.broadcast %cst_256 : f32 to vector<8x512xf32>
    %707 = arith.cmpf oeq, %703, %706 : vector<8x512xf32>
    %708 = arith.ori %705, %707 : vector<8x512xi1>
    %709 = arith.select %708, %697, %684 : vector<8x512xi1>, vector<8x512xf32>
    %710 = arith.select %708, %684, %697 : vector<8x512xi1>, vector<8x512xf32>
    %cst_257 = arith.constant 2.000000e+00 : f32
    %711 = vector.broadcast %cst_257 : f32 to vector<8x512xf32>
    %712 = arith.cmpf oge, %703, %711 : vector<8x512xf32>
    %cst_258 = arith.constant 0.000000e+00 : f32
    %713 = vector.broadcast %cst_258 : f32 to vector<8x512xf32>
    %714 = arith.subf %713, %709 : vector<8x512xf32>
    %715 = arith.select %712, %714, %709 : vector<8x512xi1>, vector<8x512xf32>
    %cst_259 = arith.constant 1.000000e+00 : f32
    %716 = vector.broadcast %cst_259 : f32 to vector<8x512xf32>
    %717 = arith.cmpf oeq, %703, %716 : vector<8x512xf32>
    %cst_260 = arith.constant 2.000000e+00 : f32
    %718 = vector.broadcast %cst_260 : f32 to vector<8x512xf32>
    %719 = arith.cmpf oeq, %703, %718 : vector<8x512xf32>
    %720 = arith.ori %717, %719 : vector<8x512xi1>
    %cst_261 = arith.constant 0.000000e+00 : f32
    %721 = vector.broadcast %cst_261 : f32 to vector<8x512xf32>
    %722 = arith.subf %721, %710 : vector<8x512xf32>
    %723 = arith.select %720, %722, %710 : vector<8x512xi1>, vector<8x512xf32>
    %724 = arith.mulf %658, %658 : vector<8x512xf32>
    %cst_262 = arith.constant 3.000000e+00 : f32
    %725 = vector.broadcast %cst_262 : f32 to vector<8x512xf32>
    %726 = arith.subf %725, %724 : vector<8x512xf32>
    %727 = arith.mulf %726, %715 : vector<8x512xf32>
    %cst_263 = arith.constant 3.000000e+00 : f32
    %728 = vector.broadcast %cst_263 : f32 to vector<8x512xf32>
    %729 = arith.mulf %728, %658 : vector<8x512xf32>
    %730 = arith.mulf %729, %723 : vector<8x512xf32>
    %731 = arith.subf %727, %730 : vector<8x512xf32>
    %cst_264 = arith.constant 0.105165295 : f32
    %732 = vector.broadcast %cst_264 : f32 to vector<8x512xf32>
    %733 = arith.mulf %11, %732 : vector<8x512xf32>
    %734 = arith.mulf %731, %733 : vector<8x512xf32>
    %c12 = arith.constant 12 : index
    %c0_265 = arith.constant 0 : index
    %c0_266 = arith.constant 0 : index
    %735 = vector.load %arg2[%c12, %c0_265, %c0_266] : memref<15x8x512xf32, #tpu.memory_space<vmem>>, vector<1x8x512xf32>
    %736 = vector.shape_cast %735 : vector<1x8x512xf32> to vector<8x512xf32>
    %737 = vector.shape_cast %734 : vector<8x512xf32> to vector<1x8x512xf32>
    tpu.vector_store %arg2[%c12, %c0_265, %c0_266], %737 {strides = array<i32>} : memref<15x8x512xf32, #tpu.memory_space<vmem>>, vector<1x8x512xf32>,
    %cst_267 = arith.constant 3.10292053 : f32
    %738 = vector.broadcast %cst_267 : f32 to vector<8x512xf32>
    %739 = arith.mulf %4, %738 : vector<8x512xf32>
    %cst_268 = arith.constant 0.636619746 : f32
    %740 = vector.broadcast %cst_268 : f32 to vector<8x512xf32>
    %741 = arith.mulf %739, %740 : vector<8x512xf32>
    %cst_269 = arith.constant 5.000000e-01 : f32
    %742 = vector.broadcast %cst_269 : f32 to vector<8x512xf32>
    %743 = arith.addf %741, %742 : vector<8x512xf32>
    %744 = math.floor %743 : vector<8x512xf32>
    %cst_270 = arith.constant 1.57079637 : f32
    %745 = vector.broadcast %cst_270 : f32 to vector<8x512xf32>
    %746 = arith.mulf %744, %745 : vector<8x512xf32>
    %747 = arith.subf %739, %746 : vector<8x512xf32>
    %cst_271 = arith.constant -4.37113883E-8 : f32
    %748 = vector.broadcast %cst_271 : f32 to vector<8x512xf32>
    %749 = arith.mulf %744, %748 : vector<8x512xf32>
    %750 = arith.subf %747, %749 : vector<8x512xf32>
    %751 = arith.mulf %750, %750 : vector<8x512xf32>
    %cst_272 = arith.constant 2.75573188E-6 : f32
    %752 = vector.broadcast %cst_272 : f32 to vector<8x512xf32>
    %753 = arith.mulf %751, %752 : vector<8x512xf32>
    %cst_273 = arith.constant -1.98412701E-4 : f32
    %754 = vector.broadcast %cst_273 : f32 to vector<8x512xf32>
    %755 = arith.addf %754, %753 : vector<8x512xf32>
    %756 = arith.mulf %751, %755 : vector<8x512xf32>
    %cst_274 = arith.constant 0.00833333377 : f32
    %757 = vector.broadcast %cst_274 : f32 to vector<8x512xf32>
    %758 = arith.addf %757, %756 : vector<8x512xf32>
    %759 = arith.mulf %751, %758 : vector<8x512xf32>
    %cst_275 = arith.constant -0.166666672 : f32
    %760 = vector.broadcast %cst_275 : f32 to vector<8x512xf32>
    %761 = arith.addf %760, %759 : vector<8x512xf32>
    %762 = arith.mulf %751, %761 : vector<8x512xf32>
    %cst_276 = arith.constant 1.000000e+00 : f32
    %763 = vector.broadcast %cst_276 : f32 to vector<8x512xf32>
    %764 = arith.addf %763, %762 : vector<8x512xf32>
    %765 = arith.mulf %750, %764 : vector<8x512xf32>
    %cst_277 = arith.constant 2.48015876E-5 : f32
    %766 = vector.broadcast %cst_277 : f32 to vector<8x512xf32>
    %767 = arith.mulf %751, %766 : vector<8x512xf32>
    %cst_278 = arith.constant -0.00138888892 : f32
    %768 = vector.broadcast %cst_278 : f32 to vector<8x512xf32>
    %769 = arith.addf %768, %767 : vector<8x512xf32>
    %770 = arith.mulf %751, %769 : vector<8x512xf32>
    %cst_279 = arith.constant 0.0416666679 : f32
    %771 = vector.broadcast %cst_279 : f32 to vector<8x512xf32>
    %772 = arith.addf %771, %770 : vector<8x512xf32>
    %773 = arith.mulf %751, %772 : vector<8x512xf32>
    %cst_280 = arith.constant -5.000000e-01 : f32
    %774 = vector.broadcast %cst_280 : f32 to vector<8x512xf32>
    %775 = arith.addf %774, %773 : vector<8x512xf32>
    %776 = arith.mulf %751, %775 : vector<8x512xf32>
    %cst_281 = arith.constant 1.000000e+00 : f32
    %777 = vector.broadcast %cst_281 : f32 to vector<8x512xf32>
    %778 = arith.addf %777, %776 : vector<8x512xf32>
    %cst_282 = arith.constant 2.500000e-01 : f32
    %779 = vector.broadcast %cst_282 : f32 to vector<8x512xf32>
    %780 = arith.mulf %744, %779 : vector<8x512xf32>
    %781 = math.floor %780 : vector<8x512xf32>
    %cst_283 = arith.constant 4.000000e+00 : f32
    %782 = vector.broadcast %cst_283 : f32 to vector<8x512xf32>
    %783 = arith.mulf %782, %781 : vector<8x512xf32>
    %784 = arith.subf %744, %783 : vector<8x512xf32>
    %cst_284 = arith.constant 1.000000e+00 : f32
    %785 = vector.broadcast %cst_284 : f32 to vector<8x512xf32>
    %786 = arith.cmpf oeq, %784, %785 : vector<8x512xf32>
    %cst_285 = arith.constant 3.000000e+00 : f32
    %787 = vector.broadcast %cst_285 : f32 to vector<8x512xf32>
    %788 = arith.cmpf oeq, %784, %787 : vector<8x512xf32>
    %789 = arith.ori %786, %788 : vector<8x512xi1>
    %790 = arith.select %789, %778, %765 : vector<8x512xi1>, vector<8x512xf32>
    %791 = arith.select %789, %765, %778 : vector<8x512xi1>, vector<8x512xf32>
    %cst_286 = arith.constant 2.000000e+00 : f32
    %792 = vector.broadcast %cst_286 : f32 to vector<8x512xf32>
    %793 = arith.cmpf oge, %784, %792 : vector<8x512xf32>
    %cst_287 = arith.constant 0.000000e+00 : f32
    %794 = vector.broadcast %cst_287 : f32 to vector<8x512xf32>
    %795 = arith.subf %794, %790 : vector<8x512xf32>
    %796 = arith.select %793, %795, %790 : vector<8x512xi1>, vector<8x512xf32>
    %cst_288 = arith.constant 1.000000e+00 : f32
    %797 = vector.broadcast %cst_288 : f32 to vector<8x512xf32>
    %798 = arith.cmpf oeq, %784, %797 : vector<8x512xf32>
    %cst_289 = arith.constant 2.000000e+00 : f32
    %799 = vector.broadcast %cst_289 : f32 to vector<8x512xf32>
    %800 = arith.cmpf oeq, %784, %799 : vector<8x512xf32>
    %801 = arith.ori %798, %800 : vector<8x512xi1>
    %cst_290 = arith.constant 0.000000e+00 : f32
    %802 = vector.broadcast %cst_290 : f32 to vector<8x512xf32>
    %803 = arith.subf %802, %791 : vector<8x512xf32>
    %804 = arith.select %801, %803, %791 : vector<8x512xi1>, vector<8x512xf32>
    %805 = arith.mulf %739, %739 : vector<8x512xf32>
    %cst_291 = arith.constant 3.000000e+00 : f32
    %806 = vector.broadcast %cst_291 : f32 to vector<8x512xf32>
    %807 = arith.subf %806, %805 : vector<8x512xf32>
    %808 = arith.mulf %807, %796 : vector<8x512xf32>
    %cst_292 = arith.constant 3.000000e+00 : f32
    %809 = vector.broadcast %cst_292 : f32 to vector<8x512xf32>
    %810 = arith.mulf %809, %739 : vector<8x512xf32>
    %811 = arith.mulf %810, %804 : vector<8x512xf32>
    %812 = arith.subf %808, %811 : vector<8x512xf32>
    %cst_293 = arith.constant 0.0661015511 : f32
    %813 = vector.broadcast %cst_293 : f32 to vector<8x512xf32>
    %814 = arith.mulf %11, %813 : vector<8x512xf32>
    %815 = arith.mulf %812, %814 : vector<8x512xf32>
    %c13 = arith.constant 13 : index
    %c0_294 = arith.constant 0 : index
    %c0_295 = arith.constant 0 : index
    %816 = vector.load %arg2[%c13, %c0_294, %c0_295] : memref<15x8x512xf32, #tpu.memory_space<vmem>>, vector<1x8x512xf32>
    %817 = vector.shape_cast %816 : vector<1x8x512xf32> to vector<8x512xf32>
    %818 = vector.shape_cast %815 : vector<8x512xf32> to vector<1x8x512xf32>
    tpu.vector_store %arg2[%c13, %c0_294, %c0_295], %818 {strides = array<i32>} : memref<15x8x512xf32, #tpu.memory_space<vmem>>, vector<1x8x512xf32>,
    %cst_296 = arith.constant 3.73780727 : f32
    %819 = vector.broadcast %cst_296 : f32 to vector<8x512xf32>
    %820 = arith.mulf %4, %819 : vector<8x512xf32>
    %cst_297 = arith.constant 0.636619746 : f32
    %821 = vector.broadcast %cst_297 : f32 to vector<8x512xf32>
    %822 = arith.mulf %820, %821 : vector<8x512xf32>
    %cst_298 = arith.constant 5.000000e-01 : f32
    %823 = vector.broadcast %cst_298 : f32 to vector<8x512xf32>
    %824 = arith.addf %822, %823 : vector<8x512xf32>
    %825 = math.floor %824 : vector<8x512xf32>
    %cst_299 = arith.constant 1.57079637 : f32
    %826 = vector.broadcast %cst_299 : f32 to vector<8x512xf32>
    %827 = arith.mulf %825, %826 : vector<8x512xf32>
    %828 = arith.subf %820, %827 : vector<8x512xf32>
    %cst_300 = arith.constant -4.37113883E-8 : f32
    %829 = vector.broadcast %cst_300 : f32 to vector<8x512xf32>
    %830 = arith.mulf %825, %829 : vector<8x512xf32>
    %831 = arith.subf %828, %830 : vector<8x512xf32>
    %832 = arith.mulf %831, %831 : vector<8x512xf32>
    %cst_301 = arith.constant 2.75573188E-6 : f32
    %833 = vector.broadcast %cst_301 : f32 to vector<8x512xf32>
    %834 = arith.mulf %832, %833 : vector<8x512xf32>
    %cst_302 = arith.constant -1.98412701E-4 : f32
    %835 = vector.broadcast %cst_302 : f32 to vector<8x512xf32>
    %836 = arith.addf %835, %834 : vector<8x512xf32>
    %837 = arith.mulf %832, %836 : vector<8x512xf32>
    %cst_303 = arith.constant 0.00833333377 : f32
    %838 = vector.broadcast %cst_303 : f32 to vector<8x512xf32>
    %839 = arith.addf %838, %837 : vector<8x512xf32>
    %840 = arith.mulf %832, %839 : vector<8x512xf32>
    %cst_304 = arith.constant -0.166666672 : f32
    %841 = vector.broadcast %cst_304 : f32 to vector<8x512xf32>
    %842 = arith.addf %841, %840 : vector<8x512xf32>
    %843 = arith.mulf %832, %842 : vector<8x512xf32>
    %cst_305 = arith.constant 1.000000e+00 : f32
    %844 = vector.broadcast %cst_305 : f32 to vector<8x512xf32>
    %845 = arith.addf %844, %843 : vector<8x512xf32>
    %846 = arith.mulf %831, %845 : vector<8x512xf32>
    %cst_306 = arith.constant 2.48015876E-5 : f32
    %847 = vector.broadcast %cst_306 : f32 to vector<8x512xf32>
    %848 = arith.mulf %832, %847 : vector<8x512xf32>
    %cst_307 = arith.constant -0.00138888892 : f32
    %849 = vector.broadcast %cst_307 : f32 to vector<8x512xf32>
    %850 = arith.addf %849, %848 : vector<8x512xf32>
    %851 = arith.mulf %832, %850 : vector<8x512xf32>
    %cst_308 = arith.constant 0.0416666679 : f32
    %852 = vector.broadcast %cst_308 : f32 to vector<8x512xf32>
    %853 = arith.addf %852, %851 : vector<8x512xf32>
    %854 = arith.mulf %832, %853 : vector<8x512xf32>
    %cst_309 = arith.constant -5.000000e-01 : f32
    %855 = vector.broadcast %cst_309 : f32 to vector<8x512xf32>
    %856 = arith.addf %855, %854 : vector<8x512xf32>
    %857 = arith.mulf %832, %856 : vector<8x512xf32>
    %cst_310 = arith.constant 1.000000e+00 : f32
    %858 = vector.broadcast %cst_310 : f32 to vector<8x512xf32>
    %859 = arith.addf %858, %857 : vector<8x512xf32>
    %cst_311 = arith.constant 2.500000e-01 : f32
    %860 = vector.broadcast %cst_311 : f32 to vector<8x512xf32>
    %861 = arith.mulf %825, %860 : vector<8x512xf32>
    %862 = math.floor %861 : vector<8x512xf32>
    %cst_312 = arith.constant 4.000000e+00 : f32
    %863 = vector.broadcast %cst_312 : f32 to vector<8x512xf32>
    %864 = arith.mulf %863, %862 : vector<8x512xf32>
    %865 = arith.subf %825, %864 : vector<8x512xf32>
    %cst_313 = arith.constant 1.000000e+00 : f32
    %866 = vector.broadcast %cst_313 : f32 to vector<8x512xf32>
    %867 = arith.cmpf oeq, %865, %866 : vector<8x512xf32>
    %cst_314 = arith.constant 3.000000e+00 : f32
    %868 = vector.broadcast %cst_314 : f32 to vector<8x512xf32>
    %869 = arith.cmpf oeq, %865, %868 : vector<8x512xf32>
    %870 = arith.ori %867, %869 : vector<8x512xi1>
    %871 = arith.select %870, %859, %846 : vector<8x512xi1>, vector<8x512xf32>
    %872 = arith.select %870, %846, %859 : vector<8x512xi1>, vector<8x512xf32>
    %cst_315 = arith.constant 2.000000e+00 : f32
    %873 = vector.broadcast %cst_315 : f32 to vector<8x512xf32>
    %874 = arith.cmpf oge, %865, %873 : vector<8x512xf32>
    %cst_316 = arith.constant 0.000000e+00 : f32
    %875 = vector.broadcast %cst_316 : f32 to vector<8x512xf32>
    %876 = arith.subf %875, %871 : vector<8x512xf32>
    %877 = arith.select %874, %876, %871 : vector<8x512xi1>, vector<8x512xf32>
    %cst_317 = arith.constant 1.000000e+00 : f32
    %878 = vector.broadcast %cst_317 : f32 to vector<8x512xf32>
    %879 = arith.cmpf oeq, %865, %878 : vector<8x512xf32>
    %cst_318 = arith.constant 2.000000e+00 : f32
    %880 = vector.broadcast %cst_318 : f32 to vector<8x512xf32>
    %881 = arith.cmpf oeq, %865, %880 : vector<8x512xf32>
    %882 = arith.ori %879, %881 : vector<8x512xi1>
    %cst_319 = arith.constant 0.000000e+00 : f32
    %883 = vector.broadcast %cst_319 : f32 to vector<8x512xf32>
    %884 = arith.subf %883, %872 : vector<8x512xf32>
    %885 = arith.select %882, %884, %872 : vector<8x512xi1>, vector<8x512xf32>
    %886 = arith.mulf %820, %820 : vector<8x512xf32>
    %cst_320 = arith.constant 3.000000e+00 : f32
    %887 = vector.broadcast %cst_320 : f32 to vector<8x512xf32>
    %888 = arith.subf %887, %886 : vector<8x512xf32>
    %889 = arith.mulf %888, %877 : vector<8x512xf32>
    %cst_321 = arith.constant 3.000000e+00 : f32
    %890 = vector.broadcast %cst_321 : f32 to vector<8x512xf32>
    %891 = arith.mulf %890, %820 : vector<8x512xf32>
    %892 = arith.mulf %891, %885 : vector<8x512xf32>
    %893 = arith.subf %889, %892 : vector<8x512xf32>
    %cst_322 = arith.constant 0.0454641618 : f32
    %894 = vector.broadcast %cst_322 : f32 to vector<8x512xf32>
    %895 = arith.mulf %11, %894 : vector<8x512xf32>
    %896 = arith.mulf %893, %895 : vector<8x512xf32>
    %c14 = arith.constant 14 : index
    %c0_323 = arith.constant 0 : index
    %c0_324 = arith.constant 0 : index
    %897 = vector.load %arg2[%c14, %c0_323, %c0_324] : memref<15x8x512xf32, #tpu.memory_space<vmem>>, vector<1x8x512xf32>
    %898 = vector.shape_cast %897 : vector<1x8x512xf32> to vector<8x512xf32>
    %899 = vector.shape_cast %896 : vector<8x512xf32> to vector<1x8x512xf32>
    tpu.vector_store %arg2[%c14, %c0_323, %c0_324], %899 {strides = array<i32>} : memref<15x8x512xf32, #tpu.memory_space<vmem>>, vector<1x8x512xf32>,
    return
  }
  func.func @transform_0(%arg0: i32) -> (i32, i32) {
    %c0_i32 = arith.constant 0 : i32
    %c0_i32_0 = arith.constant 0 : i32
    return %arg0, %c0_i32 : i32, i32
  }
  func.func @transform_1(%arg0: i32) -> (i32, i32, i32) {
    %c0_i32 = arith.constant 0 : i32
    %c0_i32_0 = arith.constant 0 : i32
    %c0_i32_1 = arith.constant 0 : i32
    return %c0_i32, %arg0, %c0_i32_0 : i32, i32, i32
  }
}

</mosaic_0001>

<bundles_post_ra>
// kernel: tpu_custom_call.1
= control target key start
LH: loop header
LB: loop body
LE: loop exit
PB: predicated region body
PF: predicated region fallthrough
CT: control target
= control target key end

     0   :  { %6 = vsyncpa [#allocation3], 0  ;;  %s4084_s0 = inlined_call_operand.hbm [shape: f32[8,512], index: 0, kind: input, shape index: {}]   ;;  %s4085_s1 = inlined_call_operand.hbm [shape: f32[15,8,512], index: 1, kind: output, shape index: {}]  }
   0x1   :  { %7 = vsyncpa [#allocation4], 0  ;;  %s2368_s6 = smov [#allocation2]   ;;  %s2320_s10 = scalar_lea.hbm %s4084_s0, 512 }
   0x2   :  { %s14_s7 = sshll.u32 %s2368_s6, 4  ;;  %p2321_p0 = scmp.ne.s32.totalorder %s4084_s0, %s2320_s10  ;;  %s15_s7 = int_to_ptr.vmem [resolvable:$true] %s14_s7 }
   0x3   :  { %p2324_p1 = scmp.lt.u32.totalorder %s2320_s10, %s4084_s0 }
   0x5   :  { %p2326_p2 = pnand %p2324_p1, %p2321_p0 }
   0x7   :  { %2329 = shalt.err (!%p2326_p2)
}
   0x8   :  { %s2330_s15 = scalar_lea.vmem %s15_s7, 512  ;;  %p2335_p4 = scmp.lt.s32.totalorder %s15_s7, %s15_s7 }
   0x9   :  { %p2331_p3 = scmp.ne.s32.totalorder %s15_s7, %s2330_s15  ;;  %p2336_p5 = scmp.lt.s32.totalorder %s2330_s15, %s2330_s15 }
   0xb   :  { %p2337_p6 = por %p2336_p5, %p2335_p4 }
   0xd   :  { %p2338_p7 = pnand %p2337_p6, %p2331_p3 }
   0xf   :  { %2341 = shalt.err (!%p2338_p7)
}
  0x10   :  { %17 = dma.hbm_to_vmem [thread:$0]  %s4084_s0, 512, %s15_s7, [#allocation3]  }
  0x11   :  { %2364 = dma.done.wait [#allocation3], 512  }
  0x12   :  { %2365 = vsyncadd [#allocation3], 4294966784  ;;  %v21_v0 = vld [vmem:[#allocation2] sm:$0xff]  ;;  %v22_v1 = vld [vmem:[#allocation2 + $0x8] sm:$0xff]  ;;  %s2369_s0 = smov [#allocation5]  }
  0x13   :  { %v23_v2 = vld [vmem:[#allocation2 + $0x10] sm:$0xff]  ;;  %v25_v3 = vmax.f32 %v21_v0, 1e-12  ;;  %v26_v4 = vmax.f32 %v22_v1, 1e-12  ;;  %v24_v6 = vld [vmem:[#allocation2 + $0x18] sm:$0xff] }
  0x14   :  { %v27_v5 = vmax.f32 %v23_v2, 1e-12  ;;  %v28_v10 = vmax.f32 %v24_v6, 1e-12  ;;  %s2296_s18 = sshll.u32 %s2369_s0, 4  ;;  %s2297_s18 = int_to_ptr.vmem [resolvable:$true] %s2296_s18 }
  0x15   :  { %v2394_v7 = vmin.f32 %v25_v3, 5.0  ;;  %v2396_v8 = vmin.f32 %v26_v4, 5.0  ;;  %s2342_s19 = scalar_lea.vmem %s2297_s18, 7680  ;;  %p2347_p9 = scmp.lt.s32.totalorder %s2297_s18, %s2297_s18 }
  0x16   :  { %v2398_v9 = vmin.f32 %v27_v5, 5.0  ;;  %v2405_v14 = vmin.f32 %v28_v10, 5.0  ;;  %p2343_p8 = scmp.ne.s32.totalorder %s2297_s18, %s2342_s19  ;;  %p2348_p10 = scmp.lt.s32.totalorder %s2342_s19, %s2342_s19 }
  0x17   :  { %2312 = vrcp.f32 %v2394_v7  ;;  %v57_v11 = vmul.f32 0.62831855, %v2394_v7  ;;  %v58_v12 = vmul.f32 0.62831855, %v2396_v8  ;;  %v2412_v19 = vmul.f32 0.8986819, %v2394_v7 }
  0x18   :  { %v59_v13 = vmul.f32 0.62831855, %v2398_v9  ;;  %2314 = vrcp.f32 %v2396_v8  ;;  %v2409_v18 = vmul.f32 0.62831855, %v2405_v14  ;;  %v2415_v20 = vmul.f32 0.8986819, %v2396_v8  ;;  %p2349_p11 = por %p2348_p10, %p2347_p9 }
  0x19   :  { %v61_v15 = vmul.f32 0.63661975, %v57_v11  ;;  %v62_v16 = vmul.f32 0.63661975, %v58_v12  ;;  %2316 = vrcp.f32 %v2398_v9  ;;  %v325_v28 = vmul.f32 0.63661975, %v2412_v19 }
  0x1a   :  { %v63_v17 = vmul.f32 0.63661975, %v59_v13  ;;  %v64_v27 = vmul.f32 0.63661975, %v2409_v18  ;;  %v326_v29 = vmul.f32 0.63661975, %v2415_v20  ;;  %2318 = vrcp.f32 %v2405_v14  ;;  %p2350_p12 = pnand %p2349_p11, %p2343_p8 }
  0x1b   :  { %v65_v21 = vadd.f32 0.5, %v61_v15  ;;  %v66_v22 = vadd.f32 0.5, %v62_v16  ;;  %v329_v49 = vadd.f32 0.5, %v325_v28 }
  0x1c   :  { %v67_v23 = vadd.f32 0.5, %v63_v17  ;;  %v68_v54 = vadd.f32 0.5, %v64_v27  ;;  %v2436_v55 = vadd.f32 0.5, %v326_v29 }
  0x1d   :  { %v69_v24 = vfloor.f32 %v65_v21  ;;  %v70_v25 = vfloor.f32 %v66_v22  ;;  %v2447_v63 = vfloor.f32 %v329_v49 }
  0x1e   :  { %v2417_v26 = vfloor.f32 %v67_v23  ;;  %v2458_v10 = vfloor.f32 %v68_v54 }
  0x1f   :  { %v73_v30 = vmul.f32 1.5707964, %v69_v24  ;;  %v81_v31 = vmul.f32 -4.371139e-08, %v69_v24  ;;  %v161_v32 = vmul.f32 0.25, %v69_v24  ;;  %v162_v33 = vmul.f32 0.25, %v70_v25 }
  0x20   :  { %v74_v34 = vmul.f32 1.5707964, %v70_v25  ;;  %v82_v35 = vmul.f32 -4.371139e-08, %v70_v25  ;;  %v75_v36 = vmul.f32 1.5707964, %v2417_v26 }
  0x21   :  { %v2313_v37 = vpop.eup %2312  ;;  %v77_v38 = vsub.f32 %v57_v11, %v73_v30  ;;  %v165_v39 = vfloor.f32 %v161_v32  ;;  %v166_v40 = vfloor.f32 %v162_v33  ;;  %v83_v41 = vmul.f32 -4.371139e-08, %v2417_v26 }
  0x22   :  { %v2315_v42 = vpop.eup %2314  ;;  %v37_v43 = vmul.f32 %v2313_v37, %v2394_v7  ;;  %v78_v44 = vsub.f32 %v58_v12, %v74_v34  ;;  %v79_v45 = vsub.f32 %v59_v13, %v75_v36  ;;  %v163_v3 = vmul.f32 0.25, %v2417_v26 }
  0x23   :  { %v2425_v46 = vpop.eup %2316  ;;  %v2427_v47 = vsub.f32 %v77_v38, %v81_v31  ;;  %v169_v48 = vmul.f32 4.0, %v165_v39  ;;  %v170_v51 = vmul.f32 4.0, %v166_v40  ;;  %v38_v57 = vmul.f32 %v2315_v42, %v2396_v8 }
  0x24   :  { %v2430_v50 = vsub.f32 %v78_v44, %v82_v35  ;;  %v2432_v52 = vsub.f32 %v79_v45, %v83_v41  ;;  %v41_v56 = vsub.f32 2.0, %v37_v43  ;;  %v39_v59 = vmul.f32 %v2425_v46, %v2398_v9  ;;  %v2468_v27 = vpop.eup %2318 }
  0x25   :  { %v89_v53 = vmul.f32 %v2427_v47, %v2427_v47  ;;  %v2445_v62 = vsub.f32 %v69_v24, %v169_v48  ;;  %v2450_v1 = vsub.f32 %v70_v25, %v170_v51  ;;  %v42_v12 = vsub.f32 2.0, %v38_v57 }
  0x26   :  { %v2441_v58 = vmul.f32 %v2430_v50, %v2430_v50  ;;  %v2454_v2 = vmul.f32 %v2432_v52, %v2432_v52  ;;  %v2460_v11 = vmul.f32 %v2313_v37, %v41_v56  ;;  %v43_v15 = vsub.f32 2.0, %v39_v59 }
  0x27   :  { %v93_v60 = vmul.f32 2.7557319e-06, %v89_v53  ;;  %v129_v61 = vmul.f32 2.4801588e-05, %v89_v53  ;;  %vm177_vm0 = vcmp.eq.f32.partialorder %v2445_v62, 1.0  ;;  %vm181_vm1 = vcmp.eq.f32.partialorder %v2445_v62, 3.0 }
  0x28   :  { %v94_v0 = vmul.f32 2.7557319e-06, %v2441_v58  ;;  %v130_v6 = vmul.f32 2.4801588e-05, %v2441_v58  ;;  %vm178_vm2 = vcmp.eq.f32.partialorder %v2450_v1, 1.0  ;;  %v167_v25 = vfloor.f32 %v163_v3  ;;  %vm2502_vm9 = vmor %vm177_vm0, %vm181_vm1 }
  0x29   :  { %v97_v4 = vadd.f32 -0.0001984127, %v93_v60  ;;  %v133_v5 = vadd.f32 -0.0013888889, %v129_v61  ;;  %v95_v23 = vmul.f32 2.7557319e-06, %v2454_v2  ;;  %v2473_v31 = vmul.f32 %v2315_v42, %v42_v12 }
  0x2a   :  { %v98_v13 = vadd.f32 -0.0001984127, %v94_v0  ;;  %v134_v21 = vadd.f32 -0.0013888889, %v130_v6  ;;  %v131_v24 = vmul.f32 2.4801588e-05, %v2454_v2  ;;  %v2480_v43 = vmul.f32 %v2468_v27, %v2405_v14 }
  0x2b   :  { %v101_v16 = vmul.f32 %v97_v4, %v89_v53  ;;  %v137_v17 = vmul.f32 %v133_v5, %v89_v53  ;;  %vm182_vm3 = vcmp.eq.f32.partialorder %v2450_v1, 3.0  ;;  %vm209_vm4 = vcmp.eq.f32.partialorder %v2445_v62, 2.0 }
  0x2c   :  { %v102_v22 = vmul.f32 %v98_v13, %v2441_v58  ;;  %v138_v30 = vmul.f32 %v134_v21, %v2441_v58  ;;  %v99_v33 = vadd.f32 -0.0001984127, %v95_v23  ;;  %v135_v34 = vadd.f32 -0.0013888889, %v131_v24  ;;  %vm2512_vm11 = vmor %vm178_vm2, %vm182_vm3 }
  0x2d   :  { %v105_v28 = vadd.f32 0.008333334, %v101_v16  ;;  %v141_v29 = vadd.f32 0.041666668, %v137_v17  ;;  %v171_v38 = vmul.f32 4.0, %v167_v25  ;;  %vm197_vm5 = vcmp.ge.f32.partialorder %v2445_v62, 2.0  ;;  %vm213_vm13 = vmor %vm177_vm0, %vm209_vm4 }
  0x2e   :  { %v106_v32 = vadd.f32 0.008333334, %v102_v22  ;;  %v142_v37 = vadd.f32 0.041666668, %v138_v30  ;;  %v103_v40 = vmul.f32 %v99_v33, %v2454_v2  ;;  %v139_v41 = vmul.f32 %v135_v34, %v2454_v2 }
  0x2f   :  { %v109_v35 = vmul.f32 %v105_v28, %v89_v53  ;;  %v145_v36 = vmul.f32 %v141_v29, %v89_v53  ;;  %v2485_v48 = vsub.f32 %v2417_v26, %v171_v38  ;;  %vm198_vm6 = vcmp.ge.f32.partialorder %v2450_v1, 2.0 }
  0x30   :  { %v110_v39 = vmul.f32 %v106_v32, %v2441_v58  ;;  %v146_v45 = vmul.f32 %v142_v37, %v2441_v58  ;;  %v2489_v51 = vmul.f32 %v2425_v46, %v43_v15  ;;  %v107_v54 = vadd.f32 0.008333334, %v103_v40 }
  0x31   :  { %v113_v44 = vadd.f32 -0.16666667, %v109_v35  ;;  %v149_v42 = vadd.f32 -0.5, %v145_v36  ;;  %v143_v56 = vadd.f32 0.041666668, %v139_v41  ;;  %vm210_vm7 = vcmp.eq.f32.partialorder %v2450_v1, 2.0 }
  0x32   :  { %v114_v49 = vadd.f32 -0.16666667, %v110_v39  ;;  %v150_v60 = vadd.f32 -0.5, %v146_v45  ;;  %v111_v0 = vmul.f32 %v107_v54, %v2454_v2  ;;  %v44_v3 = vsub.f32 2.0, %v2480_v43  ;;  %vm214_vm15 = vmor %vm178_vm2, %vm210_vm7 }
  0x33   :  { %v117_v57 = vmul.f32 %v113_v44, %v89_v53  ;;  %v153_v59 = vmul.f32 %v149_v42, %v89_v53  ;;  %v147_v26 = vmul.f32 %v143_v56, %v2454_v2  ;;  %vm179_vm8 = vcmp.eq.f32.partialorder %v2485_v48, 1.0 }
  0x34   :  { %v118_v61 = vmul.f32 %v114_v49, %v2441_v58  ;;  %v154_v46 = vmul.f32 %v150_v60, %v2441_v58  ;;  %v115_v12 = vadd.f32 -0.16666667, %v111_v0  ;;  %vm183_vm10 = vcmp.eq.f32.partialorder %v2485_v48, 3.0 }
  0x35   :  { %v121_v4 = vadd.f32 1.0, %v117_v57  ;;  %v157_v5 = vadd.f32 1.0, %v153_v59  ;;  %v151_v13 = vadd.f32 -0.5, %v147_v26  ;;  %v76_v17 = vmul.f32 1.5707964, %v2458_v10  ;;  %vm187_vm0 = vmor %vm179_vm8, %vm183_vm10 }
  0x36   :  { %v122_v6 = vadd.f32 1.0, %v118_v61  ;;  %v158_v16 = vadd.f32 1.0, %v154_v46  ;;  %v84_v21 = vmul.f32 -4.371139e-08, %v2458_v10  ;;  %v119_v23 = vmul.f32 %v115_v12, %v2454_v2 }
  0x37   :  { %v125_v15 = vmul.f32 %v121_v4, %v2427_v47  ;;  %v155_v24 = vmul.f32 %v151_v13, %v2454_v2  ;;  %vm199_vm12 = vcmp.ge.f32.partialorder %v2485_v48, 2.0  ;;  %v164_v47 = vmul.f32 0.25, %v2458_v10 }
  0x38   :  { %v126_v22 = vmul.f32 %v122_v6, %v2430_v50  ;;  %vm211_vm14 = vcmp.eq.f32.partialorder %v2485_v48, 2.0  ;;  %v80_v50 = vsub.f32 %v2409_v18, %v76_v17  ;;  %v123_v35 = vadd.f32 1.0, %v119_v23 }
  0x39   :  { %v189_v25 = vsel %vm2502_vm9, %v157_v5, %v125_v15  ;;  %v193_v28 = vsel %vm2502_vm9, %v125_v15, %v157_v5  ;;  %v159_v36 = vadd.f32 1.0, %v155_v24  ;;  %v168_v39 = vfloor.f32 %v164_v47  ;;  %vm215_vm1 = vmor %vm179_vm8, %vm211_vm14 }
  0x3a   :  { %v201_v2 = vsub.f32 0.0, %v189_v25  ;;  %v217_v29 = vsub.f32 0.0, %v193_v28  ;;  %v190_v30 = vsel %vm2512_vm11, %v158_v16, %v126_v22  ;;  %v194_v32 = vsel %vm2512_vm11, %v126_v22, %v158_v16 }
  0x3b   :  { %v202_v33 = vsub.f32 0.0, %v190_v30  ;;  %v218_v34 = vsub.f32 0.0, %v194_v32  ;;  %v2543_v38 = vsub.f32 %v80_v50, %v84_v21  ;;  %v127_v45 = vmul.f32 %v123_v35, %v2432_v52 }
  0x3c   :  { %v205_v18 = vsel %vm197_vm5, %v201_v2, %v189_v25  ;;  %v221_v37 = vsel %vm213_vm13, %v217_v29, %v193_v28  ;;  %v172_v56 = vmul.f32 4.0, %v168_v39  ;;  %v337_v57 = vmul.f32 1.5707964, %v2447_v63 }
  0x3d   :  { %v2545_v40 = vmul.f32 2.0, %v221_v37  ;;  %v229_v41 = vmul.f32 %v205_v18, %v2460_v11  ;;  %v206_v43 = vsel %vm198_vm6, %v202_v33, %v190_v30  ;;  %v222_v44 = vsel %vm214_vm15, %v218_v34, %v194_v32 }
  0x3e   :  { %v2554_v42 = vmul.f32 2.0, %v222_v44  ;;  %v230_v62 = vmul.f32 %v206_v43, %v2473_v31  ;;  %v2560_v49 = vmul.f32 %v2543_v38, %v2543_v38  ;;  %v191_v60 = vsel %vm187_vm0, %v159_v36, %v127_v45 }
  0x3f   :  { %v233_v54 = vmul.f32 0.6324555, %v229_v41  ;;  %v241_v1 = vmul.f32 %v2545_v40, %v205_v18  ;;  %v195_v61 = vsel %vm187_vm0, %v127_v45, %v159_v36  ;;  %v203_v0 = vsub.f32 0.0, %v191_v60 }
  0x40   :  { %v234_v59 = vmul.f32 0.6324555, %v230_v62  ;;  %v96_v52 = vmul.f32 2.7557319e-06, %v2560_v49  ;;  %v219_v26 = vsub.f32 0.0, %v195_v61  ;;  %v2571_v5 = vsub.f32 %v2458_v10, %v172_v56 }
  0x41   :  { %237 = vst [vmem:[#allocation5] sm:$0xff] %v233_v54  ;;  %v132_v4 = vmul.f32 2.4801588e-05, %v2560_v49  ;;  %v2574_v46 = vmul.f32 %v2468_v27, %v44_v3  ;;  %v245_v6 = vmul.f32 %v241_v1, %v2460_v11  ;;  %v242_v12 = vmul.f32 %v2554_v42, %v206_v43 }
  0x42   :  { %238 = vst [vmem:[#allocation5 + $0x8] sm:$0xff] %v234_v59  ;;  %v100_v53 = vadd.f32 -0.0001984127, %v96_v52  ;;  %v207_v13 = vsel %vm199_vm12, %v203_v0, %v191_v60  ;;  %v223_v15 = vsel %vm215_vm1, %v219_v26, %v195_v61  ;;  %v258_v58 = vmul.f32 %v241_v1, %v2545_v40 }
  0x43   :  { %v136_v16 = vadd.f32 -0.0013888889, %v132_v4  ;;  %v2581_v17 = vmul.f32 2.0, %v223_v15  ;;  %v231_v10 = vmul.f32 %v207_v13, %v2489_v51  ;;  %v341_v27 = vsub.f32 %v2412_v19, %v337_v57 }
  0x44   :  { %v104_v21 = vmul.f32 %v100_v53, %v2560_v49  ;;  %vm180_vm2 = vcmp.eq.f32.partialorder %v2571_v5, 1.0  ;;  %vm184_vm3 = vcmp.eq.f32.partialorder %v2571_v5, 3.0  ;;  %v249_v48 = vmul.f32 0.6324555, %v245_v6 }
  0x45   :  { %v140_v3 = vmul.f32 %v136_v16, %v2560_v49  ;;  %v235_v22 = vmul.f32 0.6324555, %v231_v10  ;;  %v246_v24 = vmul.f32 %v242_v12, %v2473_v31  ;;  %v243_v47 = vmul.f32 %v2581_v17, %v207_v13  ;;  %vm2615_vm6 = vmor %vm180_vm2, %vm184_vm3 }
  0x46   :  { %v108_v23 = vadd.f32 0.008333334, %v104_v21  ;;  %vm212_vm4 = vcmp.eq.f32.partialorder %v2571_v5, 2.0  ;;  %254 = vst [vmem:[#allocation5 + $0x20] sm:$0xff] %v249_v48  ;;  %v262_v28 = vsub.f32 %v258_v58, %v205_v18  ;;  %v259_v50 = vmul.f32 %v242_v12, %v2554_v42 }
  0x47   :  { %v144_v25 = vadd.f32 0.041666668, %v140_v3  ;;  %v345_v2 = vmul.f32 -4.371139e-08, %v2447_v63  ;;  %239 = vst [vmem:[#allocation5 + $0x10] sm:$0xff] %v235_v22  ;;  %v247_v32 = vmul.f32 %v243_v47, %v2489_v51  ;;  %v260_v33 = vmul.f32 %v243_v47, %v2581_v17  ;;  %vm216_vm7 = vmor %vm180_vm2, %vm212_vm4 }
  0x48   :  { %v112_v29 = vmul.f32 %v108_v23, %v2560_v49  ;;  %v250_v30 = vmul.f32 0.6324555, %v246_v24  ;;  %v266_v35 = vmul.f32 %v262_v28, %v2460_v11  ;;  %v263_v36 = vsub.f32 %v259_v50, %v206_v43 }
  0x49   :  { %v148_v34 = vmul.f32 %v144_v25, %v2560_v49  ;;  %v279_v37 = vmul.f32 %v262_v28, %v2545_v40  ;;  %vm200_vm5 = vcmp.ge.f32.partialorder %v2571_v5, 2.0  ;;  %v251_v39 = vmul.f32 0.6324555, %v247_v32 }
  0x4a   :  { %v116_v18 = vadd.f32 -0.16666667, %v112_v29  ;;  %255 = vst [vmem:[#allocation5 + $0x28] sm:$0xff] %v250_v30  ;;  %v264_v41 = vsub.f32 %v260_v33, %v207_v13  ;;  %v2601_v44 = vsub.f32 %v341_v27, %v345_v2  ;;  %v270_v45 = vmul.f32 0.6324555, %v266_v35 }
  0x4b   :  { %v152_v62 = vadd.f32 -0.5, %v148_v34  ;;  %v267_v54 = vmul.f32 %v263_v36, %v2473_v31  ;;  %v283_v56 = vsub.f32 %v279_v37, %v241_v1  ;;  %256 = vst [vmem:[#allocation5 + $0x30] sm:$0xff] %v251_v39  ;;  %v280_v59 = vmul.f32 %v263_v36, %v2554_v42 }
  0x4c   :  { %v120_v57 = vmul.f32 %v116_v18, %v2560_v49  ;;  %v268_v43 = vmul.f32 %v264_v41, %v2489_v51  ;;  %v281_v60 = vmul.f32 %v264_v41, %v2581_v17  ;;  %275 = vst [vmem:[#allocation5 + $0x40] sm:$0xff] %v270_v45  ;;  %v2621_v58 = vmul.f32 %v2601_v44, %v2601_v44 }
  0x4d   :  { %v156_v61 = vmul.f32 %v152_v62, %v2560_v49  ;;  %v271_v52 = vmul.f32 0.6324555, %v267_v54  ;;  %v287_v0 = vmul.f32 %v283_v56, %v2460_v11  ;;  %v300_v26 = vmul.f32 %v283_v56, %v2545_v40 }
  0x4e   :  { %v124_v4 = vadd.f32 1.0, %v120_v57  ;;  %v272_v53 = vmul.f32 0.6324555, %v268_v43  ;;  %v284_v1 = vsub.f32 %v280_v59, %v242_v12  ;;  %v285_v6 = vsub.f32 %v281_v60, %v243_v47 }
  0x4f   :  { %v160_v13 = vadd.f32 1.0, %v156_v61  ;;  %276 = vst [vmem:[#allocation5 + $0x48] sm:$0xff] %v271_v52  ;;  %v291_v49 = vmul.f32 0.6324555, %v287_v0  ;;  %v304_v16 = vsub.f32 %v300_v26, %v262_v28  ;;  %v357_v48 = vmul.f32 2.7557319e-06, %v2621_v58 }
  0x50   :  { %v128_v40 = vmul.f32 %v124_v4, %v2543_v38  ;;  %277 = vst [vmem:[#allocation5 + $0x50] sm:$0xff] %v272_v53  ;;  %v288_v12 = vmul.f32 %v284_v1, %v2473_v31  ;;  %v289_v10 = vmul.f32 %v285_v6, %v2489_v51  ;;  %v301_v21 = vmul.f32 %v284_v1, %v2554_v42 }
  0x51   :  { %296 = vst [vmem:[#allocation5 + $0x60] sm:$0xff] %v291_v49  ;;  %v308_v27 = vmul.f32 %v304_v16, %v2460_v11  ;;  %v302_v3 = vmul.f32 %v285_v6, %v2581_v17  ;;  %v393_v22 = vmul.f32 2.4801588e-05, %v2621_v58  ;;  %v361_v2 = vadd.f32 -0.0001984127, %v357_v48 }
  0x52   :  { %v192_v23 = vsel %vm2615_vm6, %v160_v13, %v128_v40  ;;  %v196_v38 = vsel %vm2615_vm6, %v128_v40, %v160_v13  ;;  %v292_v42 = vmul.f32 0.6324555, %v288_v12  ;;  %v293_v24 = vmul.f32 0.6324555, %v289_v10 }
  0x53   :  { %v204_v47 = vsub.f32 0.0, %v192_v23  ;;  %v220_v25 = vsub.f32 0.0, %v196_v38  ;;  %v312_v17 = vmul.f32 0.6324555, %v308_v27  ;;  %v305_v28 = vsub.f32 %v301_v21, %v263_v36 }
  0x54   :  { %297 = vst [vmem:[#allocation5 + $0x68] sm:$0xff] %v292_v42  ;;  %298 = vst [vmem:[#allocation5 + $0x70] sm:$0xff] %v293_v24  ;;  %v306_v50 = vsub.f32 %v302_v3, %v264_v41  ;;  %v397_v29 = vadd.f32 -0.0013888889, %v393_v22  ;;  %v425_v30 = vmul.f32 0.25, %v2447_v63  ;;  %v2644_v35 = vfloor.f32 %v2436_v55 }
  0x55   :  { %v208_v32 = vsel %vm200_vm5, %v204_v47, %v192_v23  ;;  %v224_v33 = vsel %vm216_vm7, %v220_v25, %v196_v38  ;;  %317 = vst [vmem:[#allocation5 + $0x80] sm:$0xff] %v312_v17  ;;  %v309_v34 = vmul.f32 %v305_v28, %v2473_v31  ;;  %v365_v39 = vmul.f32 %v361_v2, %v2621_v58 }
  0x56   :  { %v228_v37 = vmul.f32 2.0, %v224_v33  ;;  %v232_v36 = vmul.f32 %v208_v32, %v2574_v46  ;;  %v310_v18 = vmul.f32 %v306_v50, %v2489_v51  ;;  %v401_v62 = vmul.f32 %v397_v29, %v2621_v58 }
  0x57   :  { %v313_v41 = vmul.f32 0.6324555, %v309_v34  ;;  %v429_v45 = vfloor.f32 %v425_v30  ;;  %v2651_v5 = vmul.f32 0.8986819, %v2398_v9  ;;  %v369_v43 = vadd.f32 0.008333334, %v365_v39 }
  0x58   :  { %v236_v54 = vmul.f32 0.6324555, %v232_v36  ;;  %v244_v56 = vmul.f32 %v228_v37, %v208_v32  ;;  %v314_v57 = vmul.f32 0.6324555, %v310_v18  ;;  %v405_v55 = vadd.f32 0.041666668, %v401_v62 }
  0x59   :  { %318 = vst [vmem:[#allocation5 + $0x88] sm:$0xff] %v313_v41  ;;  %v433_v59 = vmul.f32 4.0, %v429_v45  ;;  %v338_v60 = vmul.f32 1.5707964, %v2644_v35  ;;  %v426_v61 = vmul.f32 0.25, %v2644_v35  ;;  %v373_v26 = vmul.f32 %v369_v43, %v2621_v58 }
  0x5a   :  { %240 = vst [vmem:[#allocation5 + $0x18] sm:$0xff] %v236_v54  ;;  %v248_v52 = vmul.f32 %v244_v56, %v2574_v46  ;;  %v261_v0 = vmul.f32 %v244_v56, %v228_v37  ;;  %319 = vst [vmem:[#allocation5 + $0x90] sm:$0xff] %v314_v57  ;;  %v2658_v4 = vmul.f32 0.8986819, %v2405_v14  ;;  %v409_v53 = vmul.f32 %v405_v55, %v2621_v58 }
  0x5b   :  { %v437_v1 = vsub.f32 %v2447_v63, %v433_v59  ;;  %v342_v6 = vsub.f32 %v2415_v20, %v338_v60  ;;  %v346_v13 = vmul.f32 -4.371139e-08, %v2644_v35  ;;  %v377_v16 = vadd.f32 -0.16666667, %v373_v26 }
  0x5c   :  { %v252_v15 = vmul.f32 0.6324555, %v248_v52  ;;  %v265_v49 = vsub.f32 %v261_v0, %v208_v32  ;;  %v327_v40 = vmul.f32 0.63661975, %v2651_v5  ;;  %v413_v12 = vadd.f32 -0.5, %v409_v53 }
  0x5d   :  { %vm441_vm8 = vcmp.eq.f32.partialorder %v437_v1, 1.0  ;;  %v430_v10 = vfloor.f32 %v426_v61  ;;  %v381_v3 = vmul.f32 %v377_v16, %v2621_v58  ;;  %vm445_vm9 = vcmp.eq.f32.partialorder %v437_v1, 3.0 }
  0x5e   :  { %257 = vst [vmem:[#allocation5 + $0x38] sm:$0xff] %v252_v15  ;;  %v269_v21 = vmul.f32 %v265_v49, %v2574_v46  ;;  %v282_v27 = vmul.f32 %v265_v49, %v228_v37  ;;  %v417_v63 = vmul.f32 %v413_v12, %v2621_v58  ;;  %v2668_v48 = vsub.f32 %v342_v6, %v346_v13  ;;  %vm2672_vm10 = vmor %vm441_vm8, %vm445_vm9 }
  0x5f   :  { %v328_v22 = vmul.f32 0.63661975, %v2658_v4  ;;  %v385_v42 = vadd.f32 1.0, %v381_v3  ;;  %v331_v24 = vadd.f32 0.5, %v327_v40  ;;  %vm473_vm11 = vcmp.eq.f32.partialorder %v437_v1, 2.0 }
  0x60   :  { %v273_v23 = vmul.f32 0.6324555, %v269_v21  ;;  %v286_v38 = vsub.f32 %v282_v27, %v244_v56  ;;  %v421_v47 = vadd.f32 1.0, %v417_v63  ;;  %v354_v17 = vmul.f32 %v2668_v48, %v2668_v48  ;;  %vm477_vm13 = vmor %vm441_vm8, %vm473_vm11 }
  0x61   :  { %v434_v28 = vmul.f32 4.0, %v430_v10  ;;  %v389_v2 = vmul.f32 %v385_v42, %v2601_v44  ;;  %v335_v29 = vfloor.f32 %v331_v24  ;;  %v2682_v30 = vmul.f32 %v2460_v11, %v2460_v11 }
  0x62   :  { %278 = vst [vmem:[#allocation5 + $0x58] sm:$0xff] %v273_v23  ;;  %v290_v58 = vmul.f32 %v286_v38, %v2574_v46  ;;  %v303_v50 = vmul.f32 %v286_v38, %v228_v37  ;;  %vm461_vm12 = vcmp.ge.f32.partialorder %v437_v1, 2.0  ;;  %v358_v32 = vmul.f32 2.7557319e-06, %v354_v17 }
  0x63   :  { %v394_v33 = vmul.f32 2.4801588e-05, %v354_v17  ;;  %v453_v18 = vsel %vm2672_vm10, %v421_v47, %v389_v2  ;;  %v457_v39 = vsel %vm2672_vm10, %v389_v2, %v421_v47  ;;  %v497_v54 = vmul.f32 0.72097623, %v2682_v30 }
  0x64   :  { %v294_v34 = vmul.f32 0.6324555, %v290_v58  ;;  %v307_v36 = vsub.f32 %v303_v50, %v265_v49  ;;  %v465_v44 = vsub.f32 0.0, %v453_v18  ;;  %v481_v37 = vsub.f32 0.0, %v457_v39 }
  0x65   :  { %v362_v41 = vadd.f32 -0.0001984127, %v358_v32  ;;  %v398_v62 = vadd.f32 -0.0013888889, %v394_v33  ;;  %v2693_v56 = vsub.f32 %v2644_v35, %v434_v28  ;;  %v339_v57 = vmul.f32 1.5707964, %v335_v29 }
  0x66   :  { %299 = vst [vmem:[#allocation5 + $0x78] sm:$0xff] %v294_v34  ;;  %v311_v45 = vmul.f32 %v307_v36, %v2574_v46  ;;  %v469_v43 = vsel %vm461_vm12, %v465_v44, %v453_v18  ;;  %v485_v55 = vsel %vm477_vm13, %v481_v37, %v457_v39  ;;  %v347_v26 = vmul.f32 -4.371139e-08, %v335_v29 }
  0x67   :  { %v366_v59 = vmul.f32 %v362_v41, %v354_v17  ;;  %v402_v60 = vmul.f32 %v398_v62, %v354_v17  ;;  %v489_v52 = vmul.f32 %v485_v55, %v2412_v19  ;;  %v343_v0 = vsub.f32 %v2651_v5, %v339_v57 }
  0x68   :  { %v315_v61 = vmul.f32 0.6324555, %v311_v45  ;;  %v2700_v53 = vmul.f32 %v2473_v31, %v2473_v31  ;;  %v427_v35 = vmul.f32 0.25, %v335_v29  ;;  %v332_v49 = vadd.f32 0.5, %v328_v22 }
  0x69   :  { %v370_v6 = vadd.f32 0.008333334, %v366_v59  ;;  %v406_v13 = vadd.f32 0.041666668, %v402_v60  ;;  %v493_v15 = vsub.f32 %v469_v43, %v489_v52  ;;  %v2702_v1 = vsub.f32 %v343_v0, %v347_v26 }
  0x6a   :  { %320 = vst [vmem:[#allocation5 + $0x98] sm:$0xff] %v315_v61  ;;  %v2705_v16 = vmul.f32 1.5450504, %v2394_v7  ;;  %vm442_vm14 = vcmp.eq.f32.partialorder %v2693_v56, 1.0  ;;  %v431_v12 = vfloor.f32 %v427_v35  ;;  %vm446_vm15 = vcmp.eq.f32.partialorder %v2693_v56, 3.0 }
  0x6b   :  { %v374_v40 = vmul.f32 %v370_v6, %v354_v17  ;;  %v410_v19 = vmul.f32 %v406_v13, %v354_v17  ;;  %v501_v10 = vmul.f32 %v497_v54, %v493_v15  ;;  %v355_v21 = vmul.f32 %v2702_v1, %v2702_v1  ;;  %vm450_vm0 = vmor %vm442_vm14, %vm446_vm15 }
  0x6c   :  { %v336_v27 = vfloor.f32 %v332_v49  ;;  %v435_v23 = vmul.f32 4.0, %v431_v12  ;;  %v514_v22 = vmul.f32 0.63661975, %v2705_v16  ;;  %v2714_v38 = vmul.f32 %v2489_v51, %v2489_v51 }
  0x6d   :  { %v378_v3 = vadd.f32 -0.16666667, %v374_v40  ;;  %v414_v63 = vadd.f32 -0.5, %v410_v19  ;;  %506 = vst [vmem:[#allocation5 + $0xa0] sm:$0xff] %v501_v10  ;;  %v359_v42 = vmul.f32 2.7557319e-06, %v355_v21  ;;  %v2735_v43 = vmul.f32 %v2574_v46, %v2574_v46 }
  0x6e   :  { %v395_v24 = vmul.f32 2.4801588e-05, %v355_v21  ;;  %v340_v47 = vmul.f32 1.5707964, %v336_v27  ;;  %v2716_v58 = vsub.f32 %v335_v29, %v435_v23  ;;  %v348_v50 = vmul.f32 -4.371139e-08, %v336_v27 }
  0x6f   :  { %v382_v25 = vmul.f32 %v378_v3, %v354_v17  ;;  %v418_v28 = vmul.f32 %v414_v63, %v354_v17  ;;  %v363_v2 = vadd.f32 -0.0001984127, %v359_v42  ;;  %v428_v34 = vmul.f32 0.25, %v336_v27 }
  0x70   :  { %v399_v32 = vadd.f32 -0.0013888889, %v395_v24  ;;  %v344_v33 = vsub.f32 %v2658_v4, %v340_v47  ;;  %v498_v39 = vmul.f32 0.72097623, %v2700_v53  ;;  %v2721_v44 = vmul.f32 0.72097623, %v2714_v38 }
  0x71   :  { %v386_v36 = vadd.f32 1.0, %v382_v25  ;;  %v422_v18 = vadd.f32 1.0, %v418_v28  ;;  %vm462_vm1 = vcmp.ge.f32.partialorder %v2693_v56, 2.0  ;;  %vm474_vm2 = vcmp.eq.f32.partialorder %v2693_v56, 2.0 }
  0x72   :  { %v367_v17 = vmul.f32 %v363_v2, %v355_v21  ;;  %v403_v29 = vmul.f32 %v399_v32, %v355_v21  ;;  %v2730_v41 = vsub.f32 %v344_v33, %v348_v50  ;;  %v432_v62 = vfloor.f32 %v428_v34  ;;  %vm478_vm4 = vmor %vm442_vm14, %vm474_vm2 }
  0x73   :  { %v390_v37 = vmul.f32 %v386_v36, %v2668_v48  ;;  %v518_v45 = vadd.f32 0.5, %v514_v22  ;;  %vm443_vm3 = vcmp.eq.f32.partialorder %v2716_v58, 1.0  ;;  %vm447_vm5 = vcmp.eq.f32.partialorder %v2716_v58, 3.0 }
  0x74   :  { %v371_v54 = vadd.f32 0.008333334, %v367_v17  ;;  %v407_v57 = vadd.f32 0.041666668, %v403_v29  ;;  %v356_v48 = vmul.f32 %v2730_v41, %v2730_v41  ;;  %v436_v60 = vmul.f32 4.0, %v432_v62  ;;  %vm451_vm8 = vmor %vm443_vm3, %vm447_vm5 }
  0x75   :  { %v454_v55 = vsel %vm450_vm0, %v422_v18, %v390_v37  ;;  %v458_v59 = vsel %vm450_vm0, %v390_v37, %v422_v18  ;;  %v2742_v35 = vfloor.f32 %v518_v45  ;;  %vm463_vm6 = vcmp.ge.f32.partialorder %v2716_v58, 2.0 }
  0x76   :  { %v466_v61 = vsub.f32 0.0, %v454_v55  ;;  %v482_v52 = vsub.f32 0.0, %v458_v59  ;;  %v375_v0 = vmul.f32 %v371_v54, %v355_v21  ;;  %v411_v26 = vmul.f32 %v407_v57, %v355_v21 }
  0x77   :  { %v360_v6 = vmul.f32 2.7557319e-06, %v356_v48  ;;  %v396_v13 = vmul.f32 2.4801588e-05, %v356_v48  ;;  %v2748_v22 = vsub.f32 %v336_v27, %v436_v60  ;;  %v2751_v42 = vmul.f32 1.5450504, %v2396_v8 }
  0x78   :  { %v470_v15 = vsel %vm462_vm1, %v466_v61, %v454_v55  ;;  %v486_v49 = vsel %vm478_vm4, %v482_v52, %v458_v59  ;;  %v379_v40 = vadd.f32 -0.16666667, %v375_v0  ;;  %v415_v19 = vadd.f32 -0.5, %v411_v26 }
  0x79   :  { %v490_v12 = vmul.f32 %v486_v49, %v2415_v20  ;;  %v364_v10 = vadd.f32 -0.0001984127, %v360_v6  ;;  %v400_v3 = vadd.f32 -0.0013888889, %v396_v13  ;;  %vm475_vm7 = vcmp.eq.f32.partialorder %v2716_v58, 2.0 }
  0x7a   :  { %v383_v63 = vmul.f32 %v379_v40, %v355_v21  ;;  %v419_v23 = vmul.f32 %v415_v19, %v355_v21  ;;  %v526_v20 = vmul.f32 1.5707964, %v2742_v35  ;;  %v534_v50 = vmul.f32 -4.371139e-08, %v2742_v35  ;;  %vm479_vm10 = vmor %vm443_vm3, %vm475_vm7 }
  0x7b   :  { %v494_v24 = vsub.f32 %v470_v15, %v490_v12  ;;  %v368_v56 = vmul.f32 %v364_v10, %v356_v48  ;;  %v404_v47 = vmul.f32 %v400_v3, %v356_v48  ;;  %v614_v32 = vmul.f32 0.25, %v2742_v35 }
  0x7c   :  { %v387_v25 = vadd.f32 1.0, %v383_v63  ;;  %v423_v28 = vadd.f32 1.0, %v419_v23  ;;  %vm444_vm9 = vcmp.eq.f32.partialorder %v2748_v22, 1.0  ;;  %v530_v34 = vsub.f32 %v2705_v16, %v526_v20 }
  0x7d   :  { %v502_v2 = vmul.f32 %v498_v39, %v494_v24  ;;  %v372_v21 = vadd.f32 0.008333334, %v368_v56  ;;  %v408_v27 = vadd.f32 0.041666668, %v404_v47  ;;  %v515_v36 = vmul.f32 0.63661975, %v2751_v42 }
  0x7e   :  { %v391_v33 = vmul.f32 %v387_v25, %v2702_v1  ;;  %v618_v17 = vfloor.f32 %v614_v32  ;;  %v2766_v29 = vmul.f32 1.5450504, %v2398_v9  ;;  %v2772_v1 = vsub.f32 %v530_v34, %v534_v50 }
  0x7f   :  { %507 = vst [vmem:[#allocation5 + $0xa8] sm:$0xff] %v502_v2  ;;  %v376_v18 = vmul.f32 %v372_v21, %v356_v48  ;;  %v412_v39 = vmul.f32 %v408_v27, %v356_v48  ;;  %v519_v45 = vadd.f32 0.5, %v515_v36  ;;  %vm448_vm11 = vcmp.eq.f32.partialorder %v2748_v22, 3.0 }
  0x80   :  { %v455_v37 = vsel %vm451_vm8, %v423_v28, %v391_v33  ;;  %v459_v62 = vsel %vm451_vm8, %v391_v33, %v423_v28  ;;  %v542_v60 = vmul.f32 %v2772_v1, %v2772_v1  ;;  %v622_v61 = vmul.f32 4.0, %v618_v17  ;;  %vm452_vm12 = vmor %vm444_vm9, %vm448_vm11 }
  0x81   :  { %v467_v54 = vsub.f32 0.0, %v455_v37  ;;  %v483_v57 = vsub.f32 0.0, %v459_v62  ;;  %v380_v55 = vadd.f32 -0.16666667, %v376_v18  ;;  %v416_v59 = vadd.f32 -0.5, %v412_v39 }
  0x82   :  { %v2777_v52 = vfloor.f32 %v519_v45  ;;  %v500_v49 = vmul.f32 0.72097623, %v2735_v43  ;;  %v546_v40 = vmul.f32 2.7557319e-06, %v542_v60  ;;  %v582_v19 = vmul.f32 2.4801588e-05, %v542_v60 }
  0x83   :  { %v471_v0 = vsel %vm463_vm6, %v467_v54, %v455_v37  ;;  %v487_v26 = vsel %vm479_vm10, %v483_v57, %v459_v62  ;;  %v384_v6 = vmul.f32 %v380_v55, %v356_v48  ;;  %v420_v13 = vmul.f32 %v416_v59, %v356_v48 }
  0x84   :  { %v491_v15 = vmul.f32 %v487_v26, %v2651_v5  ;;  %v527_v3 = vmul.f32 1.5707964, %v2777_v52  ;;  %v516_v63 = vmul.f32 0.63661975, %v2766_v29  ;;  %vm476_vm13 = vcmp.eq.f32.partialorder %v2748_v22, 2.0 }
  0x85   :  { %v388_v12 = vadd.f32 1.0, %v384_v6  ;;  %v424_v10 = vadd.f32 1.0, %v420_v13  ;;  %v550_v58 = vadd.f32 -0.0001984127, %v546_v40  ;;  %v586_v5 = vadd.f32 -0.0013888889, %v582_v19  ;;  %vm480_vm15 = vmor %vm444_vm9, %vm476_vm13 }
  0x86   :  { %v495_v23 = vsub.f32 %v471_v0, %v491_v15  ;;  %vm464_vm14 = vcmp.ge.f32.partialorder %v2748_v22, 2.0  ;;  %v2793_v24 = vsub.f32 %v2742_v35, %v622_v61  ;;  %v535_v56 = vmul.f32 -4.371139e-08, %v2777_v52 }
  0x87   :  { %v392_v48 = vmul.f32 %v388_v12, %v2730_v41  ;;  %v554_v25 = vmul.f32 %v550_v58, %v542_v60  ;;  %v590_v28 = vmul.f32 %v586_v5, %v542_v60  ;;  %v531_v20 = vsub.f32 %v2751_v42, %v527_v3 }
  0x88   :  { %v503_v47 = vmul.f32 %v2721_v44, %v495_v23  ;;  %v615_v41 = vmul.f32 0.25, %v2777_v52  ;;  %v520_v21 = vadd.f32 0.5, %v516_v63  ;;  %vm630_vm0 = vcmp.eq.f32.partialorder %v2793_v24, 1.0 }
  0x89   :  { %v456_v50 = vsel %vm452_vm12, %v424_v10, %v392_v48  ;;  %v460_v2 = vsel %vm452_vm12, %v392_v48, %v424_v10  ;;  %v558_v32 = vadd.f32 0.008333334, %v554_v25  ;;  %v594_v33 = vadd.f32 0.041666668, %v590_v28 }
  0x8a   :  { %508 = vst [vmem:[#allocation5 + $0xb0] sm:$0xff] %v503_v47  ;;  %v468_v27 = vsub.f32 0.0, %v456_v50  ;;  %v484_v35 = vsub.f32 0.0, %v460_v2  ;;  %v2802_v44 = vsub.f32 %v531_v20, %v535_v56  ;;  %v619_v34 = vfloor.f32 %v615_v41 }
  0x8b   :  { %v524_v36 = vfloor.f32 %v520_v21  ;;  %v562_v17 = vmul.f32 %v558_v32, %v542_v60  ;;  %v598_v37 = vmul.f32 %v594_v33, %v542_v60  ;;  %vm634_vm1 = vcmp.eq.f32.partialorder %v2793_v24, 3.0 }
  0x8c   :  { %v472_v18 = vsel %vm464_vm14, %v468_v27, %v456_v50  ;;  %v488_v39 = vsel %vm480_vm15, %v484_v35, %v460_v2  ;;  %v543_v45 = vmul.f32 %v2802_v44, %v2802_v44  ;;  %v623_v54 = vmul.f32 4.0, %v619_v34  ;;  %vm638_vm2 = vmor %vm630_vm0, %vm634_vm1 }
  0x8d   :  { %v492_v62 = vmul.f32 %v488_v39, %v2658_v4  ;;  %v528_v57 = vmul.f32 1.5707964, %v524_v36  ;;  %v566_v55 = vadd.f32 -0.16666667, %v562_v17  ;;  %v602_v59 = vadd.f32 -0.5, %v598_v37 }
  0x8e   :  { %v616_v61 = vmul.f32 0.25, %v524_v36  ;;  %v547_v26 = vmul.f32 2.7557319e-06, %v543_v45  ;;  %v583_v6 = vmul.f32 2.4801588e-05, %v543_v45  ;;  %v2812_v3 = vsub.f32 %v2777_v52, %v623_v54 }
  0x8f   :  { %v496_v0 = vsub.f32 %v472_v18, %v492_v62  ;;  %v536_v22 = vmul.f32 -4.371139e-08, %v524_v36  ;;  %v570_v13 = vmul.f32 %v566_v55, %v542_v60  ;;  %v606_v15 = vmul.f32 %v602_v59, %v542_v60 }
  0x90   :  { %v532_v40 = vsub.f32 %v2766_v29, %v528_v57  ;;  %v620_v19 = vfloor.f32 %v616_v61  ;;  %v551_v12 = vadd.f32 -0.0001984127, %v547_v26  ;;  %v587_v10 = vadd.f32 -0.0013888889, %v583_v6 }
  0x91   :  { %v504_v4 = vmul.f32 %v500_v49, %v496_v0  ;;  %v574_v63 = vadd.f32 1.0, %v570_v13  ;;  %v610_v23 = vadd.f32 1.0, %v606_v15  ;;  %v686_v58 = vmul.f32 0.41275826, %v2682_v30 }
  0x92   :  { %v2816_v5 = vmul.f32 0.41275826, %v2700_v53  ;;  %vm662_vm3 = vcmp.eq.f32.partialorder %v2793_v24, 2.0  ;;  %v555_v60 = vmul.f32 %v551_v12, %v543_v45  ;;  %v591_v49 = vmul.f32 %v587_v10, %v543_v45 }
  0x93   :  { %509 = vst [vmem:[#allocation5 + $0xb8] sm:$0xff] %v504_v4  ;;  %v2823_v48 = vsub.f32 %v532_v40, %v536_v22  ;;  %v578_v52 = vmul.f32 %v574_v63, %v2772_v1  ;;  %vm650_vm4 = vcmp.ge.f32.partialorder %v2793_v24, 2.0  ;;  %v624_v56 = vmul.f32 4.0, %v620_v19  ;;  %vm666_vm6 = vmor %vm630_vm0, %vm662_vm3 }
  0x94   :  { %v2828_v47 = vmul.f32 1.5450504, %v2405_v14  ;;  %v559_v25 = vadd.f32 0.008333334, %v555_v60  ;;  %v595_v28 = vadd.f32 0.041666668, %v591_v49 }
  0x95   :  { %vm631_vm5 = vcmp.eq.f32.partialorder %v2812_v3, 1.0  ;;  %v2833_v20 = vmul.f32 %v2823_v48, %v2823_v48  ;;  %v642_v50 = vsel %vm638_vm2, %v610_v23, %v578_v52  ;;  %v646_v2 = vsel %vm638_vm2, %v578_v52, %v610_v23 }
  0x96   :  { %vm635_vm7 = vcmp.eq.f32.partialorder %v2812_v3, 3.0  ;;  %v517_v1 = vmul.f32 0.63661975, %v2828_v47  ;;  %v654_v41 = vsub.f32 0.0, %v642_v50  ;;  %v670_v21 = vsub.f32 0.0, %v646_v2 }
  0x97   :  { %v563_v27 = vmul.f32 %v559_v25, %v543_v45  ;;  %v599_v35 = vmul.f32 %v595_v28, %v543_v45  ;;  %v548_v32 = vmul.f32 2.7557319e-06, %v2833_v20  ;;  %v584_v33 = vmul.f32 2.4801588e-05, %v2833_v20  ;;  %vm639_vm11 = vmor %vm631_vm5, %vm635_vm7 }
  0x98   :  { %v2841_v34 = vsub.f32 %v524_v36, %v624_v56  ;;  %v2844_v18 = vmul.f32 2.1808243, %v2394_v7  ;;  %v658_v39 = vsel %vm650_vm4, %v654_v41, %v642_v50  ;;  %v674_v17 = vsel %vm666_vm6, %v670_v21, %v646_v2 }
  0x99   :  { %v567_v37 = vadd.f32 -0.16666667, %v563_v27  ;;  %v603_v62 = vadd.f32 -0.5, %v599_v35  ;;  %v678_v54 = vmul.f32 %v674_v17, %v2705_v16  ;;  %vm651_vm8 = vcmp.ge.f32.partialorder %v2812_v3, 2.0 }
  0x9a   :  { %v552_v57 = vadd.f32 -0.0001984127, %v548_v32  ;;  %v588_v55 = vadd.f32 -0.0013888889, %v584_v33  ;;  %vm663_vm9 = vcmp.eq.f32.partialorder %v2812_v3, 2.0  ;;  %v521_v36 = vadd.f32 0.5, %v517_v1 }
  0x9b   :  { %v571_v59 = vmul.f32 %v567_v37, %v543_v45  ;;  %v607_v61 = vmul.f32 %v603_v62, %v543_v45  ;;  %v682_v0 = vsub.f32 %v658_v39, %v678_v54  ;;  %v703_v6 = vmul.f32 0.63661975, %v2844_v18  ;;  %vm667_vm12 = vmor %vm631_vm5, %vm663_vm9 }
  0x9c   :  { %v556_v26 = vmul.f32 %v552_v57, %v2833_v20  ;;  %v592_v24 = vmul.f32 %v588_v55, %v2833_v20  ;;  %vm632_vm10 = vcmp.eq.f32.partialorder %v2841_v34, 1.0  ;;  %v525_v16 = vfloor.f32 %v521_v36 }
  0x9d   :  { %v575_v22 = vadd.f32 1.0, %v571_v59  ;;  %v611_v13 = vadd.f32 1.0, %v607_v61  ;;  %v690_v15 = vmul.f32 %v686_v58, %v682_v0  ;;  %v707_v19 = vadd.f32 0.5, %v703_v6 }
  0x9e   :  { %v560_v45 = vadd.f32 0.008333334, %v556_v26  ;;  %v596_v40 = vadd.f32 0.041666668, %v592_v24  ;;  %v529_v12 = vmul.f32 1.5707964, %v525_v16 }
  0x9f   :  { %v579_v4 = vmul.f32 %v575_v22, %v2802_v44  ;;  %v537_v10 = vmul.f32 -4.371139e-08, %v525_v16  ;;  %v617_v63 = vmul.f32 0.25, %v525_v16  ;;  %695 = vst [vmem:[#allocation5 + $0xc0] sm:$0xff] %v690_v15  ;;  %v2862_v49 = vfloor.f32 %v707_v19 }
  0xa0   :  { %v564_v23 = vmul.f32 %v560_v45, %v2833_v20  ;;  %v600_v60 = vmul.f32 %v596_v40, %v2833_v20  ;;  %v2865_v58 = vmul.f32 2.1808243, %v2396_v8  ;;  %v533_v44 = vsub.f32 %v2828_v47, %v529_v12 }
  0xa1   :  { %v643_v52 = vsel %vm639_vm11, %v611_v13, %v579_v4  ;;  %v647_v56 = vsel %vm639_vm11, %v579_v4, %v611_v13  ;;  %v621_v25 = vfloor.f32 %v617_v63  ;;  %vm636_vm13 = vcmp.eq.f32.partialorder %v2841_v34, 3.0 }
  0xa2   :  { %v655_v28 = vsub.f32 0.0, %v643_v52  ;;  %v671_v50 = vsub.f32 0.0, %v647_v56  ;;  %v568_v2 = vadd.f32 -0.16666667, %v564_v23  ;;  %v604_v1 = vadd.f32 -0.5, %v600_v60  ;;  %vm640_vm14 = vmor %vm632_vm10, %vm636_vm13 }
  0xa3   :  { %v2873_v41 = vsub.f32 %v533_v44, %v537_v10  ;;  %v625_v21 = vmul.f32 4.0, %v621_v25  ;;  %v715_v27 = vmul.f32 1.5707964, %v2862_v49  ;;  %v723_v54 = vmul.f32 -4.371139e-08, %v2862_v49 }
  0xa4   :  { %v659_v35 = vsel %vm651_vm8, %v655_v28, %v643_v52  ;;  %v675_v32 = vsel %vm667_vm12, %v671_v50, %v647_v56  ;;  %v572_v33 = vmul.f32 %v568_v2, %v2833_v20  ;;  %v608_v39 = vmul.f32 %v604_v1, %v2833_v20 }
  0xa5   :  { %v679_v17 = vmul.f32 %v675_v32, %v2751_v42  ;;  %v545_v37 = vmul.f32 %v2873_v41, %v2873_v41  ;;  %v719_v62 = vsub.f32 %v2844_v18, %v715_v27  ;;  %v803_v59 = vmul.f32 0.25, %v2862_v49 }
  0xa6   :  { %v576_v57 = vadd.f32 1.0, %v572_v33  ;;  %v612_v55 = vadd.f32 1.0, %v608_v39  ;;  %v704_v3 = vmul.f32 0.63661975, %v2865_v58  ;;  %vm664_vm15 = vcmp.eq.f32.partialorder %v2841_v34, 2.0 }
  0xa7   :  { %v683_v61 = vsub.f32 %v659_v35, %v679_v17  ;;  %v549_v42 = vmul.f32 2.7557319e-06, %v545_v37  ;;  %v585_v20 = vmul.f32 2.4801588e-05, %v545_v37  ;;  %vm652_vm0 = vcmp.ge.f32.partialorder %v2841_v34, 2.0  ;;  %vm668_vm1 = vmor %vm632_vm10, %vm664_vm15 }
  0xa8   :  { %v580_v36 = vmul.f32 %v576_v57, %v2823_v48  ;;  %v2894_v0 = vsub.f32 %v525_v16, %v625_v21  ;;  %v2897_v22 = vsub.f32 %v719_v62, %v723_v54  ;;  %v807_v45 = vfloor.f32 %v803_v59 }
  0xa9   :  { %v691_v26 = vmul.f32 %v2816_v5, %v683_v61  ;;  %v553_v24 = vadd.f32 -0.0001984127, %v549_v42  ;;  %v589_v6 = vadd.f32 -0.0013888889, %v585_v20  ;;  %v708_v40 = vadd.f32 0.5, %v704_v3 }
  0xaa   :  { %v644_v13 = vsel %vm640_vm14, %v612_v55, %v580_v36  ;;  %v648_v15 = vsel %vm640_vm14, %v580_v36, %v612_v55  ;;  %v688_v16 = vmul.f32 0.41275826, %v2714_v38  ;;  %v2903_v5 = vmul.f32 0.41275826, %v2735_v43 }
  0xab   :  { %696 = vst [vmem:[#allocation5 + $0xc8] sm:$0xff] %v691_v26  ;;  %v656_v19 = vsub.f32 0.0, %v644_v13  ;;  %v672_v48 = vsub.f32 0.0, %v648_v15  ;;  %v557_v4 = vmul.f32 %v553_v24, %v545_v37  ;;  %v593_v12 = vmul.f32 %v589_v6, %v545_v37 }
  0xac   :  { %v731_v10 = vmul.f32 %v2897_v22, %v2897_v22  ;;  %v2907_v63 = vfloor.f32 %v708_v40  ;;  %v811_v50 = vmul.f32 4.0, %v807_v45  ;;  %vm633_vm2 = vcmp.eq.f32.partialorder %v2894_v0, 1.0 }
  0xad   :  { %v660_v23 = vsel %vm652_vm0, %v656_v19, %v644_v13  ;;  %v676_v60 = vsel %vm668_vm1, %v672_v48, %v648_v15  ;;  %v561_v52 = vadd.f32 0.008333334, %v557_v4  ;;  %v597_v56 = vadd.f32 0.041666668, %v593_v12 }
  0xae   :  { %v680_v44 = vmul.f32 %v676_v60, %v2766_v29  ;;  %v735_v25 = vmul.f32 2.7557319e-06, %v731_v10  ;;  %v771_v28 = vmul.f32 2.4801588e-05, %v731_v10  ;;  %v716_v21 = vmul.f32 1.5707964, %v2907_v63 }
  0xaf   :  { %v565_v2 = vmul.f32 %v561_v52, %v545_v37  ;;  %v601_v1 = vmul.f32 %v597_v56, %v545_v37  ;;  %vm637_vm3 = vcmp.eq.f32.partialorder %v2894_v0, 3.0  ;;  %vm653_vm4 = vcmp.ge.f32.partialorder %v2894_v0, 2.0 }
  0xb0   :  { %v684_v27 = vsub.f32 %v660_v23, %v680_v44  ;;  %v739_v35 = vadd.f32 -0.0001984127, %v735_v25  ;;  %v775_v34 = vadd.f32 -0.0013888889, %v771_v28  ;;  %v724_v29 = vmul.f32 -4.371139e-08, %v2907_v63  ;;  %vm641_vm5 = vmor %vm633_vm2, %vm637_vm3 }
  0xb1   :  { %v569_v32 = vadd.f32 -0.16666667, %v565_v2  ;;  %v605_v33 = vadd.f32 -0.5, %v601_v1  ;;  %v2918_v54 = vsub.f32 %v2862_v49, %v811_v50  ;;  %v720_v59 = vsub.f32 %v2865_v58, %v716_v21 }
  0xb2   :  { %v692_v39 = vmul.f32 %v688_v16, %v684_v27  ;;  %v743_v17 = vmul.f32 %v739_v35, %v731_v10  ;;  %v779_v62 = vmul.f32 %v775_v34, %v731_v10  ;;  %v804_v3 = vmul.f32 0.25, %v2907_v63 }
  0xb3   :  { %v573_v57 = vmul.f32 %v569_v32, %v545_v37  ;;  %v609_v55 = vmul.f32 %v605_v33, %v545_v37  ;;  %v2923_v20 = vmul.f32 2.1808243, %v2398_v9  ;;  %v2925_v24 = vsub.f32 %v720_v59, %v724_v29 }
  0xb4   :  { %697 = vst [vmem:[#allocation5 + $0xd0] sm:$0xff] %v692_v39  ;;  %v747_v61 = vadd.f32 0.008333334, %v743_v17  ;;  %v783_v42 = vadd.f32 0.041666668, %v779_v62  ;;  %v808_v6 = vfloor.f32 %v804_v3  ;;  %vm665_vm6 = vcmp.eq.f32.partialorder %v2894_v0, 2.0 }
  0xb5   :  { %v577_v36 = vadd.f32 1.0, %v573_v57  ;;  %v613_v26 = vadd.f32 1.0, %v609_v55  ;;  %v705_v13 = vmul.f32 0.63661975, %v2923_v20  ;;  %vm819_vm7 = vcmp.eq.f32.partialorder %v2918_v54, 1.0  ;;  %vm669_vm9 = vmor %vm633_vm2, %vm665_vm6 }
  0xb6   :  { %v751_v49 = vmul.f32 %v747_v61, %v731_v10  ;;  %v787_v37 = vmul.f32 %v783_v42, %v731_v10  ;;  %vm823_vm8 = vcmp.eq.f32.partialorder %v2918_v54, 3.0  ;;  %v732_v45 = vmul.f32 %v2925_v24, %v2925_v24 }
  0xb7   :  { %v581_v15 = vmul.f32 %v577_v36, %v2873_v41  ;;  %v812_v48 = vmul.f32 4.0, %v808_v6  ;;  %v709_v4 = vadd.f32 0.5, %v705_v13  ;;  %v875_v25 = vmul.f32 0.29122454, %v2682_v30  ;;  %vm827_vm10 = vmor %vm819_vm7, %vm823_vm8 }
  0xb8   :  { %v755_v40 = vadd.f32 -0.16666667, %v751_v49  ;;  %v791_v19 = vadd.f32 -0.5, %v787_v37  ;;  %v736_v23 = vmul.f32 2.7557319e-06, %v732_v45  ;;  %vm851_vm11 = vcmp.eq.f32.partialorder %v2918_v54, 2.0 }
  0xb9   :  { %v645_v12 = vsel %vm641_vm5, %v613_v26, %v581_v15  ;;  %v649_v16 = vsel %vm641_vm5, %v581_v15, %v613_v26  ;;  %v772_v60 = vmul.f32 2.4801588e-05, %v732_v45  ;;  %v2941_v2 = vfloor.f32 %v709_v4  ;;  %vm855_vm13 = vmor %vm819_vm7, %vm851_vm11 }
  0xba   :  { %v657_v52 = vsub.f32 0.0, %v645_v12  ;;  %v673_v41 = vsub.f32 0.0, %v649_v16  ;;  %v759_v56 = vmul.f32 %v755_v40, %v731_v10  ;;  %v795_v44 = vmul.f32 %v791_v19, %v731_v10 }
  0xbb   :  { %v740_v28 = vadd.f32 -0.0001984127, %v736_v23  ;;  %v776_v50 = vadd.f32 -0.0013888889, %v772_v60  ;;  %vm839_vm12 = vcmp.ge.f32.partialorder %v2918_v54, 2.0  ;;  %v2954_v0 = vsub.f32 %v2907_v63, %v812_v48 }
  0xbc   :  { %v661_v1 = vsel %vm653_vm4, %v657_v52, %v645_v12  ;;  %v677_v21 = vsel %vm669_vm9, %v673_v41, %v649_v16  ;;  %v763_v27 = vadd.f32 1.0, %v759_v56  ;;  %v799_v35 = vadd.f32 1.0, %v795_v44 }
  0xbd   :  { %v681_v34 = vmul.f32 %v677_v21, %v2828_v47  ;;  %v744_v10 = vmul.f32 %v740_v28, %v732_v45  ;;  %v780_v32 = vmul.f32 %v776_v50, %v732_v45  ;;  %v2957_v29 = vmul.f32 2.1808243, %v2405_v14 }
  0xbe   :  { %v767_v33 = vmul.f32 %v763_v27, %v2897_v22  ;;  %v717_v62 = vmul.f32 1.5707964, %v2941_v2  ;;  %v725_v22 = vmul.f32 -4.371139e-08, %v2941_v2  ;;  %v805_v59 = vmul.f32 0.25, %v2941_v2 }
  0xbf   :  { %v685_v47 = vsub.f32 %v661_v1, %v681_v34  ;;  %v748_v39 = vadd.f32 0.008333334, %v744_v10  ;;  %v784_v17 = vadd.f32 0.041666668, %v780_v32  ;;  %v706_v49 = vmul.f32 0.63661975, %v2957_v29 }
  0xc0   :  { %v831_v57 = vsel %vm827_vm10, %v799_v35, %v767_v33  ;;  %v835_v55 = vsel %vm827_vm10, %v767_v33, %v799_v35  ;;  %v721_v26 = vsub.f32 %v2923_v20, %v717_v62  ;;  %v809_v6 = vfloor.f32 %v805_v59 }
  0xc1   :  { %v693_v63 = vmul.f32 %v2903_v5, %v685_v47  ;;  %v843_v3 = vsub.f32 0.0, %v831_v57  ;;  %v859_v61 = vsub.f32 0.0, %v835_v55  ;;  %v752_v42 = vmul.f32 %v748_v39, %v732_v45 }
  0xc2   :  { %v788_v36 = vmul.f32 %v784_v17, %v732_v45  ;;  %v2970_v40 = vmul.f32 2.8132389, %v2394_v7  ;;  %vm820_vm14 = vcmp.eq.f32.partialorder %v2954_v0, 1.0  ;;  %v2974_v48 = vsub.f32 %v721_v26, %v725_v22 }
  0xc3   :  { %698 = vst [vmem:[#allocation5 + $0xd8] sm:$0xff] %v693_v63  ;;  %v847_v37 = vsel %vm839_vm12, %v843_v3, %v831_v57  ;;  %v863_v13 = vsel %vm855_vm13, %v859_v61, %v835_v55  ;;  %v756_v15 = vadd.f32 -0.16666667, %v752_v42  ;;  %vm824_vm15 = vcmp.eq.f32.partialorder %v2954_v0, 3.0 }
  0xc4   :  { %v867_v5 = vmul.f32 %v863_v13, %v2844_v18  ;;  %v792_v19 = vadd.f32 -0.5, %v788_v36  ;;  %v710_v12 = vadd.f32 0.5, %v706_v49  ;;  %v892_v16 = vmul.f32 0.63661975, %v2970_v40  ;;  %vm828_vm1 = vmor %vm820_vm14, %vm824_vm15 }
  0xc5   :  { %v760_v4 = vmul.f32 %v756_v15, %v732_v45  ;;  %v733_v60 = vmul.f32 %v2974_v48, %v2974_v48  ;;  %v813_v52 = vmul.f32 4.0, %v809_v6  ;;  %vm852_vm0 = vcmp.eq.f32.partialorder %v2954_v0, 2.0 }
  0xc6   :  { %v871_v54 = vsub.f32 %v847_v37, %v867_v5  ;;  %v796_v23 = vmul.f32 %v792_v19, %v732_v45  ;;  %v714_v18 = vfloor.f32 %v710_v12  ;;  %vm840_vm2 = vcmp.ge.f32.partialorder %v2954_v0, 2.0  ;;  %vm856_vm3 = vmor %vm820_vm14, %vm852_vm0 }
  0xc7   :  { %v764_v41 = vadd.f32 1.0, %v760_v4  ;;  %v737_v28 = vmul.f32 2.7557319e-06, %v733_v60  ;;  %v773_v50 = vmul.f32 2.4801588e-05, %v733_v60  ;;  %v896_v45 = vadd.f32 0.5, %v892_v16 }
  0xc8   :  { %v879_v56 = vmul.f32 %v875_v25, %v871_v54  ;;  %v800_v44 = vadd.f32 1.0, %v796_v23  ;;  %v2986_v21 = vmul.f32 2.8132389, %v2396_v8  ;;  %v2989_v34 = vsub.f32 %v2941_v2, %v813_v52 }
  0xc9   :  { %v768_v1 = vmul.f32 %v764_v41, %v2925_v24  ;;  %v741_v27 = vadd.f32 -0.0001984127, %v737_v28  ;;  %v777_v35 = vadd.f32 -0.0013888889, %v773_v50  ;;  %v806_v25 = vmul.f32 0.25, %v714_v18 }
  0xca   :  { %884 = vst [vmem:[#allocation5 + $0xe0] sm:$0xff] %v879_v56  ;;  %v718_v24 = vmul.f32 1.5707964, %v714_v18  ;;  %v726_v33 = vmul.f32 -4.371139e-08, %v714_v18  ;;  %v2996_v22 = vfloor.f32 %v896_v45  ;;  %vm821_vm4 = vcmp.eq.f32.partialorder %v2989_v34, 1.0 }
  0xcb   :  { %v832_v10 = vsel %vm828_vm1, %v800_v44, %v768_v1  ;;  %v836_v32 = vsel %vm828_vm1, %v768_v1, %v800_v44  ;;  %v745_v17 = vmul.f32 %v741_v27, %v733_v60  ;;  %v781_v62 = vmul.f32 %v777_v35, %v733_v60 }
  0xcc   :  { %v844_v47 = vsub.f32 0.0, %v832_v10  ;;  %v860_v39 = vsub.f32 0.0, %v836_v32  ;;  %v722_v57 = vsub.f32 %v2957_v29, %v718_v24  ;;  %v810_v55 = vfloor.f32 %v806_v25 }
  0xcd   :  { %v893_v2 = vmul.f32 0.63661975, %v2986_v21  ;;  %v749_v3 = vadd.f32 0.008333334, %v745_v17  ;;  %v785_v61 = vadd.f32 0.041666668, %v781_v62 }
  0xce   :  { %v848_v59 = vsel %vm840_vm2, %v844_v47, %v832_v10  ;;  %v864_v63 = vsel %vm856_vm3, %v860_v39, %v836_v32  ;;  %v876_v36 = vmul.f32 0.29122454, %v2700_v53  ;;  %v3003_v26 = vsub.f32 %v722_v57, %v726_v33 }
  0xcf   :  { %v868_v42 = vmul.f32 %v864_v63, %v2865_v58  ;;  %v904_v6 = vmul.f32 1.5707964, %v2996_v22  ;;  %v753_v49 = vmul.f32 %v749_v3, %v733_v60  ;;  %v789_v37 = vmul.f32 %v785_v61, %v733_v60 }
  0xd0   :  { %v814_v13 = vmul.f32 4.0, %v810_v55  ;;  %v992_v15 = vmul.f32 0.25, %v2996_v22  ;;  %v734_v0 = vmul.f32 %v3003_v26, %v3003_v26  ;;  %v912_v4 = vmul.f32 -4.371139e-08, %v2996_v22 }
  0xd1   :  { %v872_v5 = vsub.f32 %v848_v59, %v868_v42  ;;  %v908_v19 = vsub.f32 %v2970_v40, %v904_v6  ;;  %v757_v58 = vadd.f32 -0.16666667, %v753_v49  ;;  %v793_v12 = vadd.f32 -0.5, %v789_v37 }
  0xd2   :  { %v897_v16 = vadd.f32 0.5, %v893_v2  ;;  %vm825_vm5 = vcmp.eq.f32.partialorder %v2989_v34, 3.0  ;;  %v738_v23 = vmul.f32 2.7557319e-06, %v734_v0  ;;  %v774_v52 = vmul.f32 2.4801588e-05, %v734_v0 }
  0xd3   :  { %v880_v54 = vmul.f32 %v876_v36, %v872_v5  ;;  %v761_v41 = vmul.f32 %v757_v58, %v733_v60  ;;  %v797_v56 = vmul.f32 %v793_v12, %v733_v60  ;;  %v3013_v44 = vsub.f32 %v714_v18, %v814_v13  ;;  %vm829_vm7 = vmor %vm821_vm4, %vm825_vm5 }
  0xd4   :  { %v996_v28 = vfloor.f32 %v992_v15  ;;  %v877_v50 = vmul.f32 0.29122454, %v2714_v38  ;;  %v742_v1 = vadd.f32 -0.0001984127, %v738_v23  ;;  %v778_v45 = vadd.f32 -0.0013888889, %v774_v52 }
  0xd5   :  { %885 = vst [vmem:[#allocation5 + $0xe8] sm:$0xff] %v880_v54  ;;  %v3016_v27 = vsub.f32 %v908_v19, %v912_v4  ;;  %v765_v35 = vadd.f32 1.0, %v761_v41  ;;  %v801_v25 = vadd.f32 1.0, %v797_v56  ;;  %vm841_vm6 = vcmp.ge.f32.partialorder %v2989_v34, 2.0 }
  0xd6   :  { %v3019_v10 = vfloor.f32 %v897_v16  ;;  %vm853_vm8 = vcmp.eq.f32.partialorder %v2989_v34, 2.0  ;;  %v746_v60 = vmul.f32 %v742_v1, %v734_v0  ;;  %v782_v18 = vmul.f32 %v778_v45, %v734_v0 }
  0xd7   :  { %v3028_v32 = vmul.f32 %v3016_v27, %v3016_v27  ;;  %v769_v24 = vmul.f32 %v765_v35, %v2974_v48  ;;  %vm822_vm9 = vcmp.eq.f32.partialorder %v3013_v44, 1.0  ;;  %vm826_vm10 = vcmp.eq.f32.partialorder %v3013_v44, 3.0  ;;  %vm857_vm11 = vmor %vm821_vm4, %vm853_vm8 }
  0xd8   :  { %v1000_v33 = vmul.f32 4.0, %v996_v28  ;;  %v750_v47 = vadd.f32 0.008333334, %v746_v60  ;;  %v786_v39 = vadd.f32 0.041666668, %v782_v18  ;;  %vm854_vm12 = vcmp.eq.f32.partialorder %v3013_v44, 2.0  ;;  %vm830_vm14 = vmor %vm822_vm9, %vm826_vm10 }
  0xd9   :  { %v924_v17 = vmul.f32 2.7557319e-06, %v3028_v32  ;;  %v833_v62 = vsel %vm829_vm7, %v801_v25, %v769_v24  ;;  %v837_v57 = vsel %vm829_vm7, %v769_v24, %v801_v25  ;;  %v960_v55 = vmul.f32 2.4801588e-05, %v3028_v32  ;;  %vm858_vm1 = vmor %vm822_vm9, %vm854_vm12 }
  0xda   :  { %v905_v48 = vmul.f32 1.5707964, %v3019_v10  ;;  %v845_v2 = vsub.f32 0.0, %v833_v62  ;;  %v861_v59 = vsub.f32 0.0, %v837_v57  ;;  %v754_v63 = vmul.f32 %v750_v47, %v734_v0 }
  0xdb   :  { %v790_v3 = vmul.f32 %v786_v39, %v734_v0  ;;  %v928_v61 = vadd.f32 -0.0001984127, %v924_v17  ;;  %v964_v42 = vadd.f32 -0.0013888889, %v960_v55  ;;  %v913_v36 = vmul.f32 -4.371139e-08, %v3019_v10 }
  0xdc   :  { %v849_v6 = vsel %vm841_vm6, %v845_v2, %v833_v62  ;;  %v865_v49 = vsel %vm857_vm11, %v861_v59, %v837_v57  ;;  %v758_v37 = vadd.f32 -0.16666667, %v754_v63  ;;  %vm842_vm13 = vcmp.ge.f32.partialorder %v3013_v44, 2.0 }
  0xdd   :  { %v794_v13 = vadd.f32 -0.5, %v790_v3  ;;  %v869_v15 = vmul.f32 %v865_v49, %v2923_v20  ;;  %v932_v5 = vmul.f32 %v928_v61, %v3028_v32  ;;  %v968_v19 = vmul.f32 %v964_v42, %v3028_v32 }
  0xde   :  { %v3047_v4 = vsub.f32 %v2996_v22, %v1000_v33  ;;  %v762_v58 = vmul.f32 %v758_v37, %v734_v0  ;;  %v909_v16 = vsub.f32 %v2986_v21, %v905_v48  ;;  %v993_v34 = vmul.f32 0.25, %v3019_v10 }
  0xdf   :  { %v798_v12 = vmul.f32 %v794_v13, %v734_v0  ;;  %v873_v54 = vsub.f32 %v849_v6, %v869_v15  ;;  %v936_v23 = vadd.f32 0.008333334, %v932_v5  ;;  %v972_v52 = vadd.f32 0.041666668, %v968_v19 }
  0xe0   :  { %v3052_v41 = vmul.f32 2.8132389, %v2398_v9  ;;  %v766_v20 = vadd.f32 1.0, %v762_v58  ;;  %v3054_v28 = vsub.f32 %v909_v16, %v913_v36  ;;  %v997_v1 = vfloor.f32 %v993_v34 }
  0xe1   :  { %v802_v56 = vadd.f32 1.0, %v798_v12  ;;  %v881_v45 = vmul.f32 %v877_v50, %v873_v54  ;;  %v940_v22 = vmul.f32 %v936_v23, %v3028_v32  ;;  %v976_v0 = vmul.f32 %v972_v52, %v3028_v32 }
  0xe2   :  { %v894_v35 = vmul.f32 0.63661975, %v3052_v41  ;;  %v770_v25 = vmul.f32 %v766_v20, %v3003_v26  ;;  %vm1008_vm15 = vcmp.eq.f32.partialorder %v3047_v4, 1.0  ;;  %vm1012_vm0 = vcmp.eq.f32.partialorder %v3047_v4, 3.0 }
  0xe3   :  { %v3068_v50 = vmul.f32 %v3054_v28, %v3054_v28  ;;  %886 = vst [vmem:[#allocation5 + $0xf0] sm:$0xff] %v881_v45  ;;  %v944_v60 = vadd.f32 -0.16666667, %v940_v22  ;;  %v980_v18 = vadd.f32 -0.5, %v976_v0  ;;  %v1001_v24 = vmul.f32 4.0, %v997_v1  ;;  %vm1016_vm2 = vmor %vm1008_vm15, %vm1012_vm0 }
  0xe4   :  { %v898_v33 = vadd.f32 0.5, %v894_v35  ;;  %v834_v47 = vsel %vm830_vm14, %v802_v56, %v770_v25  ;;  %v838_v39 = vsel %vm830_vm14, %v770_v25, %v802_v56  ;;  %v878_v2 = vmul.f32 0.29122454, %v2735_v43 }
  0xe5   :  { %v925_v26 = vmul.f32 2.7557319e-06, %v3068_v50  ;;  %v961_v17 = vmul.f32 2.4801588e-05, %v3068_v50  ;;  %v846_v62 = vsub.f32 0.0, %v834_v47  ;;  %v862_v57 = vsub.f32 0.0, %v838_v39 }
  0xe6   :  { %v948_v55 = vmul.f32 %v944_v60, %v3028_v32  ;;  %v984_v48 = vmul.f32 %v980_v18, %v3028_v32  ;;  %v3079_v3 = vfloor.f32 %v898_v33  ;;  %vm1040_vm3 = vcmp.eq.f32.partialorder %v3047_v4, 2.0 }
  0xe7   :  { %v929_v59 = vadd.f32 -0.0001984127, %v925_v26  ;;  %v965_v63 = vadd.f32 -0.0013888889, %v961_v17  ;;  %v850_v61 = vsel %vm842_vm13, %v846_v62, %v834_v47  ;;  %v866_v42 = vsel %vm858_vm1, %v862_v57, %v838_v39  ;;  %vm1044_vm5 = vmor %vm1008_vm15, %vm1040_vm3 }
  0xe8   :  { %v952_v36 = vadd.f32 1.0, %v948_v55  ;;  %v988_v6 = vadd.f32 1.0, %v984_v48  ;;  %v870_v49 = vmul.f32 %v866_v42, %v2957_v29  ;;  %vm1028_vm4 = vcmp.ge.f32.partialorder %v3047_v4, 2.0 }
  0xe9   :  { %v933_v32 = vmul.f32 %v929_v59, %v3068_v50  ;;  %v969_v37 = vmul.f32 %v965_v63, %v3068_v50  ;;  %v3094_v44 = vsub.f32 %v3019_v10, %v1001_v24  ;;  %v3097_v29 = vmul.f32 2.8132389, %v2405_v14 }
  0xea   :  { %v956_v13 = vmul.f32 %v952_v36, %v3016_v27  ;;  %v874_v15 = vsub.f32 %v850_v61, %v870_v49  ;;  %v906_v58 = vmul.f32 1.5707964, %v3079_v3  ;;  %v914_v27 = vmul.f32 -4.371139e-08, %v3079_v3 }
  0xeb   :  { %v937_v5 = vadd.f32 0.008333334, %v933_v32  ;;  %v973_v19 = vadd.f32 0.041666668, %v969_v37  ;;  %v994_v34 = vmul.f32 0.25, %v3079_v3  ;;  %vm1009_vm6 = vcmp.eq.f32.partialorder %v3094_v44, 1.0 }
  0xec   :  { %v1020_v12 = vsel %vm1016_vm2, %v988_v6, %v956_v13  ;;  %v1024_v16 = vsel %vm1016_vm2, %v956_v13, %v988_v6  ;;  %v882_v54 = vmul.f32 %v878_v2, %v874_v15  ;;  %v910_v56 = vsub.f32 %v3052_v41, %v906_v58 }
  0xed   :  { %v1032_v10 = vsub.f32 0.0, %v1020_v12  ;;  %v1048_v23 = vsub.f32 0.0, %v1024_v16  ;;  %v941_v52 = vmul.f32 %v937_v5, %v3068_v50  ;;  %v977_v20 = vmul.f32 %v973_v19, %v3068_v50 }
  0xee   :  { %v998_v1 = vfloor.f32 %v994_v34  ;;  %v895_v45 = vmul.f32 0.63661975, %v3097_v29  ;;  %887 = vst [vmem:[#allocation5 + $0xf8] sm:$0xff] %v882_v54  ;;  %v1064_v35 = vmul.f32 0.22538143, %v2682_v30  ;;  %v3113_v24 = vsub.f32 %v910_v56, %v914_v27 }
  0xef   :  { %v1036_v22 = vsel %vm1028_vm4, %v1032_v10, %v1020_v12  ;;  %v1052_v0 = vsel %vm1044_vm5, %v1048_v23, %v1024_v16  ;;  %v945_v25 = vadd.f32 -0.16666667, %v941_v52  ;;  %v981_v18 = vadd.f32 -0.5, %v977_v20 }
  0xf0   :  { %v1056_v60 = vmul.f32 %v1052_v0, %v2970_v40  ;;  %vm1013_vm7 = vcmp.eq.f32.partialorder %v3094_v44, 3.0  ;;  %v899_v47 = vadd.f32 0.5, %v895_v45  ;;  %v3118_v39 = vmul.f32 3.4441512, %v2394_v7 }
  0xf1   :  { %v949_v33 = vmul.f32 %v945_v25, %v3068_v50  ;;  %v985_v26 = vmul.f32 %v981_v18, %v3068_v50  ;;  %v922_v17 = vmul.f32 %v3113_v24, %v3113_v24  ;;  %v1002_v40 = vmul.f32 4.0, %v998_v1  ;;  %vm1017_vm9 = vmor %vm1009_vm6, %vm1013_vm7 }
  0xf2   :  { %v1060_v4 = vsub.f32 %v1036_v22, %v1056_v60  ;;  %vm1041_vm8 = vcmp.eq.f32.partialorder %v3094_v44, 2.0  ;;  %v1065_v57 = vmul.f32 0.22538143, %v2700_v53  ;;  %v903_v55 = vfloor.f32 %v899_v47 }
  0xf3   :  { %v953_v62 = vadd.f32 1.0, %v949_v33  ;;  %v989_v2 = vadd.f32 1.0, %v985_v26  ;;  %v926_v59 = vmul.f32 2.7557319e-06, %v922_v17  ;;  %v962_v63 = vmul.f32 2.4801588e-05, %v922_v17  ;;  %vm1045_vm11 = vmor %vm1009_vm6, %vm1041_vm8 }
  0xf4   :  { %v1068_v48 = vmul.f32 %v1064_v35, %v1060_v4  ;;  %vm1029_vm10 = vcmp.ge.f32.partialorder %v3094_v44, 2.0  ;;  %v1081_v50 = vmul.f32 0.63661975, %v3118_v39  ;;  %v3131_v42 = vmul.f32 3.4441512, %v2396_v8 }
  0xf5   :  { %v957_v61 = vmul.f32 %v953_v62, %v3054_v28  ;;  %v930_v36 = vadd.f32 -0.0001984127, %v926_v59  ;;  %v966_v6 = vadd.f32 -0.0013888889, %v962_v63  ;;  %v3134_v49 = vsub.f32 %v3079_v3, %v1002_v40 }
  0xf6   :  { %1073 = vst [vmem:[#allocation5 + $0x100] sm:$0xff] %v1068_v48  ;;  %v995_v32 = vmul.f32 0.25, %v903_v55  ;;  %v907_v28 = vmul.f32 1.5707964, %v903_v55  ;;  %v915_v15 = vmul.f32 -4.371139e-08, %v903_v55 }
  0xf7   :  { %v1021_v37 = vsel %vm1017_vm9, %v989_v2, %v957_v61  ;;  %v1025_v13 = vsel %vm1017_vm9, %v957_v61, %v989_v2  ;;  %v934_v58 = vmul.f32 %v930_v36, %v922_v17  ;;  %v970_v12 = vmul.f32 %v966_v6, %v922_v17 }
  0xf8   :  { %v1033_v5 = vsub.f32 0.0, %v1021_v37  ;;  %v1049_v19 = vsub.f32 0.0, %v1025_v13  ;;  %v911_v16 = vsub.f32 %v3097_v29, %v907_v28  ;;  %v999_v27 = vfloor.f32 %v995_v32 }
  0xf9   :  { %v1085_v34 = vadd.f32 0.5, %v1081_v50  ;;  %v1082_v3 = vmul.f32 0.63661975, %v3131_v42  ;;  %v938_v23 = vadd.f32 0.008333334, %v934_v58  ;;  %vm1010_vm12 = vcmp.eq.f32.partialorder %v3134_v49, 1.0 }
  0xfa   :  { %v1037_v54 = vsel %vm1029_vm10, %v1033_v5, %v1021_v37  ;;  %v1053_v10 = vsel %vm1045_vm11, %v1049_v19, %v1025_v13  ;;  %v974_v52 = vadd.f32 0.041666668, %v970_v12  ;;  %v3146_v56 = vmul.f32 0.22538143, %v2714_v38 }
  0xfb   :  { %v1057_v20 = vmul.f32 %v1053_v10, %v2986_v21  ;;  %v3148_v1 = vsub.f32 %v911_v16, %v915_v15  ;;  %v3150_v45 = vfloor.f32 %v1085_v34  ;;  %v942_v22 = vmul.f32 %v938_v23, %v922_v17 }
  0xfc   :  { %v978_v0 = vmul.f32 %v974_v52, %v922_v17  ;;  %v1003_v35 = vmul.f32 4.0, %v999_v27  ;;  %v3153_v25 = vmul.f32 0.22538143, %v2735_v43  ;;  %v1086_v4 = vadd.f32 0.5, %v1082_v3 }
  0xfd   :  { %v1061_v44 = vsub.f32 %v1037_v54, %v1057_v20  ;;  %v923_v60 = vmul.f32 %v3148_v1, %v3148_v1  ;;  %v1093_v21 = vmul.f32 1.5707964, %v3150_v45  ;;  %v946_v18 = vadd.f32 -0.16666667, %v942_v22 }
  0xfe   :  { %v982_v33 = vadd.f32 -0.5, %v978_v0  ;;  %v1181_v47 = vmul.f32 0.25, %v3150_v45  ;;  %v1101_v48 = vmul.f32 -4.371139e-08, %v3150_v45  ;;  %vm1014_vm13 = vcmp.eq.f32.partialorder %v3134_v49, 3.0 }
  0xff   :  { %v1069_v26 = vmul.f32 %v1065_v57, %v1061_v44  ;;  %v927_v40 = vmul.f32 2.7557319e-06, %v923_v60  ;;  %v963_v62 = vmul.f32 2.4801588e-05, %v923_v60  ;;  %v950_v2 = vmul.f32 %v946_v18, %v922_v17  ;;  %vm1018_vm15 = vmor %vm1010_vm12, %vm1014_vm13 }
 0x100   :  { %v986_v59 = vmul.f32 %v982_v33, %v922_v17  ;;  %v3162_v63 = vsub.f32 %v903_v55, %v1003_v35  ;;  %vm1030_vm14 = vcmp.ge.f32.partialorder %v3134_v49, 2.0  ;;  %v1097_v36 = vsub.f32 %v3118_v39, %v1093_v21 }
 0x101   :  { %1074 = vst [vmem:[#allocation5 + $0x108] sm:$0xff] %v1069_v26  ;;  %v931_v61 = vadd.f32 -0.0001984127, %v927_v40  ;;  %v967_v50 = vadd.f32 -0.0013888889, %v963_v62  ;;  %v954_v6 = vadd.f32 1.0, %v950_v2  ;;  %v1185_v57 = vfloor.f32 %v1181_v47 }
 0x102   :  { %v990_v32 = vadd.f32 1.0, %v986_v59  ;;  %v1090_v37 = vfloor.f32 %v1086_v4  ;;  %vm1042_vm0 = vcmp.eq.f32.partialorder %v3134_v49, 2.0  ;;  %v3169_v55 = vsub.f32 %v1097_v36, %v1101_v48 }
 0x103   :  { %v935_v17 = vmul.f32 %v931_v61, %v923_v60  ;;  %v971_v13 = vmul.f32 %v967_v50, %v923_v60  ;;  %v958_v28 = vmul.f32 %v954_v6, %v3113_v24  ;;  %vm1011_vm1 = vcmp.eq.f32.partialorder %v3162_v63, 1.0  ;;  %vm1046_vm2 = vmor %vm1010_vm12, %vm1042_vm0 }
 0x104   :  { %v1094_v15 = vmul.f32 1.5707964, %v1090_v37  ;;  %v3174_v5 = vmul.f32 3.4441512, %v2398_v9  ;;  %v3178_v12 = vmul.f32 %v3169_v55, %v3169_v55  ;;  %v1189_v16 = vmul.f32 4.0, %v1185_v57 }
 0x105   :  { %v939_v19 = vadd.f32 0.008333334, %v935_v17  ;;  %v975_v58 = vadd.f32 0.041666668, %v971_v13  ;;  %v1022_v27 = vsel %vm1018_vm15, %v990_v32, %v958_v28  ;;  %v1026_v34 = vsel %vm1018_vm15, %v958_v28, %v990_v32 }
 0x106   :  { %v1098_v24 = vsub.f32 %v3131_v42, %v1094_v15  ;;  %v1102_v3 = vmul.f32 -4.371139e-08, %v1090_v37  ;;  %v1034_v54 = vsub.f32 0.0, %v1022_v27  ;;  %v1050_v10 = vsub.f32 0.0, %v1026_v34 }
 0x107   :  { %v943_v23 = vmul.f32 %v939_v19, %v923_v60  ;;  %v979_v52 = vmul.f32 %v975_v58, %v923_v60  ;;  %vm1015_vm3 = vcmp.eq.f32.partialorder %v3162_v63, 3.0  ;;  %v1113_v20 = vmul.f32 2.7557319e-06, %v3178_v12 }
 0x108   :  { %v1149_v22 = vmul.f32 2.4801588e-05, %v3178_v12  ;;  %v1182_v0 = vmul.f32 0.25, %v1090_v37  ;;  %v1038_v35 = vsel %vm1030_vm14, %v1034_v54, %v1022_v27  ;;  %v1054_v44 = vsel %vm1046_vm2, %v1050_v10, %v1026_v34  ;;  %vm1019_vm6 = vmor %vm1011_vm1, %vm1015_vm3 }
 0x109   :  { %v947_v21 = vadd.f32 -0.16666667, %v943_v23  ;;  %v983_v18 = vadd.f32 -0.5, %v979_v52  ;;  %vm1031_vm4 = vcmp.ge.f32.partialorder %v3162_v63, 2.0  ;;  %v1058_v33 = vmul.f32 %v1054_v44, %v3052_v41 }
 0x10a   :  { %vm1043_vm5 = vcmp.eq.f32.partialorder %v3162_v63, 2.0  ;;  %v1117_v47 = vadd.f32 -0.0001984127, %v1113_v20  ;;  %v1153_v4 = vadd.f32 -0.0013888889, %v1149_v22  ;;  %v3192_v62 = vsub.f32 %v3150_v45, %v1189_v16 }
 0x10b   :  { %v951_v26 = vmul.f32 %v947_v21, %v923_v60  ;;  %v987_v40 = vmul.f32 %v983_v18, %v923_v60  ;;  %v3194_v48 = vsub.f32 %v1098_v24, %v1102_v3  ;;  %v1062_v49 = vsub.f32 %v1038_v35, %v1058_v33  ;;  %vm1047_vm8 = vmor %vm1011_vm1, %vm1043_vm5 }
 0x10c   :  { %v1121_v2 = vmul.f32 %v1117_v47, %v3178_v12  ;;  %v1157_v59 = vmul.f32 %v1153_v4, %v3178_v12  ;;  %v1186_v61 = vfloor.f32 %v1182_v0  ;;  %v1083_v6 = vmul.f32 0.63661975, %v3174_v5 }
 0x10d   :  { %v955_v50 = vadd.f32 1.0, %v951_v26  ;;  %v991_v36 = vadd.f32 1.0, %v987_v40  ;;  %v3200_v41 = vmul.f32 %v3194_v48, %v3194_v48  ;;  %v1070_v60 = vmul.f32 %v3146_v56, %v1062_v49 }
 0x10e   :  { %v1125_v45 = vadd.f32 0.008333334, %v1121_v2  ;;  %v1161_v32 = vadd.f32 0.041666668, %v1157_v59  ;;  %v1190_v57 = vmul.f32 4.0, %v1186_v61  ;;  %vm1197_vm7 = vcmp.eq.f32.partialorder %v3192_v62, 1.0 }
 0x10f   :  { %v959_v17 = vmul.f32 %v955_v50, %v3148_v1  ;;  %v1114_v13 = vmul.f32 2.7557319e-06, %v3200_v41  ;;  %v1150_v28 = vmul.f32 2.4801588e-05, %v3200_v41  ;;  %1075 = vst [vmem:[#allocation5 + $0x110] sm:$0xff] %v1070_v60  ;;  %v1087_v58 = vadd.f32 0.5, %v1083_v6 }
 0x110   :  { %v1129_v15 = vmul.f32 %v1125_v45, %v3178_v12  ;;  %v1165_v56 = vmul.f32 %v1161_v32, %v3178_v12  ;;  %v3214_v19 = vsub.f32 %v1090_v37, %v1190_v57  ;;  %vm1201_vm9 = vcmp.eq.f32.partialorder %v3192_v62, 3.0 }
 0x111   :  { %v1023_v16 = vsel %vm1019_vm6, %v991_v36, %v959_v17  ;;  %v1027_v27 = vsel %vm1019_vm6, %v959_v17, %v991_v36  ;;  %v1118_v1 = vadd.f32 -0.0001984127, %v1114_v13  ;;  %v1154_v34 = vadd.f32 -0.0013888889, %v1150_v28  ;;  %vm1205_vm13 = vmor %vm1197_vm7, %vm1201_vm9 }
 0x112   :  { %v1035_v24 = vsub.f32 0.0, %v1023_v16  ;;  %v1051_v3 = vsub.f32 0.0, %v1027_v27  ;;  %v1133_v54 = vadd.f32 -0.16666667, %v1129_v15  ;;  %v1169_v10 = vadd.f32 -0.5, %v1165_v56 }
 0x113   :  { %vm1217_vm10 = vcmp.ge.f32.partialorder %v3192_v62, 2.0  ;;  %v1122_v37 = vmul.f32 %v1118_v1, %v3200_v41  ;;  %v1158_v23 = vmul.f32 %v1154_v34, %v3200_v41  ;;  %vm1229_vm11 = vcmp.eq.f32.partialorder %v3192_v62, 2.0 }
 0x114   :  { %v1039_v52 = vsel %vm1031_vm4, %v1035_v24, %v1023_v16  ;;  %v1055_v20 = vsel %vm1047_vm8, %v1051_v3, %v1027_v27  ;;  %v1137_v22 = vmul.f32 %v1133_v54, %v3178_v12  ;;  %v1173_v0 = vmul.f32 %v1169_v10, %v3178_v12  ;;  %vm1233_vm14 = vmor %vm1197_vm7, %vm1229_vm11 }
 0x115   :  { %v1059_v35 = vmul.f32 %v1055_v20, %v3097_v29  ;;  %v1126_v44 = vadd.f32 0.008333334, %v1122_v37  ;;  %v1162_v21 = vadd.f32 0.041666668, %v1158_v23  ;;  %vm1198_vm12 = vcmp.eq.f32.partialorder %v3214_v19, 1.0 }
 0x116   :  { %v1141_v18 = vadd.f32 1.0, %v1137_v22  ;;  %v1177_v33 = vadd.f32 1.0, %v1173_v0  ;;  %v3231_v47 = vfloor.f32 %v1087_v58  ;;  %v3240_v12 = vmul.f32 3.4441512, %v2405_v14 }
 0x117   :  { %v1063_v4 = vsub.f32 %v1039_v52, %v1059_v35  ;;  %v1130_v63 = vmul.f32 %v1126_v44, %v3200_v41  ;;  %v1166_v29 = vmul.f32 %v1162_v21, %v3200_v41  ;;  %vm1202_vm15 = vcmp.eq.f32.partialorder %v3214_v19, 3.0 }
 0x118   :  { %v1145_v26 = vmul.f32 %v1141_v18, %v3169_v55  ;;  %v1095_v40 = vmul.f32 1.5707964, %v3231_v47  ;;  %v1103_v49 = vmul.f32 -4.371139e-08, %v3231_v47  ;;  %v1183_v2 = vmul.f32 0.25, %v3231_v47  ;;  %vm1206_vm0 = vmor %vm1198_vm12, %vm1202_vm15 }
 0x119   :  { %v1071_v59 = vmul.f32 %v3153_v25, %v1063_v4  ;;  %v1134_v61 = vadd.f32 -0.16666667, %v1130_v63  ;;  %v1170_v50 = vadd.f32 -0.5, %v1166_v29  ;;  %v1084_v36 = vmul.f32 0.63661975, %v3240_v12 }
 0x11a   :  { %v1209_v6 = vsel %vm1205_vm13, %v1177_v33, %v1145_v26  ;;  %v1213_v60 = vsel %vm1205_vm13, %v1145_v26, %v1177_v33  ;;  %v1099_v55 = vsub.f32 %v3174_v5, %v1095_v40  ;;  %v1187_v13 = vfloor.f32 %v1183_v2 }
 0x11b   :  { %1076 = vst [vmem:[#allocation5 + $0x118] sm:$0xff] %v1071_v59  ;;  %v1221_v45 = vsub.f32 0.0, %v1209_v6  ;;  %v1237_v32 = vsub.f32 0.0, %v1213_v60  ;;  %v1138_v25 = vmul.f32 %v1134_v61, %v3200_v41  ;;  %v1174_v57 = vmul.f32 %v1170_v50, %v3200_v41 }
 0x11c   :  { %v3256_v17 = vsub.f32 %v1099_v55, %v1103_v49  ;;  %v1088_v28 = vadd.f32 0.5, %v1084_v36  ;;  %v1253_v1 = vmul.f32 0.18394111, %v2682_v30  ;;  %vm1230_vm1 = vcmp.eq.f32.partialorder %v3214_v19, 2.0 }
 0x11d   :  { %v1225_v15 = vsel %vm1217_vm10, %v1221_v45, %v1209_v6  ;;  %v1241_v56 = vsel %vm1233_vm14, %v1237_v32, %v1213_v60  ;;  %v1142_v58 = vadd.f32 1.0, %v1138_v25  ;;  %v1178_v16 = vadd.f32 1.0, %v1174_v57  ;;  %vm1234_vm3 = vmor %vm1198_vm12, %vm1230_vm1 }
 0x11e   :  { %v1245_v27 = vmul.f32 %v1241_v56, %v3118_v39  ;;  %v1111_v41 = vmul.f32 %v3256_v17, %v3256_v17  ;;  %v1254_v34 = vmul.f32 0.18394111, %v2700_v53  ;;  %v3272_v24 = vmul.f32 0.18394111, %v2714_v38 }
 0x11f   :  { %v1146_v62 = vmul.f32 %v1142_v58, %v3194_v48  ;;  %v3274_v39 = vfloor.f32 %v1088_v28  ;;  %vm1218_vm2 = vcmp.ge.f32.partialorder %v3214_v19, 2.0  ;;  %v1191_v52 = vmul.f32 4.0, %v1187_v13 }
 0x120   :  { %v1249_v3 = vsub.f32 %v1225_v15, %v1245_v27  ;;  %v1115_v54 = vmul.f32 2.7557319e-06, %v1111_v41  ;;  %v1151_v10 = vmul.f32 2.4801588e-05, %v1111_v41  ;;  %v3280_v48 = vmul.f32 1.1526918, %v2394_v7 }
 0x121   :  { %v1210_v37 = vsel %vm1206_vm0, %v1178_v16, %v1146_v62  ;;  %v1214_v23 = vsel %vm1206_vm0, %v1146_v62, %v1178_v16  ;;  %v1096_v21 = vmul.f32 1.5707964, %v3274_v39  ;;  %v3284_v18 = vmul.f32 0.18394111, %v2735_v43 }
 0x122   :  { %v1257_v20 = vmul.f32 %v1253_v1, %v1249_v3  ;;  %v1222_v22 = vsub.f32 0.0, %v1210_v37  ;;  %v1238_v0 = vsub.f32 0.0, %v1214_v23  ;;  %v1119_v35 = vadd.f32 -0.0001984127, %v1115_v54 }
 0x123   :  { %v1155_v44 = vadd.f32 -0.0013888889, %v1151_v10  ;;  %v3288_v33 = vmul.f32 %v2682_v30, %v2460_v11  ;;  %v1104_v26 = vmul.f32 -4.371139e-08, %v3274_v39  ;;  %v3295_v2 = vsub.f32 %v3231_v47, %v1191_v52 }
 0x124   :  { %1262 = vst [vmem:[#allocation5 + $0x120] sm:$0xff] %v1257_v20  ;;  %v1226_v4 = vsel %vm1218_vm2, %v1222_v22, %v1210_v37  ;;  %v1242_v63 = vsel %vm1234_vm3, %v1238_v0, %v1214_v23  ;;  %v1123_v29 = vmul.f32 %v1119_v35, %v1111_v41  ;;  %v1100_v59 = vsub.f32 %v3240_v12, %v1096_v21 }
 0x125   :  { %v1246_v40 = vmul.f32 %v1242_v63, %v3131_v42  ;;  %v1159_v49 = vmul.f32 %v1155_v44, %v1111_v41  ;;  %v1184_v11 = vmul.f32 0.25, %v3274_v39  ;;  %v1270_v30 = vmul.f32 0.63661975, %v3280_v48 }
 0x126   :  { %v1127_v61 = vadd.f32 0.008333334, %v1123_v29  ;;  %v3300_v36 = vsub.f32 %v1100_v59, %v1104_v26  ;;  %v3303_v6 = vmul.f32 0.49888194, %v3288_v33  ;;  %v3307_v47 = vmul.f32 %v2700_v53, %v2473_v31 }
 0x127   :  { %v1250_v50 = vsub.f32 %v1226_v4, %v1246_v40  ;;  %v1163_v19 = vadd.f32 0.041666668, %v1159_v49  ;;  %v1274_v42 = vadd.f32 0.5, %v1270_v30  ;;  %v3310_v55 = vmul.f32 1.1526918, %v2396_v8 }
 0x128   :  { %v1131_v60 = vmul.f32 %v1127_v61, %v1111_v41  ;;  %vm1199_vm4 = vcmp.eq.f32.partialorder %v3295_v2, 1.0  ;;  %v1112_v25 = vmul.f32 %v3300_v36, %v3300_v36  ;;  %v1188_v13 = vfloor.f32 %v1184_v11 }
 0x129   :  { %v1258_v45 = vmul.f32 %v1254_v34, %v1250_v50  ;;  %v1167_v32 = vmul.f32 %v1163_v19, %v1111_v41  ;;  %v3315_v28 = vfloor.f32 %v1274_v42  ;;  %v1271_v15 = vmul.f32 0.63661975, %v3310_v55 }
 0x12a   :  { %v1135_v57 = vadd.f32 -0.16666667, %v1131_v60  ;;  %vm1203_vm5 = vcmp.eq.f32.partialorder %v3295_v2, 3.0  ;;  %v1116_v31 = vmul.f32 2.7557319e-06, %v1112_v25  ;;  %vm1219_vm6 = vcmp.ge.f32.partialorder %v3295_v2, 2.0 }
 0x12b   :  { %1263 = vst [vmem:[#allocation5 + $0x128] sm:$0xff] %v1258_v45  ;;  %v1171_v56 = vadd.f32 -0.5, %v1167_v32  ;;  %v1152_v53 = vmul.f32 2.4801588e-05, %v1112_v25  ;;  %vm1231_vm7 = vcmp.eq.f32.partialorder %v3295_v2, 2.0  ;;  %v3323_v16 = vmul.f32 %v3280_v48, %v3280_v48  ;;  %vm1207_vm8 = vmor %vm1199_vm4, %vm1203_vm5 }
 0x12c   :  { %v1139_v58 = vmul.f32 %v1135_v57, %v1111_v41  ;;  %v1120_v1 = vadd.f32 -0.0001984127, %v1116_v31  ;;  %v1282_v34 = vmul.f32 1.5707964, %v3315_v28  ;;  %v1192_v54 = vmul.f32 4.0, %v1188_v13  ;;  %vm1235_vm9 = vmor %vm1199_vm4, %vm1231_vm7 }
 0x12d   :  { %v1175_v27 = vmul.f32 %v1171_v56, %v1111_v41  ;;  %v1156_v62 = vadd.f32 -0.0013888889, %v1152_v53  ;;  %v1290_v10 = vmul.f32 -4.371139e-08, %v3315_v28  ;;  %v1275_v37 = vadd.f32 0.5, %v1271_v15 }
 0x12e   :  { %v1143_v3 = vadd.f32 1.0, %v1139_v58  ;;  %v1124_v52 = vmul.f32 %v1120_v1, %v1112_v25  ;;  %v1286_v22 = vsub.f32 %v3280_v48, %v1282_v34  ;;  %v1370_v0 = vmul.f32 0.25, %v3315_v28 }
 0x12f   :  { %v1179_v23 = vadd.f32 1.0, %v1175_v27  ;;  %v1160_v20 = vmul.f32 %v1156_v62, %v1112_v25  ;;  %v3335_v35 = vmul.f32 3.0, %v3280_v48  ;;  %v3337_v44 = vfloor.f32 %v1275_v37 }
 0x130   :  { %v1147_v41 = vmul.f32 %v1143_v3, %v3256_v17  ;;  %v1128_v21 = vadd.f32 0.008333334, %v1124_v52  ;;  %v3339_v63 = vsub.f32 %v1286_v22, %v1290_v10  ;;  %v1438_v29 = vsub.f32 3.0, %v3323_v16 }
 0x131   :  { %v1164_v4 = vadd.f32 0.041666668, %v1160_v20  ;;  %v1196_v17 = vsub.f32 %v3274_v39, %v1192_v54  ;;  %v1283_v48 = vmul.f32 1.5707964, %v3337_v44  ;;  %v1374_v50 = vfloor.f32 %v1370_v0 }
 0x132   :  { %v1211_v26 = vsel %vm1207_vm8, %v1179_v23, %v1147_v41  ;;  %v1215_v40 = vsel %vm1207_vm8, %v1147_v41, %v1179_v23  ;;  %v1132_v61 = vmul.f32 %v1128_v21, %v1112_v25  ;;  %v1298_v30 = vmul.f32 %v3339_v63, %v3339_v63 }
 0x133   :  { %v1223_v49 = vsub.f32 0.0, %v1211_v26  ;;  %v1239_v59 = vsub.f32 0.0, %v1215_v40  ;;  %v1168_v11 = vmul.f32 %v1164_v4, %v1112_v25  ;;  %v1287_v19 = vsub.f32 %v3310_v55, %v1283_v48 }
 0x134   :  { %v1291_v60 = vmul.f32 -4.371139e-08, %v3337_v44  ;;  %v1136_v32 = vadd.f32 -0.16666667, %v1132_v61  ;;  %v1302_v13 = vmul.f32 2.7557319e-06, %v1298_v30  ;;  %v3357_v56 = vmul.f32 %v3310_v55, %v3310_v55 }
 0x135   :  { %v1227_v42 = vsel %vm1219_vm6, %v1223_v49, %v1211_v26  ;;  %v1243_v45 = vsel %vm1235_vm9, %v1239_v59, %v1215_v40  ;;  %v1172_v39 = vadd.f32 -0.5, %v1168_v11  ;;  %v1338_v15 = vmul.f32 2.4801588e-05, %v1298_v30 }
 0x136   :  { %v1247_v57 = vmul.f32 %v1243_v45, %v3174_v5  ;;  %v1140_v31 = vmul.f32 %v1136_v32, %v1112_v25  ;;  %vm1200_vm10 = vcmp.eq.f32.partialorder %v1196_v17, 1.0  ;;  %vm1204_vm11 = vcmp.eq.f32.partialorder %v1196_v17, 3.0 }
 0x137   :  { %v1176_v53 = vmul.f32 %v1172_v39, %v1112_v25  ;;  %v1306_v27 = vadd.f32 -0.0001984127, %v1302_v13  ;;  %v1342_v1 = vadd.f32 -0.0013888889, %v1338_v15  ;;  %v1378_v2 = vmul.f32 4.0, %v1374_v50  ;;  %vm1208_vm12 = vmor %vm1200_vm10, %vm1204_vm11 }
 0x138   :  { %v1251_v58 = vsub.f32 %v1227_v42, %v1247_v57  ;;  %v1144_v62 = vadd.f32 1.0, %v1140_v31  ;;  %v3359_v3 = vsub.f32 %v1287_v19, %v1291_v60  ;;  %v1371_v5 = vmul.f32 0.25, %v3337_v44 }
 0x139   :  { %v1180_v34 = vadd.f32 1.0, %v1176_v53  ;;  %vm1232_vm13 = vcmp.eq.f32.partialorder %v1196_v17, 2.0  ;;  %v1310_v10 = vmul.f32 %v1306_v27, %v1298_v30  ;;  %v1346_v37 = vmul.f32 %v1342_v1, %v1298_v30 }
 0x13a   :  { %v1259_v54 = vmul.f32 %v3272_v24, %v1251_v58  ;;  %v1148_v25 = vmul.f32 %v1144_v62, %v3300_v36  ;;  %vm1220_vm14 = vcmp.ge.f32.partialorder %v1196_v17, 2.0  ;;  %v1299_v23 = vmul.f32 %v3359_v3, %v3359_v3  ;;  %vm1236_vm15 = vmor %vm1200_vm10, %vm1232_vm13 }
 0x13b   :  { %v1375_v52 = vfloor.f32 %v1371_v5  ;;  %v1314_v20 = vadd.f32 0.008333334, %v1310_v10  ;;  %v1350_v22 = vadd.f32 0.041666668, %v1346_v37  ;;  %v3368_v41 = vsub.f32 %v3315_v28, %v1378_v2 }
 0x13c   :  { %1264 = vst [vmem:[#allocation5 + $0x130] sm:$0xff] %v1259_v54  ;;  %v3371_v24 = vmul.f32 1.1526918, %v2398_v9  ;;  %v1212_v0 = vsel %vm1208_vm12, %v1180_v34, %v1148_v25  ;;  %v1216_v21 = vsel %vm1208_vm12, %v1148_v25, %v1180_v34  ;;  %v1303_v4 = vmul.f32 2.7557319e-06, %v1299_v23 }
 0x13d   :  { %v1339_v36 = vmul.f32 2.4801588e-05, %v1299_v23  ;;  %v1224_v26 = vsub.f32 0.0, %v1212_v0  ;;  %v1240_v40 = vsub.f32 0.0, %v1216_v21  ;;  %v1318_v48 = vmul.f32 %v1314_v20, %v1298_v30 }
 0x13e   :  { %v1354_v49 = vmul.f32 %v1350_v22, %v1298_v30  ;;  %v1307_v59 = vadd.f32 -0.0001984127, %v1303_v4  ;;  %v1379_v11 = vmul.f32 4.0, %v1375_v52  ;;  %v1439_v50 = vsub.f32 3.0, %v3357_v56 }
 0x13f   :  { %v1343_v61 = vadd.f32 -0.0013888889, %v1339_v36  ;;  %v1228_v28 = vsel %vm1220_vm14, %v1224_v26, %v1212_v0  ;;  %v1244_v19 = vsel %vm1236_vm15, %v1240_v40, %v1216_v21  ;;  %v1322_v60 = vadd.f32 -0.16666667, %v1318_v48 }
 0x140   :  { %v1358_v42 = vadd.f32 -0.5, %v1354_v49  ;;  %v1248_v45 = vmul.f32 %v1244_v19, %v3240_v12  ;;  %vm1386_vm0 = vcmp.eq.f32.partialorder %v3368_v41, 1.0  ;;  %v1311_v32 = vmul.f32 %v1307_v59, %v1299_v23 }
 0x141   :  { %v1347_v39 = vmul.f32 %v1343_v61, %v1299_v23  ;;  %v1326_v57 = vmul.f32 %v1322_v60, %v1298_v30  ;;  %vm1390_vm1 = vcmp.eq.f32.partialorder %v3368_v41, 3.0  ;;  %v1272_v15 = vmul.f32 0.63661975, %v3371_v24 }
 0x142   :  { %v1362_v13 = vmul.f32 %v1358_v42, %v1298_v30  ;;  %v1252_v31 = vsub.f32 %v1228_v28, %v1248_v45  ;;  %v1315_v53 = vadd.f32 0.008333334, %v1311_v32  ;;  %v3381_v17 = vsub.f32 %v3337_v44, %v1379_v11  ;;  %vm1394_vm3 = vmor %vm1386_vm0, %vm1390_vm1 }
 0x143   :  { %v1351_v58 = vadd.f32 0.041666668, %v1347_v39  ;;  %v1330_v27 = vadd.f32 1.0, %v1326_v57  ;;  %vm1406_vm2 = vcmp.ge.f32.partialorder %v3368_v41, 2.0  ;;  %v3385_v12 = vmul.f32 3.0, %v3310_v55 }
 0x144   :  { %v1366_v1 = vadd.f32 1.0, %v1362_v13  ;;  %v1260_v2 = vmul.f32 %v3284_v18, %v1252_v31  ;;  %vm1418_vm4 = vcmp.eq.f32.partialorder %v3368_v41, 2.0  ;;  %v1319_v30 = vmul.f32 %v1315_v53, %v1299_v23 }
 0x145   :  { %v1355_v62 = vmul.f32 %v1351_v58, %v1299_v23  ;;  %v1334_v34 = vmul.f32 %v1330_v27, %v3339_v63  ;;  %v3393_v44 = vmul.f32 0.49888194, %v3307_v47  ;;  %v3397_v5 = vmul.f32 %v2714_v38, %v2489_v51  ;;  %vm1422_vm7 = vmor %vm1386_vm0, %vm1418_vm4 }
 0x146   :  { %v1276_v55 = vadd.f32 0.5, %v1272_v15  ;;  %1265 = vst [vmem:[#allocation5 + $0x138] sm:$0xff] %v1260_v2  ;;  %v1323_v54 = vadd.f32 -0.16666667, %v1319_v30  ;;  %vm1387_vm5 = vcmp.eq.f32.partialorder %v3381_v17, 1.0  ;;  %vm1391_vm6 = vcmp.eq.f32.partialorder %v3381_v17, 3.0 }
 0x147   :  { %v1359_v18 = vadd.f32 -0.5, %v1355_v62  ;;  %v1398_v10 = vsel %vm1394_vm3, %v1366_v1, %v1334_v34  ;;  %v1402_v37 = vsel %vm1394_vm3, %v1334_v34, %v1366_v1  ;;  %v3404_v25 = vmul.f32 1.1526918, %v2405_v14  ;;  %vm1395_vm8 = vmor %vm1387_vm5, %vm1391_vm6 }
 0x148   :  { %v1280_v63 = vfloor.f32 %v1276_v55  ;;  %v1410_v52 = vsub.f32 0.0, %v1398_v10  ;;  %v1426_v51 = vsub.f32 0.0, %v1402_v37  ;;  %v1327_v38 = vmul.f32 %v1323_v54, %v1299_v23 }
 0x149   :  { %v1363_v20 = vmul.f32 %v1359_v18, %v1299_v23  ;;  %v3408_v4 = vmul.f32 %v2735_v43, %v2574_v46  ;;  %vm1419_vm9 = vcmp.eq.f32.partialorder %v3381_v17, 2.0  ;;  %v3424_v41 = vmul.f32 %v3371_v24, %v3371_v24 }
 0x14a   :  { %v1284_v22 = vmul.f32 1.5707964, %v1280_v63  ;;  %v1292_v0 = vmul.f32 -4.371139e-08, %v1280_v63  ;;  %v1372_v21 = vmul.f32 0.25, %v1280_v63  ;;  %v1414_v36 = vsel %vm1406_vm2, %v1410_v52, %v1398_v10  ;;  %vm1423_vm11 = vmor %vm1387_vm5, %vm1419_vm9 }
 0x14b   :  { %v1430_v26 = vsel %vm1422_vm7, %v1426_v51, %v1402_v37  ;;  %v1331_v40 = vadd.f32 1.0, %v1327_v38  ;;  %v1367_v48 = vadd.f32 1.0, %v1363_v20  ;;  %v1442_v49 = vmul.f32 %v1438_v29, %v1414_v36 }
 0x14c   :  { %v1450_v59 = vmul.f32 %v3335_v35, %v1430_v26  ;;  %v1288_v46 = vsub.f32 %v3371_v24, %v1284_v22  ;;  %v1376_v23 = vfloor.f32 %v1372_v21  ;;  %v1273_v16 = vmul.f32 0.63661975, %v3404_v25 }
 0x14d   :  { %v1335_v43 = vmul.f32 %v1331_v40, %v3359_v3  ;;  %vm1407_vm10 = vcmp.ge.f32.partialorder %v3381_v17, 2.0  ;;  %v3431_v61 = vmul.f32 1.8190023, %v2394_v7  ;;  %v3437_v19 = vmul.f32 %v3404_v25, %v3404_v25 }
 0x14e   :  { %v1454_v29 = vsub.f32 %v1442_v49, %v1450_v59  ;;  %v3428_v35 = vsub.f32 %v1288_v46, %v1292_v0  ;;  %v1277_v3 = vadd.f32 0.5, %v1273_v16  ;;  %v1380_v39 = vmul.f32 4.0, %v1376_v23 }
 0x14f   :  { %v1399_v11 = vsel %vm1395_vm8, %v1367_v48, %v1335_v43  ;;  %v1403_v28 = vsel %vm1395_vm8, %v1335_v43, %v1367_v48  ;;  %v1440_v57 = vsub.f32 3.0, %v3424_v41  ;;  %v1475_v15 = vmul.f32 0.63661975, %v3431_v61 }
 0x150   :  { %v1462_v60 = vmul.f32 %v3303_v6, %v1454_v29  ;;  %v1411_v42 = vsub.f32 0.0, %v1399_v11  ;;  %v1427_v45 = vsub.f32 0.0, %v1403_v28  ;;  %v1300_v32 = vmul.f32 %v3428_v35, %v3428_v35 }
 0x151   :  { %v1281_v13 = vfloor.f32 %v1277_v3  ;;  %v3450_v2 = vmul.f32 0.49888194, %v3397_v5  ;;  %v3453_v30 = vmul.f32 0.49888194, %v3408_v4  ;;  %v3456_v55 = vmul.f32 3.0, %v3371_v24 }
 0x152   :  { %1467 = vst [vmem:[#allocation5 + $0x140] sm:$0xff] %v1462_v60  ;;  %v1415_v31 = vsel %vm1407_vm10, %v1411_v42, %v1399_v11  ;;  %v1431_v53 = vsel %vm1423_vm11, %v1427_v45, %v1403_v28  ;;  %v1304_v58 = vmul.f32 2.7557319e-06, %v1300_v32  ;;  %v1340_v27 = vmul.f32 2.4801588e-05, %v1300_v32 }
 0x153   :  { %v1443_v6 = vmul.f32 %v1439_v50, %v1415_v31  ;;  %v1451_v1 = vmul.f32 %v3385_v12, %v1431_v53  ;;  %v1441_v17 = vsub.f32 3.0, %v3437_v19  ;;  %v1285_v18 = vmul.f32 1.5707964, %v1281_v13 }
 0x154   :  { %v1308_v62 = vadd.f32 -0.0001984127, %v1304_v58  ;;  %v1344_v34 = vadd.f32 -0.0013888889, %v1340_v27  ;;  %v1293_v10 = vmul.f32 -4.371139e-08, %v1281_v13  ;;  %v3459_v12 = vsub.f32 %v1280_v63, %v1380_v39 }
 0x155   :  { %v1455_v54 = vsub.f32 %v1443_v6, %v1451_v1  ;;  %v1373_v56 = vmul.f32 0.25, %v1281_v13  ;;  %v1479_v52 = vadd.f32 0.5, %v1475_v15  ;;  %v1289_v38 = vsub.f32 %v3404_v25, %v1285_v18 }
 0x156   :  { %v1312_v50 = vmul.f32 %v1308_v62, %v1300_v32  ;;  %v1348_v37 = vmul.f32 %v1344_v34, %v1300_v32  ;;  %v3464_v22 = vmul.f32 3.0, %v3404_v25  ;;  %v3469_v36 = vmul.f32 1.8190023, %v2396_v8 }
 0x157   :  { %v1463_v51 = vmul.f32 %v3393_v44, %v1455_v54  ;;  %v1377_v20 = vfloor.f32 %v1373_v56  ;;  %v3466_v21 = vfloor.f32 %v1479_v52  ;;  %v3471_v26 = vsub.f32 %v1289_v38, %v1293_v10 }
 0x158   :  { %v1316_v24 = vadd.f32 0.008333334, %v1312_v50  ;;  %v1352_v0 = vadd.f32 0.041666668, %v1348_v37  ;;  %v3475_v44 = vmul.f32 %v3431_v61, %v3431_v61  ;;  %v3478_v40 = vmul.f32 0.194704, %v3288_v33 }
 0x159   :  { %1468 = vst [vmem:[#allocation5 + $0x148] sm:$0xff] %v1463_v51  ;;  %v1381_v63 = vmul.f32 4.0, %v1377_v20  ;;  %vm1388_vm12 = vcmp.eq.f32.partialorder %v3459_v12, 1.0  ;;  %v1487_v49 = vmul.f32 1.5707964, %v3466_v21  ;;  %vm1392_vm13 = vcmp.eq.f32.partialorder %v3459_v12, 3.0 }
 0x15a   :  { %v1320_v25 = vmul.f32 %v1316_v24, %v1300_v32  ;;  %v1356_v48 = vmul.f32 %v1352_v0, %v1300_v32  ;;  %v1301_v59 = vmul.f32 %v3471_v26, %v3471_v26  ;;  %v1495_v46 = vmul.f32 -4.371139e-08, %v3466_v21  ;;  %vm1396_vm0 = vmor %vm1388_vm12, %vm1392_vm13 }
 0x15b   :  { %v1575_v43 = vmul.f32 0.25, %v3466_v21  ;;  %v1491_v29 = vsub.f32 %v3431_v61, %v1487_v49  ;;  %v1476_v11 = vmul.f32 0.63661975, %v3469_v36  ;;  %vm1408_vm14 = vcmp.ge.f32.partialorder %v3459_v12, 2.0 }
 0x15c   :  { %v1324_v23 = vadd.f32 -0.16666667, %v1320_v25  ;;  %v1360_v16 = vadd.f32 -0.5, %v1356_v48  ;;  %v1305_v28 = vmul.f32 2.7557319e-06, %v1301_v59  ;;  %v3490_v60 = vsub.f32 %v1281_v13, %v1381_v63 }
 0x15d   :  { %v1341_v3 = vmul.f32 2.4801588e-05, %v1301_v59  ;;  %vm1420_vm15 = vcmp.eq.f32.partialorder %v3459_v12, 2.0  ;;  %v1643_v39 = vsub.f32 3.0, %v3475_v44  ;;  %v3494_v53 = vsub.f32 %v1491_v29, %v1495_v46 }
 0x15e   :  { %v1328_v42 = vmul.f32 %v1324_v23, %v1300_v32  ;;  %v1364_v45 = vmul.f32 %v1360_v16, %v1300_v32  ;;  %v1309_v15 = vadd.f32 -0.0001984127, %v1305_v28  ;;  %v1579_v58 = vfloor.f32 %v1575_v43  ;;  %vm1424_vm3 = vmor %vm1388_vm12, %vm1420_vm15 }
 0x15f   :  { %v1345_v31 = vadd.f32 -0.0013888889, %v1341_v3  ;;  %v1480_v1 = vadd.f32 0.5, %v1476_v11  ;;  %v3497_v62 = vmul.f32 1.8190023, %v2398_v9  ;;  %vm1389_vm1 = vcmp.eq.f32.partialorder %v3490_v60, 1.0 }
 0x160   :  { %v1332_v27 = vadd.f32 1.0, %v1328_v42  ;;  %v1368_v6 = vadd.f32 1.0, %v1364_v45  ;;  %v1313_v32 = vmul.f32 %v1309_v15, %v1301_v59  ;;  %v1503_v34 = vmul.f32 %v3494_v53, %v3494_v53 }
 0x161   :  { %v1349_v13 = vmul.f32 %v1345_v31, %v1301_v59  ;;  %vm1393_vm2 = vcmp.eq.f32.partialorder %v3490_v60, 3.0  ;;  %v1583_v18 = vmul.f32 4.0, %v1579_v58  ;;  %v3508_v10 = vfloor.f32 %v1480_v1 }
 0x162   :  { %v1336_v54 = vmul.f32 %v1332_v27, %v3428_v35  ;;  %v1317_v56 = vadd.f32 0.008333334, %v1313_v32  ;;  %v1507_v37 = vmul.f32 2.7557319e-06, %v1503_v34  ;;  %v1543_v38 = vmul.f32 2.4801588e-05, %v1503_v34  ;;  %vm1397_vm6 = vmor %vm1389_vm1, %vm1393_vm2 }
 0x163   :  { %v1353_v50 = vadd.f32 0.041666668, %v1349_v13  ;;  %v1477_v20 = vmul.f32 0.63661975, %v3497_v62  ;;  %v1488_v49 = vmul.f32 1.5707964, %v3508_v10  ;;  %v3523_v15 = vsub.f32 %v3466_v21, %v1583_v18 }
 0x164   :  { %v1400_v52 = vsel %vm1396_vm0, %v1368_v6, %v1336_v54  ;;  %v1404_v51 = vsel %vm1396_vm0, %v1336_v54, %v1368_v6  ;;  %v1321_v0 = vmul.f32 %v1317_v56, %v1301_v59  ;;  %v1511_v25 = vadd.f32 -0.0001984127, %v1507_v37 }
 0x165   :  { %v1412_v24 = vsub.f32 0.0, %v1400_v52  ;;  %v1428_v35 = vsub.f32 0.0, %v1404_v51  ;;  %v1357_v63 = vmul.f32 %v1353_v50, %v1301_v59  ;;  %v1547_v48 = vadd.f32 -0.0013888889, %v1543_v38 }
 0x166   :  { %v1325_v23 = vadd.f32 -0.16666667, %v1321_v0  ;;  %v1515_v28 = vmul.f32 %v1511_v25, %v1503_v34  ;;  %vm1409_vm4 = vcmp.ge.f32.partialorder %v3490_v60, 2.0  ;;  %v1492_v27 = vsub.f32 %v3469_v36, %v1488_v49 }
 0x167   :  { %v1416_v46 = vsel %vm1408_vm14, %v1412_v24, %v1400_v52  ;;  %v1432_v43 = vsel %vm1424_vm3, %v1428_v35, %v1404_v51  ;;  %v1361_v16 = vadd.f32 -0.5, %v1357_v63  ;;  %v1551_v3 = vmul.f32 %v1547_v48, %v1503_v34 }
 0x168   :  { %v1444_v29 = vmul.f32 %v1440_v57, %v1416_v46  ;;  %v1452_v11 = vmul.f32 %v3456_v55, %v1432_v43  ;;  %v1329_v42 = vmul.f32 %v1325_v23, %v1301_v59  ;;  %v1519_v12 = vadd.f32 0.008333334, %v1515_v28 }
 0x169   :  { %v1365_v45 = vmul.f32 %v1361_v16, %v1301_v59  ;;  %v1555_v58 = vadd.f32 0.041666668, %v1551_v3  ;;  %vm1421_vm5 = vcmp.eq.f32.partialorder %v3490_v60, 2.0  ;;  %v1496_v41 = vmul.f32 -4.371139e-08, %v3508_v10 }
 0x16a   :  { %v1456_v31 = vsub.f32 %v1444_v29, %v1452_v11  ;;  %v1333_v6 = vadd.f32 1.0, %v1329_v42  ;;  %v1523_v55 = vmul.f32 %v1519_v12, %v1503_v34  ;;  %v1481_v59 = vadd.f32 0.5, %v1477_v20  ;;  %vm1425_vm9 = vmor %vm1389_vm1, %vm1421_vm5 }
 0x16b   :  { %v1369_v1 = vadd.f32 1.0, %v1365_v45  ;;  %v1559_v21 = vmul.f32 %v1555_v58, %v1503_v34  ;;  %vm1591_vm7 = vcmp.eq.f32.partialorder %v3523_v15, 1.0  ;;  %v3535_v13 = vsub.f32 %v1492_v27, %v1496_v41 }
 0x16c   :  { %v1464_v57 = vmul.f32 %v3450_v2, %v1456_v31  ;;  %v1337_v32 = vmul.f32 %v1333_v6, %v3471_v26  ;;  %v1576_v54 = vmul.f32 0.25, %v3508_v10  ;;  %v1527_v18 = vadd.f32 -0.16666667, %v1523_v55 }
 0x16d   :  { %v1563_v56 = vadd.f32 -0.5, %v1559_v21  ;;  %vm1595_vm8 = vcmp.eq.f32.partialorder %v3523_v15, 3.0  ;;  %v3539_v2 = vfloor.f32 %v1481_v59  ;;  %vm1623_vm10 = vcmp.eq.f32.partialorder %v3523_v15, 2.0 }
 0x16e   :  { %1469 = vst [vmem:[#allocation5 + $0x150] sm:$0xff] %v1464_v57  ;;  %v1401_v50 = vsel %vm1397_vm6, %v1369_v1, %v1337_v32  ;;  %v1405_v37 = vsel %vm1397_vm6, %v1337_v32, %v1369_v1  ;;  %v1504_v26 = vmul.f32 %v3535_v13, %v3535_v13  ;;  %v1531_v38 = vmul.f32 %v1527_v18, %v1503_v34  ;;  %vm1599_vm11 = vmor %vm1591_vm7, %vm1595_vm8 }
 0x16f   :  { %v1413_v52 = vsub.f32 0.0, %v1401_v50  ;;  %v1429_v51 = vsub.f32 0.0, %v1405_v37  ;;  %v1567_v20 = vmul.f32 %v1563_v56, %v1503_v34  ;;  %v1580_v0 = vfloor.f32 %v1576_v54  ;;  %vm1627_vm13 = vmor %vm1591_vm7, %vm1623_vm10 }
 0x170   :  { %v1508_v24 = vmul.f32 2.7557319e-06, %v1504_v26  ;;  %v1544_v35 = vmul.f32 2.4801588e-05, %v1504_v26  ;;  %v1489_v63 = vmul.f32 1.5707964, %v3539_v2  ;;  %v3573_v6 = vmul.f32 %v3469_v36, %v3469_v36 }
 0x171   :  { %v1417_v25 = vsel %vm1409_vm4, %v1413_v52, %v1401_v50  ;;  %v1433_v48 = vsel %vm1425_vm9, %v1429_v51, %v1405_v37  ;;  %v1535_v49 = vadd.f32 1.0, %v1531_v38  ;;  %v1571_v46 = vadd.f32 1.0, %v1567_v20 }
 0x172   :  { %v1445_v43 = vmul.f32 %v1441_v17, %v1417_v25  ;;  %v1453_v23 = vmul.f32 %v3464_v22, %v1433_v48  ;;  %v1512_v34 = vadd.f32 -0.0001984127, %v1508_v24  ;;  %v1548_v16 = vadd.f32 -0.0013888889, %v1544_v35 }
 0x173   :  { %v1539_v29 = vmul.f32 %v1535_v49, %v3494_v53  ;;  %vm1611_vm12 = vcmp.ge.f32.partialorder %v3523_v15, 2.0  ;;  %v1651_v60 = vmul.f32 3.0, %v3431_v61  ;;  %v3562_v11 = vmul.f32 0.194704, %v3307_v47 }
 0x174   :  { %v1457_v19 = vsub.f32 %v1445_v43, %v1453_v23  ;;  %v1516_v17 = vmul.f32 %v1512_v34, %v1504_v26  ;;  %v1552_v28 = vmul.f32 %v1548_v16, %v1504_v26  ;;  %v1584_v22 = vmul.f32 4.0, %v1580_v0 }
 0x175   :  { %v1603_v3 = vsel %vm1599_vm11, %v1571_v46, %v1539_v29  ;;  %v1607_v42 = vsel %vm1599_vm11, %v1539_v29, %v1571_v46  ;;  %v1493_v53 = vsub.f32 %v3497_v62, %v1489_v63  ;;  %v1497_v45 = vmul.f32 -4.371139e-08, %v3539_v2 }
 0x176   :  { %v1465_v61 = vmul.f32 %v3453_v30, %v1457_v19  ;;  %v1615_v31 = vsub.f32 0.0, %v1603_v3  ;;  %v1631_v12 = vsub.f32 0.0, %v1607_v42  ;;  %v1520_v58 = vadd.f32 0.008333334, %v1516_v17 }
 0x177   :  { %v1556_v27 = vadd.f32 0.041666668, %v1552_v28  ;;  %v3575_v1 = vsub.f32 %v1493_v53, %v1497_v45  ;;  %v1577_v41 = vmul.f32 0.25, %v3539_v2  ;;  %v1588_v30 = vsub.f32 %v3508_v10, %v1584_v22 }
 0x178   :  { %1470 = vst [vmem:[#allocation5 + $0x158] sm:$0xff] %v1465_v61  ;;  %v1619_v57 = vsel %vm1611_vm12, %v1615_v31, %v1603_v3  ;;  %v1635_v55 = vsel %vm1627_vm13, %v1631_v12, %v1607_v42  ;;  %v1524_v21 = vmul.f32 %v1520_v58, %v1504_v26  ;;  %v3587_v37 = vmul.f32 %v3497_v62, %v3497_v62 }
 0x179   :  { %v1647_v59 = vmul.f32 %v1643_v39, %v1619_v57  ;;  %v1655_v32 = vmul.f32 %v1651_v60, %v1635_v55  ;;  %v1560_v54 = vmul.f32 %v1556_v27, %v1504_v26  ;;  %v1505_v18 = vmul.f32 %v3575_v1, %v3575_v1 }
 0x17a   :  { %v1528_v56 = vadd.f32 -0.16666667, %v1524_v21  ;;  %v1581_v50 = vfloor.f32 %v1577_v41  ;;  %v3590_v15 = vmul.f32 1.8190023, %v2405_v14  ;;  %vm1592_vm14 = vcmp.eq.f32.partialorder %v1588_v30, 1.0 }
 0x17b   :  { %v1659_v52 = vsub.f32 %v1647_v59, %v1655_v32  ;;  %v1564_v51 = vadd.f32 -0.5, %v1560_v54  ;;  %v1509_v10 = vmul.f32 2.7557319e-06, %v1505_v18  ;;  %v1545_v38 = vmul.f32 2.4801588e-05, %v1505_v18 }
 0x17c   :  { %v1532_v44 = vmul.f32 %v1528_v56, %v1504_v26  ;;  %vm1596_vm15 = vcmp.eq.f32.partialorder %v1588_v30, 3.0  ;;  %v1478_v39 = vmul.f32 0.63661975, %v3590_v15  ;;  %v1644_v25 = vsub.f32 3.0, %v3573_v6 }
 0x17d   :  { %v1667_v20 = vmul.f32 %v3478_v40, %v1659_v52  ;;  %v1568_v24 = vmul.f32 %v1564_v51, %v1504_v26  ;;  %v1513_v35 = vadd.f32 -0.0001984127, %v1509_v10  ;;  %v1549_v0 = vadd.f32 -0.0013888889, %v1545_v38  ;;  %vm1600_vm0 = vmor %vm1592_vm14, %vm1596_vm15 }
 0x17e   :  { %v1536_v63 = vadd.f32 1.0, %v1532_v44  ;;  %v1585_v48 = vmul.f32 4.0, %v1581_v50  ;;  %v1482_v49 = vadd.f32 0.5, %v1478_v39  ;;  %vm1624_vm1 = vcmp.eq.f32.partialorder %v1588_v30, 2.0 }
 0x17f   :  { %1672 = vst [vmem:[#allocation5 + $0x160] sm:$0xff] %v1667_v20  ;;  %v1572_v46 = vadd.f32 1.0, %v1568_v24  ;;  %v1517_v43 = vmul.f32 %v1513_v35, %v1505_v18  ;;  %v1553_v23 = vmul.f32 %v1549_v0, %v1505_v18  ;;  %vm1612_vm2 = vcmp.ge.f32.partialorder %v1588_v30, 2.0  ;;  %vm1628_vm3 = vmor %vm1592_vm14, %vm1624_vm1 }
 0x180   :  { %v1540_v34 = vmul.f32 %v1536_v63, %v3535_v13  ;;  %v1652_v40 = vmul.f32 3.0, %v3469_v36  ;;  %v3599_v26 = vmul.f32 3.0, %v3497_v62  ;;  %v1645_v60 = vsub.f32 3.0, %v3587_v37 }
 0x181   :  { %v1521_v16 = vadd.f32 0.008333334, %v1517_v43  ;;  %v1557_v29 = vadd.f32 0.041666668, %v1553_v23  ;;  %v3602_v19 = vfloor.f32 %v1482_v49  ;;  %v1589_v22 = vsub.f32 %v3539_v2, %v1585_v48 }
 0x182   :  { %v1604_v17 = vsel %vm1600_vm0, %v1572_v46, %v1540_v34  ;;  %v1608_v28 = vsel %vm1600_vm0, %v1540_v34, %v1572_v46  ;;  %v3607_v13 = vmul.f32 2.4645882, %v2394_v7  ;;  %v3614_v31 = vmul.f32 %v3590_v15, %v3590_v15 }
 0x183   :  { %v1616_v3 = vsub.f32 0.0, %v1604_v17  ;;  %v1632_v36 = vsub.f32 0.0, %v1608_v28  ;;  %v1525_v42 = vmul.f32 %v1521_v16, %v1505_v18  ;;  %v1561_v62 = vmul.f32 %v1557_v29, %v1505_v18 }
 0x184   :  { %v1490_v53 = vmul.f32 1.5707964, %v3602_v19  ;;  %v1498_v45 = vmul.f32 -4.371139e-08, %v3602_v19  ;;  %v1578_v61 = vmul.f32 0.25, %v3602_v19  ;;  %vm1593_vm4 = vcmp.eq.f32.partialorder %v1589_v22, 1.0 }
 0x185   :  { %v1620_v12 = vsel %vm1612_vm2, %v1616_v3, %v1604_v17  ;;  %v1636_v2 = vsel %vm1628_vm3, %v1632_v36, %v1608_v28  ;;  %v1529_v58 = vadd.f32 -0.16666667, %v1525_v42  ;;  %v1565_v27 = vadd.f32 -0.5, %v1561_v62 }
 0x186   :  { %v1648_v6 = vmul.f32 %v1644_v25, %v1620_v12  ;;  %v1656_v41 = vmul.f32 %v1652_v40, %v1636_v2  ;;  %v1494_v57 = vsub.f32 %v3590_v15, %v1490_v53  ;;  %vm1597_vm5 = vcmp.eq.f32.partialorder %v1589_v22, 3.0 }
 0x187   :  { %v1533_v55 = vmul.f32 %v1529_v58, %v1505_v18  ;;  %v1569_v21 = vmul.f32 %v1565_v27, %v1505_v18  ;;  %v1680_v59 = vmul.f32 0.63661975, %v3607_v13  ;;  %v1665_v54 = vmul.f32 0.194704, %v3397_v5  ;;  %vm1601_vm6 = vmor %vm1593_vm4, %vm1597_vm5 }
 0x188   :  { %v1660_v32 = vsub.f32 %v1648_v6, %v1656_v41  ;;  %v3620_v56 = vsub.f32 %v1494_v57, %v1498_v45  ;;  %v1582_v30 = vfloor.f32 %v1578_v61  ;;  %v3623_v10 = vmul.f32 2.4645882, %v2396_v8 }
 0x189   :  { %v1537_v50 = vadd.f32 1.0, %v1533_v55  ;;  %v1573_v52 = vadd.f32 1.0, %v1569_v21  ;;  %v1684_v51 = vadd.f32 0.5, %v1680_v59  ;;  %vm1625_vm7 = vcmp.eq.f32.partialorder %v1589_v22, 2.0 }
 0x18a   :  { %v1668_v38 = vmul.f32 %v3562_v11, %v1660_v32  ;;  %v1506_v18 = vmul.f32 %v3620_v56, %v3620_v56  ;;  %v3630_v44 = vmul.f32 0.194704, %v3408_v4  ;;  %v1646_v20 = vsub.f32 3.0, %v3614_v31  ;;  %vm1629_vm9 = vmor %vm1593_vm4, %vm1625_vm7 }
 0x18b   :  { %v1541_v39 = vmul.f32 %v1537_v50, %v3575_v1  ;;  %v1688_v24 = vfloor.f32 %v1684_v51  ;;  %v1681_v35 = vmul.f32 0.63661975, %v3623_v10  ;;  %vm1613_vm8 = vcmp.ge.f32.partialorder %v1589_v22, 2.0 }
 0x18c   :  { %1673 = vst [vmem:[#allocation5 + $0x168] sm:$0xff] %v1668_v38  ;;  %v1510_v0 = vmul.f32 2.7557319e-06, %v1506_v18  ;;  %v1546_v11 = vmul.f32 2.4801588e-05, %v1506_v18  ;;  %v3636_v63 = vmul.f32 3.0, %v3590_v15  ;;  %v3641_v1 = vmul.f32 %v3607_v13, %v3607_v13 }
 0x18d   :  { %v1605_v25 = vsel %vm1601_vm6, %v1573_v52, %v1541_v39  ;;  %v1609_v48 = vsel %vm1601_vm6, %v1541_v39, %v1573_v52  ;;  %v1586_v49 = vmul.f32 4.0, %v1582_v30  ;;  %v1692_v40 = vmul.f32 1.5707964, %v1688_v24 }
 0x18e   :  { %v1617_v46 = vsub.f32 0.0, %v1605_v25  ;;  %v1633_v43 = vsub.f32 0.0, %v1609_v48  ;;  %v1514_v23 = vadd.f32 -0.0001984127, %v1510_v0  ;;  %v1550_v34 = vadd.f32 -0.0013888889, %v1546_v11 }
 0x18f   :  { %v1700_v16 = vmul.f32 -4.371139e-08, %v1688_v24  ;;  %v1780_v29 = vmul.f32 0.25, %v1688_v24  ;;  %v1685_v17 = vadd.f32 0.5, %v1681_v35  ;;  %v1696_v53 = vsub.f32 %v3607_v13, %v1692_v40 }
 0x190   :  { %v1621_v15 = vsel %vm1613_vm8, %v1617_v46, %v1605_v25  ;;  %v1637_v28 = vsel %vm1629_vm9, %v1633_v43, %v1609_v48  ;;  %v1518_v3 = vmul.f32 %v1514_v23, %v1506_v18  ;;  %v1554_v36 = vmul.f32 %v1550_v34, %v1506_v18 }
 0x191   :  { %v1649_v42 = vmul.f32 %v1645_v60, %v1621_v15  ;;  %v1657_v62 = vmul.f32 %v3599_v26, %v1637_v28  ;;  %v1784_v45 = vfloor.f32 %v1780_v29  ;;  %v3649_v2 = vmul.f32 0.105165295, %v3288_v33 }
 0x192   :  { %v1522_v61 = vadd.f32 0.008333334, %v1518_v3  ;;  %v1558_v12 = vadd.f32 0.041666668, %v1554_v36  ;;  %v3651_v58 = vfloor.f32 %v1685_v17  ;;  %v1590_v27 = vsub.f32 %v3602_v19, %v1586_v49 }
 0x193   :  { %v1661_v22 = vsub.f32 %v1649_v42, %v1657_v62  ;;  %v3654_v6 = vsub.f32 %v1696_v53, %v1700_v16  ;;  %v1848_v37 = vsub.f32 3.0, %v3641_v1  ;;  %v1788_v26 = vmul.f32 4.0, %v1784_v45 }
 0x194   :  { %v1526_v60 = vmul.f32 %v1522_v61, %v1506_v18  ;;  %v1562_v41 = vmul.f32 %v1558_v12, %v1506_v18  ;;  %v1693_v57 = vmul.f32 1.5707964, %v3651_v58  ;;  %v1701_v59 = vmul.f32 -4.371139e-08, %v3651_v58 }
 0x195   :  { %v1669_v55 = vmul.f32 %v1665_v54, %v1661_v22  ;;  %v1708_v21 = vmul.f32 %v3654_v6, %v3654_v6  ;;  %v1781_v32 = vmul.f32 0.25, %v3651_v58  ;;  %v3664_v52 = vmul.f32 2.4645882, %v2398_v9 }
 0x196   :  { %v1530_v30 = vadd.f32 -0.16666667, %v1526_v60  ;;  %v1566_v50 = vadd.f32 -0.5, %v1562_v41  ;;  %v1697_v19 = vsub.f32 %v3623_v10, %v1693_v57  ;;  %vm1594_vm10 = vcmp.eq.f32.partialorder %v1590_v27, 1.0 }
 0x197   :  { %1674 = vst [vmem:[#allocation5 + $0x170] sm:$0xff] %v1669_v55  ;;  %v1712_v51 = vmul.f32 2.7557319e-06, %v1708_v21  ;;  %v1748_v38 = vmul.f32 2.4801588e-05, %v1708_v21  ;;  %v3667_v54 = vmul.f32 3.0, %v3607_v13  ;;  %v3669_v0 = vsub.f32 %v1688_v24, %v1788_v26 }
 0x198   :  { %v1534_v39 = vmul.f32 %v1530_v30, %v1506_v18  ;;  %v1570_v35 = vmul.f32 %v1566_v50, %v1506_v18  ;;  %vm1598_vm11 = vcmp.eq.f32.partialorder %v1590_v27, 3.0  ;;  %v3671_v48 = vsub.f32 %v1697_v19, %v1701_v59 }
 0x199   :  { %v1716_v11 = vadd.f32 -0.0001984127, %v1712_v51  ;;  %v1752_v25 = vadd.f32 -0.0013888889, %v1748_v38  ;;  %v3674_v49 = vmul.f32 0.105165295, %v3307_v47  ;;  %v1785_v23 = vfloor.f32 %v1781_v32  ;;  %vm1602_vm12 = vmor %vm1594_vm10, %vm1598_vm11 }
 0x19a   :  { %v1538_v46 = vadd.f32 1.0, %v1534_v39  ;;  %v1574_v43 = vadd.f32 1.0, %v1570_v35  ;;  %v1682_v34 = vmul.f32 0.63661975, %v3664_v52  ;;  %vm1626_vm13 = vcmp.eq.f32.partialorder %v1590_v27, 2.0 }
 0x19b   :  { %v1720_v13 = vmul.f32 %v1716_v11, %v1708_v21  ;;  %v1756_v18 = vmul.f32 %v1752_v25, %v1708_v21  ;;  %v3680_v24 = vmul.f32 %v3671_v48, %v3671_v48  ;;  %vm1614_vm14 = vcmp.ge.f32.partialorder %v1590_v27, 2.0  ;;  %vm1630_vm0 = vmor %vm1594_vm10, %vm1626_vm13 }
 0x19c   :  { %v1542_v40 = vmul.f32 %v1538_v46, %v3620_v56  ;;  %vm1796_vm15 = vcmp.eq.f32.partialorder %v3669_v0, 1.0  ;;  %v1686_v16 = vadd.f32 0.5, %v1682_v34  ;;  %v3687_v28 = vmul.f32 %v3623_v10, %v3623_v10 }
 0x19d   :  { %v1724_v29 = vadd.f32 0.008333334, %v1720_v13  ;;  %v1760_v17 = vadd.f32 0.041666668, %v1756_v18  ;;  %v1713_v15 = vmul.f32 2.7557319e-06, %v3680_v24  ;;  %v3719_v34 = vmul.f32 %v3664_v52, %v3664_v52 }
 0x19e   :  { %v1606_v3 = vsel %vm1602_vm12, %v1574_v43, %v1542_v40  ;;  %v1610_v36 = vsel %vm1602_vm12, %v1542_v40, %v1574_v43  ;;  %v1749_v42 = vmul.f32 2.4801588e-05, %v3680_v24  ;;  %v1789_v62 = vmul.f32 4.0, %v1785_v23 }
 0x19f   :  { %v1618_v56 = vsub.f32 0.0, %v1606_v3  ;;  %v1634_v53 = vsub.f32 0.0, %v1610_v36  ;;  %v1728_v45 = vmul.f32 %v1724_v29, %v1708_v21  ;;  %v1764_v61 = vmul.f32 %v1760_v17, %v1708_v21 }
 0x1a0   :  { %vm1800_vm1 = vcmp.eq.f32.partialorder %v3669_v0, 3.0  ;;  %v1717_v12 = vadd.f32 -0.0001984127, %v1713_v15  ;;  %v1753_v22 = vadd.f32 -0.0013888889, %v1749_v42  ;;  %v3692_v60 = vfloor.f32 %v1686_v16 }
 0x1a1   :  { %v1622_v41 = vsel %vm1614_vm14, %v1618_v56, %v1606_v3  ;;  %v1638_v26 = vsel %vm1630_vm0, %v1634_v53, %v1610_v36  ;;  %v1732_v57 = vadd.f32 -0.16666667, %v1728_v45  ;;  %v1768_v55 = vadd.f32 -0.5, %v1764_v61  ;;  %vm1804_vm4 = vmor %vm1796_vm15, %vm1800_vm1 }
 0x1a2   :  { %v1650_v59 = vmul.f32 %v1646_v20, %v1622_v41  ;;  %v1658_v32 = vmul.f32 %v3636_v63, %v1638_v26  ;;  %v1721_v30 = vmul.f32 %v1717_v12, %v3680_v24  ;;  %v1757_v50 = vmul.f32 %v1753_v22, %v3680_v24 }
 0x1a3   :  { %v1736_v19 = vmul.f32 %v1732_v57, %v1708_v21  ;;  %v1772_v51 = vmul.f32 %v1768_v55, %v1708_v21  ;;  %vm1816_vm2 = vcmp.ge.f32.partialorder %v3669_v0, 2.0  ;;  %v3702_v38 = vsub.f32 %v3651_v58, %v1789_v62 }
 0x1a4   :  { %v1662_v27 = vsub.f32 %v1650_v59, %v1658_v32  ;;  %v1725_v39 = vadd.f32 0.008333334, %v1721_v30  ;;  %v1761_v35 = vadd.f32 0.041666668, %v1757_v50  ;;  %v1694_v11 = vmul.f32 1.5707964, %v3692_v60 }
 0x1a5   :  { %v1740_v31 = vadd.f32 1.0, %v1736_v19  ;;  %v1776_v20 = vadd.f32 1.0, %v1772_v51  ;;  %vm1828_vm3 = vcmp.eq.f32.partialorder %v3669_v0, 2.0  ;;  %v1702_v63 = vmul.f32 -4.371139e-08, %v3692_v60 }
 0x1a6   :  { %v1670_v25 = vmul.f32 %v3630_v44, %v1662_v27  ;;  %v1729_v58 = vmul.f32 %v1725_v39, %v3680_v24  ;;  %v1765_v21 = vmul.f32 %v1761_v35, %v3680_v24  ;;  %v1698_v46 = vsub.f32 %v3664_v52, %v1694_v11  ;;  %vm1832_vm6 = vmor %vm1796_vm15, %vm1828_vm3 }
 0x1a7   :  { %v1744_v43 = vmul.f32 %v1740_v31, %v3654_v6  ;;  %v1782_v23 = vmul.f32 0.25, %v3692_v60  ;;  %v3722_v44 = vmul.f32 2.4645882, %v2405_v14  ;;  %vm1797_vm5 = vcmp.eq.f32.partialorder %v3702_v38, 1.0 }
 0x1a8   :  { %1675 = vst [vmem:[#allocation5 + $0x178] sm:$0xff] %v1670_v25  ;;  %v1733_v13 = vadd.f32 -0.16666667, %v1729_v58  ;;  %v1769_v18 = vadd.f32 -0.5, %v1765_v21  ;;  %v3725_v40 = vsub.f32 %v1698_v46, %v1702_v63  ;;  %vm1801_vm7 = vcmp.eq.f32.partialorder %v3702_v38, 3.0 }
 0x1a9   :  { %v1808_v16 = vsel %vm1804_vm4, %v1776_v20, %v1744_v43  ;;  %v1812_v29 = vsel %vm1804_vm4, %v1744_v43, %v1776_v20  ;;  %v1683_v6 = vmul.f32 0.63661975, %v3722_v44  ;;  %vm1829_vm8 = vcmp.eq.f32.partialorder %v3702_v38, 2.0  ;;  %vm1805_vm9 = vmor %vm1797_vm5, %vm1801_vm7 }
 0x1aa   :  { %v1820_v17 = vsub.f32 0.0, %v1808_v16  ;;  %v1836_v15 = vsub.f32 0.0, %v1812_v29  ;;  %v1737_v3 = vmul.f32 %v1733_v13, %v3680_v24  ;;  %v1773_v36 = vmul.f32 %v1769_v18, %v3680_v24  ;;  %vm1833_vm11 = vmor %vm1797_vm5, %vm1829_vm8 }
 0x1ab   :  { %v3738_v42 = vmul.f32 %v3725_v40, %v3725_v40  ;;  %v1786_v62 = vfloor.f32 %v1782_v23  ;;  %v1687_v56 = vadd.f32 0.5, %v1683_v6  ;;  %v1849_v57 = vsub.f32 3.0, %v3687_v28 }
 0x1ac   :  { %v1824_v53 = vsel %vm1816_vm2, %v1820_v17, %v1808_v16  ;;  %v1840_v45 = vsel %vm1832_vm6, %v1836_v15, %v1812_v29  ;;  %v1741_v61 = vadd.f32 1.0, %v1737_v3  ;;  %v1777_v12 = vadd.f32 1.0, %v1773_v36 }
 0x1ad   :  { %v1852_v22 = vmul.f32 %v1848_v37, %v1824_v53  ;;  %v1860_v41 = vmul.f32 %v3667_v54, %v1840_v45  ;;  %v1714_v24 = vmul.f32 2.7557319e-06, %v3738_v42  ;;  %v1750_v26 = vmul.f32 2.4801588e-05, %v3738_v42 }
 0x1ae   :  { %v1745_v0 = vmul.f32 %v1741_v61, %v3671_v48  ;;  %v1857_v55 = vmul.f32 3.0, %v3623_v10  ;;  %v1850_v1 = vsub.f32 3.0, %v3719_v34  ;;  %v1790_v32 = vmul.f32 4.0, %v1786_v62 }
 0x1af   :  { %v1864_v37 = vsub.f32 %v1852_v22, %v1860_v41  ;;  %v1718_v59 = vadd.f32 -0.0001984127, %v1714_v24  ;;  %v1754_v54 = vadd.f32 -0.0013888889, %v1750_v26  ;;  %vm1817_vm10 = vcmp.ge.f32.partialorder %v3702_v38, 2.0 }
 0x1b0   :  { %v1809_v30 = vsel %vm1805_vm9, %v1777_v12, %v1745_v0  ;;  %v1813_v50 = vsel %vm1805_vm9, %v1745_v0, %v1777_v12  ;;  %v1691_v48 = vfloor.f32 %v1687_v56  ;;  %v1794_v25 = vsub.f32 %v3692_v60, %v1790_v32 }
 0x1b1   :  { %v1872_v28 = vmul.f32 %v3649_v2, %v1864_v37  ;;  %v1821_v19 = vsub.f32 0.0, %v1809_v30  ;;  %v1837_v10 = vsub.f32 0.0, %v1813_v50  ;;  %v1722_v51 = vmul.f32 %v1718_v59, %v3738_v42 }
 0x1b2   :  { %v1758_v27 = vmul.f32 %v1754_v54, %v3738_v42  ;;  %v1695_v39 = vmul.f32 1.5707964, %v1691_v48  ;;  %v1703_v35 = vmul.f32 -4.371139e-08, %v1691_v48  ;;  %v1783_v11 = vmul.f32 0.25, %v1691_v48 }
 0x1b3   :  { %1877 = vst [vmem:[#allocation5 + $0x180] sm:$0xff] %v1872_v28  ;;  %v1825_v31 = vsel %vm1817_vm10, %v1821_v19, %v1809_v30  ;;  %v1841_v20 = vsel %vm1833_vm11, %v1837_v10, %v1813_v50  ;;  %v1726_v63 = vadd.f32 0.008333334, %v1722_v51  ;;  %v1858_v43 = vmul.f32 3.0, %v3664_v52 }
 0x1b4   :  { %v1853_v38 = vmul.f32 %v1849_v57, %v1825_v31  ;;  %v1861_v58 = vmul.f32 %v1857_v55, %v1841_v20  ;;  %v1762_v21 = vadd.f32 0.041666668, %v1758_v27  ;;  %v1699_v2 = vsub.f32 %v3722_v44, %v1695_v39 }
 0x1b5   :  { %v1730_v46 = vmul.f32 %v1726_v63, %v3738_v42  ;;  %v1787_v23 = vfloor.f32 %v1783_v11  ;;  %v3768_v13 = vmul.f32 3.1029205, %v2394_v7  ;;  %v3774_v60 = vmul.f32 3.1029205, %v2396_v8 }
 0x1b6   :  { %v1865_v18 = vsub.f32 %v1853_v38, %v1861_v58  ;;  %v1766_v16 = vmul.f32 %v1762_v21, %v3738_v42  ;;  %v3771_v29 = vsub.f32 %v1699_v2, %v1703_v35  ;;  %v3777_v17 = vmul.f32 0.105165295, %v3397_v5 }
 0x1b7   :  { %v1734_v6 = vadd.f32 -0.16666667, %v1730_v46  ;;  %v3781_v15 = vmul.f32 %v3722_v44, %v3722_v44  ;;  %v1885_v52 = vmul.f32 0.63661975, %v3768_v13  ;;  %vm1798_vm12 = vcmp.eq.f32.partialorder %v1794_v25, 1.0 }
 0x1b8   :  { %v1873_v3 = vmul.f32 %v3674_v49, %v1865_v18  ;;  %v1770_v36 = vadd.f32 -0.5, %v1766_v16  ;;  %v1711_v62 = vmul.f32 %v3771_v29, %v3771_v29  ;;  %vm1802_vm13 = vcmp.eq.f32.partialorder %v1794_v25, 3.0 }
 0x1b9   :  { %v1738_v56 = vmul.f32 %v1734_v6, %v3738_v42  ;;  %v1791_v53 = vmul.f32 4.0, %v1787_v23  ;;  %v1889_v45 = vadd.f32 0.5, %v1885_v52  ;;  %v1886_v41 = vmul.f32 0.63661975, %v3774_v60  ;;  %vm1806_vm0 = vmor %vm1798_vm12, %vm1802_vm13 }
 0x1ba   :  { %1878 = vst [vmem:[#allocation5 + $0x188] sm:$0xff] %v1873_v3  ;;  %v1774_v61 = vmul.f32 %v1770_v36, %v3738_v42  ;;  %v1715_v12 = vmul.f32 2.7557319e-06, %v1711_v62  ;;  %v1751_v22 = vmul.f32 2.4801588e-05, %v1711_v62  ;;  %vm1818_vm14 = vcmp.ge.f32.partialorder %v1794_v25, 2.0 }
 0x1bb   :  { %v1742_v24 = vadd.f32 1.0, %v1738_v56  ;;  %vm1830_vm15 = vcmp.eq.f32.partialorder %v1794_v25, 2.0  ;;  %v3791_v49 = vmul.f32 0.105165295, %v3408_v4  ;;  %v1851_v55 = vsub.f32 3.0, %v3781_v15 }
 0x1bc   :  { %v1778_v26 = vadd.f32 1.0, %v1774_v61  ;;  %v1719_v0 = vadd.f32 -0.0001984127, %v1715_v12  ;;  %v1755_v57 = vadd.f32 -0.0013888889, %v1751_v22  ;;  %v3796_v42 = vsub.f32 %v1691_v48, %v1791_v53  ;;  %vm1834_vm1 = vmor %vm1798_vm12, %vm1830_vm15 }
 0x1bd   :  { %v1746_v37 = vmul.f32 %v1742_v24, %v3725_v40  ;;  %v1893_v59 = vfloor.f32 %v1889_v45  ;;  %v1890_v54 = vadd.f32 0.5, %v1886_v41  ;;  %v3799_v50 = vmul.f32 3.0, %v3722_v44 }
 0x1be   :  { %v1723_v32 = vmul.f32 %v1719_v0, %v1711_v62  ;;  %v1759_v30 = vmul.f32 %v1755_v57, %v1711_v62  ;;  %v3803_v28 = vmul.f32 %v3768_v13, %v3768_v13  ;;  %vm1799_vm2 = vcmp.eq.f32.partialorder %v3796_v42, 1.0 }
 0x1bf   :  { %v1810_v19 = vsel %vm1806_vm0, %v1778_v26, %v1746_v37  ;;  %v1814_v10 = vsel %vm1806_vm0, %v1746_v37, %v1778_v26  ;;  %v1897_v51 = vmul.f32 1.5707964, %v1893_v59  ;;  %v1905_v40 = vmul.f32 -4.371139e-08, %v1893_v59 }
 0x1c0   :  { %v1822_v48 = vsub.f32 0.0, %v1810_v19  ;;  %v1838_v27 = vsub.f32 0.0, %v1814_v10  ;;  %v1727_v39 = vadd.f32 0.008333334, %v1723_v32  ;;  %v1763_v35 = vadd.f32 0.041666668, %v1759_v30 }
 0x1c1   :  { %v1901_v44 = vsub.f32 %v3768_v13, %v1897_v51  ;;  %v1985_v11 = vmul.f32 0.25, %v1893_v59  ;;  %v3809_v31 = vfloor.f32 %v1890_v54  ;;  %vm1803_vm3 = vcmp.eq.f32.partialorder %v3796_v42, 3.0 }
 0x1c2   :  { %v1826_v20 = vsel %vm1818_vm14, %v1822_v48, %v1810_v19  ;;  %v1842_v63 = vsel %vm1834_vm1, %v1838_v27, %v1814_v10  ;;  %v1731_v38 = vmul.f32 %v1727_v39, %v1711_v62  ;;  %v1767_v58 = vmul.f32 %v1763_v35, %v1711_v62  ;;  %vm1807_vm4 = vmor %vm1799_vm2, %vm1803_vm3 }
 0x1c3   :  { %v1854_v21 = vmul.f32 %v1850_v1, %v1826_v20  ;;  %v1862_v2 = vmul.f32 %v1858_v43, %v1842_v63  ;;  %v3814_v46 = vsub.f32 %v1901_v44, %v1905_v40  ;;  %v1989_v23 = vfloor.f32 %v1985_v11 }
 0x1c4   :  { %v1735_v18 = vadd.f32 -0.16666667, %v1731_v38  ;;  %v1771_v16 = vadd.f32 -0.5, %v1767_v58  ;;  %v1898_v6 = vmul.f32 1.5707964, %v3809_v31  ;;  %v1986_v52 = vmul.f32 0.25, %v3809_v31 }
 0x1c5   :  { %v1866_v3 = vsub.f32 %v1854_v21, %v1862_v2  ;;  %v1913_v25 = vmul.f32 %v3814_v46, %v3814_v46  ;;  %v1906_v36 = vmul.f32 -4.371139e-08, %v3809_v31  ;;  %v1993_v43 = vmul.f32 4.0, %v1989_v23 }
 0x1c6   :  { %v1739_v34 = vmul.f32 %v1735_v18, %v1711_v62  ;;  %v1775_v1 = vmul.f32 %v1771_v16, %v1711_v62  ;;  %v1902_v56 = vsub.f32 %v3774_v60, %v1898_v6  ;;  %v1990_v12 = vfloor.f32 %v1986_v52 }
 0x1c7   :  { %v1874_v53 = vmul.f32 %v3777_v17, %v1866_v3  ;;  %v1917_v45 = vmul.f32 2.7557319e-06, %v1913_v25  ;;  %v1953_v61 = vmul.f32 2.4801588e-05, %v1913_v25  ;;  %v3825_v24 = vmul.f32 0.06610155, %v3288_v33 }
 0x1c8   :  { %v1743_v22 = vadd.f32 1.0, %v1739_v34  ;;  %v1779_v41 = vadd.f32 1.0, %v1775_v1  ;;  %v3827_v26 = vsub.f32 %v1902_v56, %v1906_v36  ;;  %vm1831_vm5 = vcmp.eq.f32.partialorder %v3796_v42, 2.0 }
 0x1c9   :  { %1879 = vst [vmem:[#allocation5 + $0x190] sm:$0xff] %v1874_v53  ;;  %v1921_v62 = vadd.f32 -0.0001984127, %v1917_v45  ;;  %v1957_v17 = vadd.f32 -0.0013888889, %v1953_v61  ;;  %v3835_v0 = vmul.f32 3.0, %v3768_v13  ;;  %v3842_v19 = vsub.f32 %v1893_v59, %v1993_v43  ;;  %vm1835_vm7 = vmor %vm1799_vm2, %vm1831_vm5 }
 0x1ca   :  { %v1747_v57 = vmul.f32 %v1743_v22, %v3771_v29  ;;  %vm1819_vm6 = vcmp.ge.f32.partialorder %v3796_v42, 2.0  ;;  %v2053_v37 = vsub.f32 3.0, %v3803_v28  ;;  %v1914_v54 = vmul.f32 %v3827_v26, %v3827_v26 }
 0x1cb   :  { %v1925_v32 = vmul.f32 %v1921_v62, %v1913_v25  ;;  %v1961_v30 = vmul.f32 %v1957_v17, %v1913_v25  ;;  %v1994_v10 = vmul.f32 4.0, %v1990_v12  ;;  %v3847_v20 = vmul.f32 3.1029205, %v2398_v9 }
 0x1cc   :  { %v1811_v51 = vsel %vm1807_vm4, %v1779_v41, %v1747_v57  ;;  %v1815_v40 = vsel %vm1807_vm4, %v1747_v57, %v1779_v41  ;;  %v1918_v13 = vmul.f32 2.7557319e-06, %v1914_v54  ;;  %v1954_v48 = vmul.f32 2.4801588e-05, %v1914_v54 }
 0x1cd   :  { %v1823_v29 = vsub.f32 0.0, %v1811_v51  ;;  %v1839_v27 = vsub.f32 0.0, %v1815_v40  ;;  %v1929_v39 = vadd.f32 0.008333334, %v1925_v32  ;;  %v1965_v35 = vadd.f32 0.041666668, %v1961_v30 }
 0x1ce   :  { %v1922_v44 = vadd.f32 -0.0001984127, %v1918_v13  ;;  %v1958_v11 = vadd.f32 -0.0013888889, %v1954_v48  ;;  %vm2001_vm8 = vcmp.eq.f32.partialorder %v3842_v19, 1.0  ;;  %v3857_v52 = vmul.f32 %v3774_v60, %v3774_v60 }
 0x1cf   :  { %v1827_v59 = vsel %vm1819_vm6, %v1823_v29, %v1811_v51  ;;  %v1843_v63 = vsel %vm1835_vm7, %v1839_v27, %v1815_v40  ;;  %v1933_v38 = vmul.f32 %v1929_v39, %v1913_v25  ;;  %v1969_v58 = vmul.f32 %v1965_v35, %v1913_v25 }
 0x1d0   :  { %v1855_v21 = vmul.f32 %v1851_v55, %v1827_v59  ;;  %v1863_v2 = vmul.f32 %v3799_v50, %v1843_v63  ;;  %v1926_v23 = vmul.f32 %v1922_v44, %v1914_v54  ;;  %v1962_v18 = vmul.f32 %v1958_v11, %v1914_v54 }
 0x1d1   :  { %v1937_v16 = vadd.f32 -0.16666667, %v1933_v38  ;;  %v1973_v6 = vadd.f32 -0.5, %v1969_v58  ;;  %v1887_v34 = vmul.f32 0.63661975, %v3847_v20  ;;  %vm2005_vm9 = vcmp.eq.f32.partialorder %v3842_v19, 3.0 }
 0x1d2   :  { %v1867_v42 = vsub.f32 %v1855_v21, %v1863_v2  ;;  %v1930_v3 = vadd.f32 0.008333334, %v1926_v23  ;;  %v1966_v36 = vadd.f32 0.041666668, %v1962_v18  ;;  %v1998_v55 = vsub.f32 %v3809_v31, %v1994_v10  ;;  %vm2009_vm11 = vmor %vm2001_vm8, %vm2005_vm9 }
 0x1d3   :  { %v1941_v1 = vmul.f32 %v1937_v16, %v1913_v25  ;;  %v1977_v15 = vmul.f32 %v1973_v6, %v1913_v25  ;;  %v1891_v53 = vadd.f32 0.5, %v1887_v34  ;;  %vm2033_vm10 = vcmp.eq.f32.partialorder %v3842_v19, 2.0 }
 0x1d4   :  { %v1875_v50 = vmul.f32 %v3791_v49, %v1867_v42  ;;  %v1934_v43 = vmul.f32 %v1930_v3, %v1914_v54  ;;  %v1970_v56 = vmul.f32 %v1966_v36, %v1914_v54  ;;  %v2062_v12 = vmul.f32 3.0, %v3774_v60  ;;  %vm2037_vm15 = vmor %vm2001_vm8, %vm2033_vm10 }
 0x1d5   :  { %v1945_v45 = vadd.f32 1.0, %v1941_v1  ;;  %v1981_v61 = vadd.f32 1.0, %v1977_v15  ;;  %v3867_v41 = vfloor.f32 %v1891_v53  ;;  %v3870_v31 = vmul.f32 3.1029205, %v2405_v14 }
 0x1d6   :  { %1880 = vst [vmem:[#allocation5 + $0x198] sm:$0xff] %v1875_v50  ;;  %v1938_v25 = vadd.f32 -0.16666667, %v1934_v43  ;;  %v1974_v22 = vadd.f32 -0.5, %v1970_v56  ;;  %vm2021_vm12 = vcmp.ge.f32.partialorder %v3842_v19, 2.0  ;;  %vm2002_vm13 = vcmp.eq.f32.partialorder %v1998_v55, 1.0 }
 0x1d7   :  { %v1949_v49 = vmul.f32 %v1945_v45, %v3814_v46  ;;  %vm2006_vm14 = vcmp.eq.f32.partialorder %v1998_v55, 3.0  ;;  %v1899_v60 = vmul.f32 1.5707964, %v3867_v41  ;;  %v1907_v57 = vmul.f32 -4.371139e-08, %v3867_v41 }
 0x1d8   :  { %v1942_v62 = vmul.f32 %v1938_v25, %v1914_v54  ;;  %v1978_v17 = vmul.f32 %v1974_v22, %v1914_v54  ;;  %v1987_v10 = vmul.f32 0.25, %v3867_v41  ;;  %v1888_v46 = vmul.f32 0.63661975, %v3870_v31  ;;  %vm2010_vm0 = vmor %vm2002_vm13, %vm2006_vm14 }
 0x1d9   :  { %v2013_v32 = vsel %vm2009_vm11, %v1981_v61, %v1949_v49  ;;  %v2017_v30 = vsel %vm2009_vm11, %v1949_v49, %v1981_v61  ;;  %vm2034_vm1 = vcmp.eq.f32.partialorder %v1998_v55, 2.0  ;;  %v2074_v54 = vmul.f32 0.06610155, %v3307_v47 }
 0x1da   :  { %v2025_v51 = vsub.f32 0.0, %v2013_v32  ;;  %v2041_v40 = vsub.f32 0.0, %v2017_v30  ;;  %v1946_v13 = vadd.f32 1.0, %v1942_v62  ;;  %v1982_v48 = vadd.f32 1.0, %v1978_v17  ;;  %vm2038_vm3 = vmor %vm2002_vm13, %vm2034_vm1 }
 0x1db   :  { %v1903_v29 = vsub.f32 %v3847_v20, %v1899_v60  ;;  %v1892_v27 = vadd.f32 0.5, %v1888_v46  ;;  %v2054_v11 = vsub.f32 3.0, %v3857_v52  ;;  %vm2022_vm2 = vcmp.ge.f32.partialorder %v1998_v55, 2.0 }
 0x1dc   :  { %v2029_v39 = vsel %vm2021_vm12, %v2025_v51, %v2013_v32  ;;  %v2045_v35 = vsel %vm2037_vm15, %v2041_v40, %v2017_v30  ;;  %v1950_v44 = vmul.f32 %v1946_v13, %v3827_v26  ;;  %v1991_v2 = vfloor.f32 %v1987_v10 }
 0x1dd   :  { %v2057_v59 = vmul.f32 %v2053_v37, %v2029_v39  ;;  %v2065_v63 = vmul.f32 %v3835_v0, %v2045_v35  ;;  %v3892_v38 = vsub.f32 %v1903_v29, %v1907_v57  ;;  %v3895_v19 = vfloor.f32 %v1892_v27 }
 0x1de   :  { %v2014_v58 = vsel %vm2010_vm0, %v1982_v48, %v1950_v44  ;;  %v2018_v21 = vsel %vm2010_vm0, %v1950_v44, %v1982_v48  ;;  %v3901_v28 = vmul.f32 %v3847_v20, %v3847_v20  ;;  %v3906_v6 = vmul.f32 3.7378073, %v2394_v7 }
 0x1df   :  { %v2069_v23 = vsub.f32 %v2057_v59, %v2065_v63  ;;  %v2026_v18 = vsub.f32 0.0, %v2014_v58  ;;  %v2042_v26 = vsub.f32 0.0, %v2018_v21  ;;  %v1915_v16 = vmul.f32 %v3892_v38, %v3892_v38 }
 0x1e0   :  { %v1900_v0 = vmul.f32 1.5707964, %v3895_v19  ;;  %v1908_v37 = vmul.f32 -4.371139e-08, %v3895_v19  ;;  %v1988_v50 = vmul.f32 0.25, %v3895_v19  ;;  %v1995_v56 = vmul.f32 4.0, %v1991_v2 }
 0x1e1   :  { %v2077_v52 = vmul.f32 %v3825_v24, %v2069_v23  ;;  %v2030_v42 = vsel %vm2022_vm2, %v2026_v18, %v2014_v58  ;;  %v2046_v3 = vsel %vm2038_vm3, %v2042_v26, %v2018_v21  ;;  %v1919_v36 = vmul.f32 2.7557319e-06, %v1915_v16 }
 0x1e2   :  { %v2058_v34 = vmul.f32 %v2054_v11, %v2030_v42  ;;  %v2066_v1 = vmul.f32 %v2062_v12, %v2046_v3  ;;  %v1955_v15 = vmul.f32 2.4801588e-05, %v1915_v16  ;;  %v3912_v53 = vmul.f32 3.0, %v3847_v20 }
 0x1e3   :  { %2082 = vst [vmem:[#allocation5 + $0x1a0] sm:$0xff] %v2077_v52  ;;  %v1923_v43 = vadd.f32 -0.0001984127, %v1919_v36  ;;  %v2055_v61 = vsub.f32 3.0, %v3901_v28  ;;  %v1904_v24 = vsub.f32 %v3870_v31, %v1900_v0  ;;  %v3917_v25 = vmul.f32 0.06610155, %v3397_v5 }
 0x1e4   :  { %v2070_v45 = vsub.f32 %v2058_v34, %v2066_v1  ;;  %v1959_v7 = vadd.f32 -0.0013888889, %v1955_v15  ;;  %v3921_v12 = vmul.f32 %v3870_v31, %v3870_v31  ;;  %v2090_v22 = vmul.f32 0.63661975, %v3906_v6 }
 0x1e5   :  { %v1927_v55 = vmul.f32 %v1923_v43, %v1915_v16  ;;  %v3924_v20 = vsub.f32 %v1904_v24, %v1908_v37  ;;  %v1992_v17 = vfloor.f32 %v1988_v50  ;;  %v3927_v57 = vsub.f32 %v3867_v41, %v1995_v56 }
 0x1e6   :  { %v2078_v49 = vmul.f32 %v2074_v54, %v2070_v45  ;;  %v1963_v62 = vmul.f32 %v1959_v7, %v1915_v16  ;;  %v2094_v32 = vadd.f32 0.5, %v2090_v22  ;;  %v3930_v30 = vmul.f32 3.7378073, %v2396_v8 }
 0x1e7   :  { %v1931_v60 = vadd.f32 0.008333334, %v1927_v55  ;;  %v1916_v46 = vmul.f32 %v3924_v20, %v3924_v20  ;;  %v3935_v51 = vmul.f32 3.0, %v3870_v31  ;;  %v3938_v40 = vmul.f32 0.06610155, %v3408_v4 }
 0x1e8   :  { %2083 = vst [vmem:[#allocation5 + $0x1a8] sm:$0xff] %v2078_v49  ;;  %v1967_v10 = vadd.f32 0.041666668, %v1963_v62  ;;  %v2056_v48 = vsub.f32 3.0, %v3921_v12  ;;  %v3941_v41 = vfloor.f32 %v2094_v32  ;;  %v2091_v54 = vmul.f32 0.63661975, %v3930_v30 }
 0x1e9   :  { %v1935_v13 = vmul.f32 %v1931_v60, %v1915_v16  ;;  %v1920_v29 = vmul.f32 2.7557319e-06, %v1916_v46  ;;  %v1956_v27 = vmul.f32 2.4801588e-05, %v1916_v46  ;;  %v1996_v39 = vmul.f32 4.0, %v1992_v17 }
 0x1ea   :  { %v1971_v8 = vmul.f32 %v1967_v10, %v1915_v16  ;;  %vm2003_vm4 = vcmp.eq.f32.partialorder %v3927_v57, 1.0  ;;  %vm2007_vm5 = vcmp.eq.f32.partialorder %v3927_v57, 3.0  ;;  %vm2023_vm6 = vcmp.ge.f32.partialorder %v3927_v57, 2.0 }
 0x1eb   :  { %v1939_v35 = vadd.f32 -0.16666667, %v1935_v13  ;;  %v1924_v44 = vadd.f32 -0.0001984127, %v1920_v29  ;;  %v1960_v11 = vadd.f32 -0.0013888889, %v1956_v27  ;;  %v3951_v0 = vsub.f32 %v3895_v19, %v1996_v39  ;;  %vm2011_vm7 = vmor %vm2003_vm4, %vm2007_vm5 }
 0x1ec   :  { %v1975_v31 = vadd.f32 -0.5, %v1971_v8  ;;  %v2190_v59 = vmul.f32 0.25, %v3941_v41  ;;  %v2102_v58 = vmul.f32 1.5707964, %v3941_v41  ;;  %v2110_v21 = vmul.f32 -4.371139e-08, %v3941_v41 }
 0x1ed   :  { %v1943_v63 = vmul.f32 %v1939_v35, %v1915_v16  ;;  %v2095_v2 = vadd.f32 0.5, %v2091_v54  ;;  %v1928_v18 = vmul.f32 %v1924_v44, %v1916_v46  ;;  %v1964_v26 = vmul.f32 %v1960_v11, %v1916_v46 }
 0x1ee   :  { %v1979_v23 = vmul.f32 %v1975_v31, %v1915_v16  ;;  %v2106_v52 = vsub.f32 %v3906_v6, %v2102_v58  ;;  %v2194_v42 = vfloor.f32 %v2190_v59  ;;  %vm2035_vm8 = vcmp.eq.f32.partialorder %v3927_v57, 2.0 }
 0x1ef   :  { %v1947_v37 = vadd.f32 1.0, %v1943_v63  ;;  %v3954_v3 = vfloor.f32 %v2095_v2  ;;  %v1932_v16 = vadd.f32 0.008333334, %v1928_v18  ;;  %v1968_v34 = vadd.f32 0.041666668, %v1964_v26  ;;  %vm2039_vm11 = vmor %vm2003_vm4, %vm2035_vm8 }
 0x1f0   :  { %v1983_v36 = vadd.f32 1.0, %v1979_v23  ;;  %v3962_v19 = vsub.f32 %v2106_v52, %v2110_v21  ;;  %v3966_v15 = vmul.f32 %v3906_v6, %v3906_v6  ;;  %vm2004_vm9 = vcmp.eq.f32.partialorder %v3951_v0, 1.0 }
 0x1f1   :  { %v1951_v1 = vmul.f32 %v1947_v37, %v3892_v38  ;;  %v2103_v50 = vmul.f32 1.5707964, %v3954_v3  ;;  %v1936_v43 = vmul.f32 %v1932_v16, %v1916_v46  ;;  %v1972_v56 = vmul.f32 %v1968_v34, %v1916_v46 }
 0x1f2   :  { %vm2008_vm10 = vcmp.eq.f32.partialorder %v3951_v0, 3.0  ;;  %v2118_v38 = vmul.f32 %v3962_v19, %v3962_v19  ;;  %v2198_v24 = vmul.f32 4.0, %v2194_v42  ;;  %v2111_v10 = vmul.f32 -4.371139e-08, %v3954_v3 }
 0x1f3   :  { %v2015_v45 = vsel %vm2011_vm7, %v1983_v36, %v1951_v1  ;;  %v2019_v7 = vsel %vm2011_vm7, %v1951_v1, %v1983_v36  ;;  %v1940_v49 = vadd.f32 -0.16666667, %v1936_v43  ;;  %v1976_v62 = vadd.f32 -0.5, %v1972_v56  ;;  %vm2012_vm13 = vmor %vm2004_vm9, %vm2008_vm10 }
 0x1f4   :  { %v2027_v55 = vsub.f32 0.0, %v2015_v45  ;;  %v2043_v22 = vsub.f32 0.0, %v2019_v7  ;;  %v2122_v17 = vmul.f32 2.7557319e-06, %v2118_v38  ;;  %v2158_v60 = vmul.f32 2.4801588e-05, %v2118_v38 }
 0x1f5   :  { %v2107_v32 = vsub.f32 %v3930_v30, %v2103_v50  ;;  %v1944_v8 = vmul.f32 %v1940_v49, %v1916_v46  ;;  %v1980_v29 = vmul.f32 %v1976_v62, %v1916_v46  ;;  %vm2036_vm12 = vcmp.eq.f32.partialorder %v3951_v0, 2.0 }
 0x1f6   :  { %v2031_v13 = vsel %vm2023_vm6, %v2027_v55, %v2015_v45  ;;  %v2047_v54 = vsel %vm2039_vm11, %v2043_v22, %v2019_v7  ;;  %v2126_v35 = vadd.f32 -0.0001984127, %v2122_v17  ;;  %v2162_v31 = vadd.f32 -0.0013888889, %v2158_v60  ;;  %vm2040_vm15 = vmor %vm2004_vm9, %vm2036_vm12 }
 0x1f7   :  { %v2059_v27 = vmul.f32 %v2055_v61, %v2031_v13  ;;  %v2067_v39 = vmul.f32 %v3912_v53, %v2047_v54  ;;  %v1948_v44 = vadd.f32 1.0, %v1944_v8  ;;  %v1984_v11 = vadd.f32 1.0, %v1980_v29 }
 0x1f8   :  { %v2191_v59 = vmul.f32 0.25, %v3954_v3  ;;  %v2130_v57 = vmul.f32 %v2126_v35, %v2118_v38  ;;  %v2166_v46 = vmul.f32 %v2162_v31, %v2118_v38  ;;  %v3988_v28 = vsub.f32 %v2107_v32, %v2111_v10 }
 0x1f9   :  { %v2071_v63 = vsub.f32 %v2059_v27, %v2067_v39  ;;  %v1952_v53 = vmul.f32 %v1948_v44, %v3924_v20  ;;  %vm2024_vm14 = vcmp.ge.f32.partialorder %v3951_v0, 2.0  ;;  %v3993_v61 = vsub.f32 %v3941_v41, %v2198_v24 }
 0x1fa   :  { %v3996_v58 = vmul.f32 3.7378073, %v2398_v9  ;;  %v2134_v2 = vadd.f32 0.008333334, %v2130_v57  ;;  %v2170_v23 = vadd.f32 0.041666668, %v2166_v46  ;;  %v4001_v18 = vmul.f32 %v3988_v28, %v3988_v28 }
 0x1fb   :  { %v2079_v21 = vmul.f32 %v3917_v25, %v2071_v63  ;;  %v2016_v26 = vsel %vm2012_vm13, %v1984_v11, %v1952_v53  ;;  %v2020_v37 = vsel %vm2012_vm13, %v1952_v53, %v1984_v11  ;;  %v2195_v20 = vfloor.f32 %v2191_v59 }
 0x1fc   :  { %v2092_v41 = vmul.f32 0.63661975, %v3996_v58  ;;  %v2028_v9 = vsub.f32 0.0, %v2016_v26  ;;  %v2044_v52 = vsub.f32 0.0, %v2020_v37  ;;  %v2138_v25 = vmul.f32 %v2134_v2, %v2118_v38 }
 0x1fd   :  { %2084 = vst [vmem:[#allocation5 + $0x1b0] sm:$0xff] %v2079_v21  ;;  %v2174_v42 = vmul.f32 %v2170_v23, %v2118_v38  ;;  %vm2206_vm0 = vcmp.eq.f32.partialorder %v3993_v61, 1.0  ;;  %v2123_v36 = vmul.f32 2.7557319e-06, %v4001_v18  ;;  %v2159_v16 = vmul.f32 2.4801588e-05, %v4001_v18 }
 0x1fe   :  { %v2096_v34 = vadd.f32 0.5, %v2092_v41  ;;  %v2032_v1 = vsel %vm2024_vm14, %v2028_v9, %v2016_v26  ;;  %v2048_v50 = vsel %vm2040_vm15, %v2044_v52, %v2020_v37  ;;  %v2142_v43 = vadd.f32 -0.16666667, %v2138_v25 }
 0x1ff   :  { %v2178_v56 = vadd.f32 -0.5, %v2174_v42  ;;  %v2060_v45 = vmul.f32 %v2056_v48, %v2032_v1  ;;  %v2068_v7 = vmul.f32 %v3935_v51, %v2048_v50  ;;  %v2127_v24 = vadd.f32 -0.0001984127, %v2123_v36 }
 0x200   :  { %v2163_v55 = vadd.f32 -0.0013888889, %v2159_v16  ;;  %v2146_v22 = vmul.f32 %v2142_v43, %v2118_v38  ;;  %vm2210_vm1 = vcmp.eq.f32.partialorder %v3993_v61, 3.0  ;;  %v2199_v62 = vmul.f32 4.0, %v2195_v20 }
 0x201   :  { %v2182_v49 = vmul.f32 %v2178_v56, %v2118_v38  ;;  %v2072_v17 = vsub.f32 %v2060_v45, %v2068_v7  ;;  %v2266_v60 = vmul.f32 3.0, %v3906_v6  ;;  %v2131_v0 = vmul.f32 %v2127_v24, %v4001_v18  ;;  %vm2214_vm2 = vmor %vm2206_vm0, %vm2210_vm1 }
 0x202   :  { %v2167_v32 = vmul.f32 %v2163_v55, %v4001_v18  ;;  %v2150_v10 = vadd.f32 1.0, %v2146_v22  ;;  %v2258_v12 = vsub.f32 3.0, %v3966_v15  ;;  %v4021_v48 = vfloor.f32 %v2096_v34 }
 0x203   :  { %v2186_v13 = vadd.f32 1.0, %v2182_v49  ;;  %v2080_v51 = vmul.f32 %v3938_v40, %v2072_v17  ;;  %vm2238_vm3 = vcmp.eq.f32.partialorder %v3993_v61, 2.0  ;;  %v2135_v38 = vadd.f32 0.008333334, %v2131_v0 }
 0x204   :  { %v2171_v54 = vadd.f32 0.041666668, %v2167_v32  ;;  %v2154_v6 = vmul.f32 %v2150_v10, %v3962_v19  ;;  %v2203_v8 = vsub.f32 %v3954_v3, %v2199_v62  ;;  %v2104_v29 = vmul.f32 1.5707964, %v4021_v48  ;;  %vm2242_vm5 = vmor %vm2206_vm0, %vm2238_vm3 }
 0x205   :  { %v2112_v27 = vmul.f32 -4.371139e-08, %v4021_v48  ;;  %2085 = vst [vmem:[#allocation5 + $0x1b8] sm:$0xff] %v2080_v51  ;;  %vm2226_vm4 = vcmp.ge.f32.partialorder %v3993_v61, 2.0  ;;  %v2139_v40 = vmul.f32 %v2135_v38, %v4001_v18  ;;  %v2255_v39 = vmul.f32 %v3930_v30, %v3930_v30 }
 0x206   :  { %v2175_v15 = vmul.f32 %v2171_v54, %v4001_v18  ;;  %v2218_v35 = vsel %vm2214_vm2, %v2186_v13, %v2154_v6  ;;  %v2222_v31 = vsel %vm2214_vm2, %v2154_v6, %v2186_v13  ;;  %v2108_v3 = vsub.f32 %v3996_v58, %v2104_v29 }
 0x207   :  { %v2192_v19 = vmul.f32 0.25, %v4021_v48  ;;  %v2230_v44 = vsub.f32 0.0, %v2218_v35  ;;  %v2246_v11 = vsub.f32 0.0, %v2222_v31  ;;  %v2143_v59 = vadd.f32 -0.16666667, %v2139_v40 }
 0x208   :  { %v2179_v63 = vadd.f32 -0.5, %v2175_v15  ;;  %vm2207_vm6 = vcmp.eq.f32.partialorder %v2203_v8, 1.0  ;;  %vm2211_vm7 = vcmp.eq.f32.partialorder %v2203_v8, 3.0  ;;  %v4040_v57 = vsub.f32 %v2108_v3, %v2112_v27 }
 0x209   :  { %v4043_v46 = vmul.f32 3.7378073, %v2405_v14  ;;  %v2234_v53 = vsel %vm2226_vm4, %v2230_v44, %v2218_v35  ;;  %v2250_v21 = vsel %vm2242_vm5, %v2246_v11, %v2222_v31  ;;  %v2147_v2 = vmul.f32 %v2143_v59, %v4001_v18  ;;  %vm2215_vm8 = vmor %vm2207_vm6, %vm2211_vm7 }
 0x20a   :  { %v2183_v23 = vmul.f32 %v2179_v63, %v4001_v18  ;;  %v2262_v26 = vmul.f32 %v2258_v12, %v2234_v53  ;;  %v2270_v37 = vmul.f32 %v2266_v60, %v2250_v21  ;;  %v2278_v20 = vmul.f32 0.04546416, %v3288_v33 }
 0x20b   :  { %v2120_v41 = vmul.f32 %v4040_v57, %v4040_v57  ;;  %v2151_v9 = vadd.f32 1.0, %v2147_v2  ;;  %v2196_v25 = vfloor.f32 %v2192_v19  ;;  %v2093_v14 = vmul.f32 0.63661975, %v4043_v46 }
 0x20c   :  { %v2187_v52 = vadd.f32 1.0, %v2183_v23  ;;  %v2274_v42 = vsub.f32 %v2262_v26, %v2270_v37  ;;  %vm2239_vm9 = vcmp.eq.f32.partialorder %v2203_v8, 2.0  ;;  %v2259_v16 = vsub.f32 3.0, %v2255_v39 }
 0x20d   :  { %v2124_v61 = vmul.f32 2.7557319e-06, %v2120_v41  ;;  %v2160_v36 = vmul.f32 2.4801588e-05, %v2120_v41  ;;  %v2155_v18 = vmul.f32 %v2151_v9, %v3988_v28  ;;  %v2267_v33 = vmul.f32 3.0, %v3930_v30  ;;  %vm2243_vm11 = vmor %vm2207_vm6, %vm2239_vm9 }
 0x20e   :  { %v2282_v34 = vmul.f32 %v2278_v20, %v2274_v42  ;;  %v2097_v43 = vadd.f32 0.5, %v2093_v14  ;;  %vm2227_vm10 = vcmp.ge.f32.partialorder %v2203_v8, 2.0  ;;  %v2200_v7 = vmul.f32 4.0, %v2196_v25 }
 0x20f   :  { %v2128_v1 = vadd.f32 -0.0001984127, %v2124_v61  ;;  %v2164_v50 = vadd.f32 -0.0013888889, %v2160_v36  ;;  %v2219_v56 = vsel %vm2215_vm8, %v2187_v52, %v2155_v18  ;;  %v2223_v45 = vsel %vm2215_vm8, %v2155_v18, %v2187_v52 }
 0x210   :  { %2287 = vst [vmem:[#allocation5 + $0x1c0] sm:$0xff] %v2282_v34  ;;  %v2231_v24 = vsub.f32 0.0, %v2219_v56  ;;  %v2247_v55 = vsub.f32 0.0, %v2223_v45  ;;  %v2279_v28 = vmul.f32 0.04546416, %v3307_v47  ;;  %v2101_v62 = vfloor.f32 %v2097_v43 }
 0x211   :  { %v2132_v22 = vmul.f32 %v2128_v1, %v2120_v41  ;;  %v2168_v49 = vmul.f32 %v2164_v50, %v2120_v41  ;;  %v2204_v54 = vsub.f32 %v4021_v48, %v2200_v7  ;;  %v2256_v31 = vmul.f32 %v3996_v58, %v3996_v58 }
 0x212   :  { %v2235_v17 = vsel %vm2227_vm10, %v2231_v24, %v2219_v56  ;;  %v2251_v30 = vsel %vm2243_vm11, %v2247_v55, %v2223_v45  ;;  %v2105_v13 = vmul.f32 1.5707964, %v2101_v62  ;;  %v2113_v12 = vmul.f32 -4.371139e-08, %v2101_v62 }
 0x213   :  { %v2136_v60 = vadd.f32 0.008333334, %v2132_v22  ;;  %v2172_v0 = vadd.f32 0.041666668, %v2168_v49  ;;  %v2263_v32 = vmul.f32 %v2259_v16, %v2235_v17  ;;  %v2271_v10 = vmul.f32 %v2267_v33, %v2251_v30 }
 0x214   :  { %v2109_v8 = vsub.f32 %v4043_v46, %v2105_v13  ;;  %v2193_v40 = vmul.f32 0.25, %v2101_v62  ;;  %vm2208_vm12 = vcmp.eq.f32.partialorder %v2204_v54, 1.0  ;;  %vm2212_vm13 = vcmp.eq.f32.partialorder %v2204_v54, 3.0 }
 0x215   :  { %v2140_v51 = vmul.f32 %v2136_v60, %v2120_v41  ;;  %v2176_v38 = vmul.f32 %v2172_v0, %v2120_v41  ;;  %v2275_v6 = vsub.f32 %v2263_v32, %v2271_v10  ;;  %vm2216_vm14 = vmor %vm2208_vm12, %vm2212_vm13  ;;  %vm2240_vm15 = vcmp.eq.f32.partialorder %v2204_v54, 2.0 }
 0x216   :  { %v2117_v15 = vsub.f32 %v2109_v8, %v2113_v12  ;;  %v2197_v48 = vfloor.f32 %v2193_v40  ;;  %v2260_v53 = vsub.f32 3.0, %v2256_v31  ;;  %v2268_v21 = vmul.f32 3.0, %v3996_v58  ;;  %vm2244_vm1 = vmor %vm2208_vm12, %vm2240_vm15 }
 0x217   :  { %v2144_v29 = vadd.f32 -0.16666667, %v2140_v51  ;;  %v2180_v27 = vadd.f32 -0.5, %v2176_v38  ;;  %v2283_v47 = vmul.f32 %v2279_v28, %v2275_v6  ;;  %vm2228_vm0 = vcmp.ge.f32.partialorder %v2204_v54, 2.0 }
 0x218   :  { %v2121_v3 = vmul.f32 %v2117_v15, %v2117_v15  ;;  %v2201_v20 = vmul.f32 4.0, %v2197_v48  ;;  %v2280_v58 = vmul.f32 0.04546416, %v3397_v5  ;;  %v2257_v24 = vmul.f32 %v4043_v46, %v4043_v46 }
 0x219   :  { %v2148_v39 = vmul.f32 %v2144_v29, %v2120_v41  ;;  %v2184_v35 = vmul.f32 %v2180_v27, %v2120_v41  ;;  %2288 = vst [vmem:[#allocation5 + $0x1c8] sm:$0xff] %v2283_v47  ;;  %v2269_v17 = vmul.f32 3.0, %v4043_v46  ;;  %v2281_v12 = vmul.f32 0.04546416, %v3408_v4 }
 0x21a   :  { %v2125_v11 = vmul.f32 2.7557319e-06, %v2121_v3  ;;  %v2161_v59 = vmul.f32 2.4801588e-05, %v2121_v3  ;;  %v2205_v34 = vsub.f32 %v2101_v62, %v2201_v20  ;;  %v2261_v49 = vsub.f32 3.0, %v2257_v24 }
 0x21b   :  { %v2152_v19 = vadd.f32 1.0, %v2148_v39  ;;  %v2188_v44 = vadd.f32 1.0, %v2184_v35 }
 0x21c   :  { %v2129_v2 = vadd.f32 -0.0001984127, %v2125_v11  ;;  %v2165_v23 = vadd.f32 -0.0013888889, %v2161_v59  ;;  %vm2209_vm2 = vcmp.eq.f32.partialorder %v2205_v34, 1.0  ;;  %vm2213_vm3 = vcmp.eq.f32.partialorder %v2205_v34, 3.0 }
 0x21d   :  { %v2156_v63 = vmul.f32 %v2152_v19, %v4040_v57  ;;  %vm2217_vm4 = vmor %vm2209_vm2, %vm2213_vm3  ;;  %vm2241_vm5 = vcmp.eq.f32.partialorder %v2205_v34, 2.0  ;;  %vm2229_vm6 = vcmp.ge.f32.partialorder %v2205_v34, 2.0 }
 0x21e   :  { %v2133_v52 = vmul.f32 %v2129_v2, %v2121_v3  ;;  %v2169_v25 = vmul.f32 %v2165_v23, %v2121_v3  ;;  %vm2245_vm7 = vmor %vm2209_vm2, %vm2241_vm5 }
 0x21f   :  { %v2220_v26 = vsel %vm2216_vm14, %v2188_v44, %v2156_v63  ;;  %v2224_v37 = vsel %vm2216_vm14, %v2156_v63, %v2188_v44 }
 0x220   :  { %v2232_v41 = vsub.f32 0.0, %v2220_v26  ;;  %v2248_v9 = vsub.f32 0.0, %v2224_v37  ;;  %v2137_v61 = vadd.f32 0.008333334, %v2133_v52  ;;  %v2173_v36 = vadd.f32 0.041666668, %v2169_v25 }
 0x222   :  { %v2236_v14 = vsel %vm2228_vm0, %v2232_v41, %v2220_v26  ;;  %v2252_v42 = vsel %vm2244_vm1, %v2248_v9, %v2224_v37  ;;  %v2141_v16 = vmul.f32 %v2137_v61, %v2121_v3  ;;  %v2177_v33 = vmul.f32 %v2173_v36, %v2121_v3 }
 0x223   :  { %v2264_v57 = vmul.f32 %v2260_v53, %v2236_v14  ;;  %v2272_v18 = vmul.f32 %v2268_v21, %v2252_v42 }
 0x224   :  { %v2145_v50 = vadd.f32 -0.16666667, %v2141_v16  ;;  %v2181_v43 = vadd.f32 -0.5, %v2177_v33 }
 0x225   :  { %v2276_v1 = vsub.f32 %v2264_v57, %v2272_v18 }
 0x226   :  { %v2149_v45 = vmul.f32 %v2145_v50, %v2121_v3  ;;  %v2185_v7 = vmul.f32 %v2181_v43, %v2121_v3 }
 0x227   :  { %v2284_v56 = vmul.f32 %v2280_v58, %v2276_v1 }
 0x228   :  { %v2153_v55 = vadd.f32 1.0, %v2149_v45  ;;  %v2189_v22 = vadd.f32 1.0, %v2185_v7 }
 0x229   :  { %2289 = vst [vmem:[#allocation5 + $0x1d0] sm:$0xff] %v2284_v56 }
 0x22a   :  { %v2157_v5 = vmul.f32 %v2153_v55, %v2117_v15 }
 0x22c   :  { %v2221_v28 = vsel %vm2217_vm4, %v2189_v22, %v2157_v5  ;;  %v2225_v62 = vsel %vm2217_vm4, %v2157_v5, %v2189_v22 }
 0x22d   :  { %v2233_v30 = vsub.f32 0.0, %v2221_v28  ;;  %v2249_v60 = vsub.f32 0.0, %v2225_v62 }
 0x22f   :  { %v2237_v0 = vsel %vm2229_vm6, %v2233_v30, %v2221_v28  ;;  %v2253_v32 = vsel %vm2245_vm7, %v2249_v60, %v2225_v62 }
 0x230   :  { %v2265_v10 = vmul.f32 %v2261_v49, %v2237_v0  ;;  %v2273_v13 = vmul.f32 %v2269_v17, %v2253_v32 }
 0x232   :  { %v2277_v51 = vsub.f32 %v2265_v10, %v2273_v13 }
 0x234   :  { %v2285_v38 = vmul.f32 %v2281_v12, %v2277_v51 }
 0x236   :  { %2290 = vst [vmem:[#allocation5 + $0x1d8] sm:$0xff] %v2285_v38 }
 0x237   :  { %2353 = shalt.err (!%p2350_p12)
}
 0x238   :  { %s2354_s22 = scalar_lea.hbm %s4085_s1, 7680 }
 0x239   :  { %p2355_p13 = scmp.ne.s32.totalorder %s4085_s1, %s2354_s22  ;;  %p2358_p0 = scmp.lt.u32.totalorder %s2354_s22, %s4085_s1 }
 0x23b   :  { %p2360_p1 = pnand %p2358_p0, %p2355_p13 }
 0x23d   :  { %2363 = shalt.err (!%p2360_p1)
}
 0x23e   :  { %s2370_s27 = smov 512   ;;  %s2371_s28 = smov 32  }
 0x23f   :  { %2302 = dma.vmem_to_hbm [thread:$0]  %s2297_s18, 7680, %s4085_s1, [#allocation4], %s2370_s27, %s2370_s27, %s2371_s28  }
 0x240   :  { %2366 = dma.done.wait [#allocation4], 7680  }
 0x241   :  { %2367 = vsyncadd [#allocation4], 4294959616 }
 0x242   :  { %2306 = vsyncpa [#allocation3], 1 }
 0x243   :  { %2307 = vsyncpa [#allocation4], 1 }

</bundles_post_ra>
